<compile_context>
chip_gen: v7x
topology: tpu7x:2x2x1
jax: 0.10.0
libtpu: 0.0.40
codegen_flags: <defaults>
</compile_context>

<pallas_src>
import functools

import jax
import jax.numpy as jnp
from jax.experimental import pallas as pl
from jax.experimental.pallas import tpu as pltpu


_LANES = 128     # pad output channels to this -> lane-dense stores
_TM_CAP = 1024   # max row tile


# ----------------------------- Pallas kernels ------------------------------

def _apply_act(y, act):
    if act == "leaky":
        return jnp.where(y > 0, y, 0.2 * y)
    if act == "sigmoid":
        return 1.0 / (1.0 + jnp.exp(-y))
    return y


def _conv_act_kernel(p_ref, w_ref, o_ref, *, act):
    # p: (tm, K) bf16   w: (K, Cp) bf16   o: (tm, Cp)
    y = jnp.dot(p_ref[...], w_ref[...], preferred_element_type=jnp.float32)
    o_ref[...] = _apply_act(y, act).astype(o_ref.dtype)


def _conv_bn_act_kernel(p_ref, w_ref, g_ref, b_ref, o_ref, *, act, eps, inv_m):
    # Whole layer in one tile: conv, batch statistics, normalize, activation.
    # p: (Mp, K) bf16  w: (K, Cp) bf16  g,b: (1, Cp) f32  o: (Mp, Cp)
    y = jnp.dot(p_ref[...], w_ref[...], preferred_element_type=jnp.float32)
    mean = jnp.sum(y, axis=0, keepdims=True) * inv_m                  # (1, Cp)
    var = jnp.sum(y * y, axis=0, keepdims=True) * inv_m - mean * mean  # biased
    scale = g_ref[...] * jax.lax.rsqrt(var + eps)
    shift = b_ref[...] - mean * scale
    o_ref[...] = _apply_act(y * scale + shift, act).astype(o_ref.dtype)


# ------------------------------ glue helpers --------------------------------

def _round_up(x, m):
    return (x + m - 1) // m * m


def _pick_tm(m):
    if m <= _TM_CAP:
        return m
    for t in (1024, 512, 256, 128, 64, 32, 16, 8):
        if m % t == 0:
            return t
    return m  # fall back to a single (possibly large) block


def im2col(x, k, stride, pad):
    """x: (N,H,W,C) -> (N*Hout*Wout, k*k*C), feature order (kh, kw, c)."""
    n, h, w, c = x.shape
    if pad:
        x = jnp.pad(x, ((0, 0), (pad, pad), (pad, pad), (0, 0)))
    hout = (h + 2 * pad - k) // stride + 1
    wout = (w + 2 * pad - k) // stride + 1
    cols = []
    for kh in range(k):
        for kw in range(k):
            h_stop = kh + (hout - 1) * stride + 1
            w_stop = kw + (wout - 1) * stride + 1
            cols.append(x[:, kh:h_stop:stride, kw:w_stop:stride, :])
    patches = jnp.concatenate(cols, axis=-1)
    return patches.reshape(n * hout * wout, k * k * c), hout, wout


def prep_weight(w_oihw, cp=_LANES):
    """(Cout,Cin,kh,kw) -> (kh*kw*Cin, Cp) bf16, Cout zero-padded to Cp."""
    cout, cin, kh, kw = w_oihw.shape
    mat = jnp.transpose(w_oihw, (2, 3, 1, 0)).reshape(kh * kw * cin, cout)
    mat = jnp.pad(mat, ((0, 0), (0, cp - cout)))
    return mat.astype(jnp.bfloat16)


def _pad_param(v, cp=_LANES):
    """(C,) -> (1, Cp) f32, zero padded (padded channels stay exactly 0)."""
    return jnp.pad(v.reshape(1, -1),
                   ((0, 0), (0, cp - v.shape[0]))).astype(jnp.float32)


# ------------------------------ layer wrappers -------------------------------

def conv_act_layer(x_nhwc, w_oihw, *, stride, pad, act,
                   out_dtype=jnp.bfloat16):
    n = x_nhwc.shape[0]
    cout, _, k, _ = w_oihw.shape
    w_mat = prep_weight(w_oihw)
    kdim, cp = w_mat.shape
    patches, hout, wout = im2col(x_nhwc, k, stride, pad)
    m = patches.shape[0]
    m_pad = _round_up(m, 8)
    if m_pad != m:
        patches = jnp.pad(patches, ((0, m_pad - m), (0, 0)))
    tm = _pick_tm(m_pad)
    out = pl.pallas_call(
        functools.partial(_conv_act_kernel, act=act),
        out_shape=jax.ShapeDtypeStruct((m_pad, cp), out_dtype),
        grid=(m_pad // tm,),
        in_specs=[
            pl.BlockSpec((tm, kdim), lambda i: (i, 0)),
            pl.BlockSpec((kdim, cp), lambda i: (0, 0)),
        ],
        out_specs=pl.BlockSpec((tm, cp), lambda i: (i, 0)),
        compiler_params=pltpu.CompilerParams(
            dimension_semantics=("parallel",)),
    )(patches, w_mat)
    return out[:m, :cout].reshape(n, hout, wout, cout)


def conv_bn_act_layer(x_nhwc, w_oihw, gamma, beta, *, eps=1e-5,
                      out_dtype=jnp.bfloat16):
    n = x_nhwc.shape[0]
    cout, _, k, _ = w_oihw.shape
    w_mat = prep_weight(w_oihw)
    kdim, cp = w_mat.shape
    patches, hout, wout = im2col(x_nhwc, k, 2, 1)
    m = patches.shape[0]
    m_pad = _round_up(m, 8)
    if m_pad != m:
        # Padded rows are exact zeros -> their conv output is 0 -> they add
        # nothing to sum/sumsq, so batch stats stay exact with inv_m = 1/m.
        patches = jnp.pad(patches, ((0, m_pad - m), (0, 0)))
    g2 = _pad_param(gamma)
    b2 = _pad_param(beta)
    # Whole layer as one tile so train-mode batch stats live in VMEM.
    # TODO(synk): add a two-pass (grid-accumulated stats) path for layers whose
    # patch matrix does not fit a single VMEM tile (not needed at these sizes).
    out = pl.pallas_call(
        functools.partial(_conv_bn_act_kernel, act="leaky",
                          eps=eps, inv_m=1.0 / m),
        out_shape=jax.ShapeDtypeStruct((m_pad, cp), out_dtype),
        grid=(1,),
        in_specs=[
            pl.BlockSpec((m_pad, kdim), lambda i: (0, 0)),
            pl.BlockSpec((kdim, cp), lambda i: (0, 0)),
            pl.BlockSpec((1, cp), lambda i: (0, 0)),
            pl.BlockSpec((1, cp), lambda i: (0, 0)),
        ],
        out_specs=pl.BlockSpec((m_pad, cp), lambda i: (0, 0)),
        compiler_params=pltpu.CompilerParams(
            dimension_semantics=("arbitrary",)),
    )(patches, w_mat, g2, b2)
    return out[:m, :cout].reshape(n, hout, wout, cout)


# ----------------------------- discriminator --------------------------------

def init_params(key, fms):
    ks = jax.random.split(key, 12)

    def w(k, shape):
        return 0.02 * jax.random.normal(k, shape, dtype=jnp.float32)

    return {
        "w1": w(ks[0], (fms, 3, 4, 4)),
        "w2": w(ks[1], (fms * 2, fms, 4, 4)),
        "w3": w(ks[2], (fms * 4, fms * 2, 4, 4)),
        "w4": w(ks[3], (fms * 8, fms * 4, 4, 4)),
        "w5": w(ks[4], (1, fms * 8, 4, 4)),
        "g2": 1.0 + 0.02 * jax.random.normal(ks[5], (fms * 2,), jnp.float32),
        "b2": 0.02 * jax.random.normal(ks[6], (fms * 2,), jnp.float32),
        "g3": 1.0 + 0.02 * jax.random.normal(ks[7], (fms * 4,), jnp.float32),
        "b3": 0.02 * jax.random.normal(ks[8], (fms * 4,), jnp.float32),
        "g4": 1.0 + 0.02 * jax.random.normal(ks[9], (fms * 8,), jnp.float32),
        "b4": 0.02 * jax.random.normal(ks[10], (fms * 8,), jnp.float32),
    }


def discriminator_forward(x_nchw, params, eps=1e-5):
    # NCHW (PyTorch) -> NHWC bf16 internally -> NCHW output.
    x = jnp.transpose(x_nchw, (0, 2, 3, 1)).astype(jnp.bfloat16)

    # Conv(3->fms, 4, 2, 1) + LeakyReLU(0.2)
    x = conv_act_layer(x, params["w1"], stride=2, pad=1, act="leaky")
    # Conv + BatchNorm(train-mode batch stats) + LeakyReLU, fully fused.
    x = conv_bn_act_layer(x, params["w2"], params["g2"], params["b2"], eps=eps)
    x = conv_bn_act_layer(x, params["w3"], params["g3"], params["b3"], eps=eps)
    x = conv_bn_act_layer(x, params["w4"], params["g4"], params["b4"], eps=eps)
    # Conv(8*fms -> 1, 4, 1, 0) + Sigmoid
    y = conv_act_layer(x, params["w5"], stride=1, pad=0, act="sigmoid",
                       out_dtype=jnp.float32)
    return jnp.transpose(y, (0, 3, 1, 2))  # (N, 1, 1, 1)


# -------------------------- pure-JAX reference -------------------------------

def reference_forward(x_nchw, params, eps=1e-5):
    def conv(x, w, stride, pad):
        return jax.lax.conv_general_dilated(
            x, w, (stride, stride), [(pad, pad), (pad, pad)],
            dimension_numbers=("NCHW", "OIHW", "NCHW"))

    def leaky(x):
        return jnp.where(x > 0, x, 0.2 * x)

    def bn(x, g, b):
        mean = jnp.mean(x, axis=(0, 2, 3), keepdims=True)
        var = jnp.var(x, axis=(0, 2, 3), keepdims=True)  # biased, train mode
        return ((x - mean) * jax.lax.rsqrt(var + eps)
                * g.reshape(1, -1, 1, 1) + b.reshape(1, -1, 1, 1))

    x = leaky(conv(x_nchw, params["w1"], 2, 1))
    x = leaky(bn(conv(x, params["w2"], 2, 1), params["g2"], params["b2"]))
    x = leaky(bn(conv(x, params["w3"], 2, 1), params["g3"], params["b3"]))
    x = leaky(bn(conv(x, params["w4"], 2, 1), params["g4"], params["b4"]))
    x = conv(x, params["w5"], 1, 0)
    return 1.0 / (1.0 + jnp.exp(-x))


# ---------------------------------- main -------------------------------------

if __name__ == "__main__":
    fms = 8          # feature_map_size (small)
    batch = 2
    key = jax.random.PRNGKey(0)
    kx, kp = jax.random.split(key)

    # DCGAN discriminator needs 64x64 RGB input to reach the final 1x1 output.
    x = jax.random.normal(kx, (batch, 3, 64, 64), dtype=jnp.float32)
    params = init_params(kp, fms)

    out = jax.block_until_ready(jax.jit(discriminator_forward)(x, params))

    assert out.shape == (batch, 1, 1, 1), out.shape
    assert bool(jnp.all(jnp.isfinite(out)))
    assert bool(jnp.all((out >= 0.0) & (out <= 1.0)))  # sigmoid range

    # Numerical check against a pure-JAX f32 reference (bf16 MXU drift budget).
    ref = jax.block_until_ready(jax.jit(reference_forward)(x, params))
    max_err = float(jnp.max(jnp.abs(out - ref.reshape(out.shape))))
    assert max_err < 5e-2, max_err

    print("KERNEL_OK")
</pallas_src>

<mosaic_0001>
module attributes {stable_mosaic.version = 11 : i64} {
  func.func @_conv_act_kernel(%arg0: i32, %arg1: memref<1024x48xbf16, #tpu.memory_space<vmem>>, %arg2: memref<48x128xbf16, #tpu.memory_space<vmem>>, %arg3: memref<1024x128xbf16, #tpu.memory_space<vmem>>) attributes {dimension_semantics = [#tpu.dimension_semantics<parallel>], iteration_bounds = array<i64: 2>, scalar_prefetch = 0 : i64, scratch_operands = 0 : i64, tpu.core_type = #tpu.core_type<tc>, window_params = [{transform_indices = @transform_0, window_bounds = array<i64: 1024, 48>}, {pipeline_mode = #tpu.pipeline_mode<synchronous>, transform_indices = @transform_1, window_bounds = array<i64: 48, 128>}, {transform_indices = @transform_2, window_bounds = array<i64: 1024, 128>}]} {
    %c0 = arith.constant 0 : index
    %c0_0 = arith.constant 0 : index
    %0 = vector.load %arg1[%c0, %c0_0] : memref<1024x48xbf16, #tpu.memory_space<vmem>>, vector<1024x48xbf16>
    %c0_1 = arith.constant 0 : index
    %c0_2 = arith.constant 0 : index
    %1 = vector.load %arg2[%c0_1, %c0_2] : memref<48x128xbf16, #tpu.memory_space<vmem>>, vector<48x128xbf16>
    %cst = arith.constant dense<0.000000e+00> : vector<1024x128xf32>
    %2 = tpu.matmul %0, %1, %cst {dimension_numbers = #tpu.dot_dimension_numbers<[1], [0], [0], [1], [0, 0, 1, 1], [], []>} : vector<1024x48xbf16>, vector<48x128xbf16>, vector<1024x128xf32> -> vector<1024x128xf32>
    %cst_3 = arith.constant 0.000000e+00 : f32
    %3 = vector.broadcast %cst_3 : f32 to vector<1024x128xf32>
    %4 = arith.cmpf ogt, %2, %3 : vector<1024x128xf32>
    %cst_4 = arith.constant 2.000000e-01 : f32
    %5 = vector.broadcast %cst_4 : f32 to vector<1024x128xf32>
    %6 = arith.mulf %5, %2 : vector<1024x128xf32>
    %7 = arith.select %4, %2, %6 : vector<1024x128xi1>, vector<1024x128xf32>
    %8 = arith.truncf %7 : vector<1024x128xf32> to vector<1024x128xbf16>
    %c0_5 = arith.constant 0 : index
    %c0_6 = arith.constant 0 : index
    %9 = vector.load %arg3[%c0_5, %c0_6] : memref<1024x128xbf16, #tpu.memory_space<vmem>>, vector<1024x128xbf16>
    tpu.vector_store %arg3[%c0_5, %c0_6], %8 {strides = array<i32>} : memref<1024x128xbf16, #tpu.memory_space<vmem>>, vector<1024x128xbf16>,
    return
  }
  func.func @transform_0(%arg0: i32) -> (i32, i32) {
    %c0_i32 = arith.constant 0 : i32
    %c0_i32_0 = arith.constant 0 : i32
    return %arg0, %c0_i32 : i32, i32
  }
  func.func @transform_1(%arg0: i32) -> (i32, i32) {
    %c0_i32 = arith.constant 0 : i32
    %c0_i32_0 = arith.constant 0 : i32
    %c0_i32_1 = arith.constant 0 : i32
    return %c0_i32, %c0_i32_0 : i32, i32
  }
  func.func @transform_2(%arg0: i32) -> (i32, i32) {
    %c0_i32 = arith.constant 0 : i32
    %c0_i32_0 = arith.constant 0 : i32
    return %arg0, %c0_i32 : i32, i32
  }
}

module attributes {stable_mosaic.version = 11 : i64} {
  func.func @_conv_bn_act_kernel(%arg0: i32, %arg1: memref<512x128xbf16, #tpu.memory_space<vmem>>, %arg2: memref<128x128xbf16, #tpu.memory_space<vmem>>, %arg3: memref<1x128xf32, #tpu.memory_space<vmem>>, %arg4: memref<1x128xf32, #tpu.memory_space<vmem>>, %arg5: memref<512x128xbf16, #tpu.memory_space<vmem>>) attributes {dimension_semantics = [#tpu.dimension_semantics<arbitrary>], iteration_bounds = array<i64: 1>, scalar_prefetch = 0 : i64, scratch_operands = 0 : i64, tpu.core_type = #tpu.core_type<tc>, window_params = [{pipeline_mode = #tpu.pipeline_mode<synchronous>, transform_indices = @transform_0, window_bounds = array<i64: 512, 128>}, {pipeline_mode = #tpu.pipeline_mode<synchronous>, transform_indices = @transform_1, window_bounds = array<i64: 128, 128>}, {pipeline_mode = #tpu.pipeline_mode<synchronous>, transform_indices = @transform_2, window_bounds = array<i64: 1, 128>}, {pipeline_mode = #tpu.pipeline_mode<synchronous>, transform_indices = @transform_3, window_bounds = array<i64: 1, 128>}, {pipeline_mode = #tpu.pipeline_mode<synchronous>, transform_indices = @transform_4, window_bounds = array<i64: 512, 128>}]} {
    %c0 = arith.constant 0 : index
    %c0_0 = arith.constant 0 : index
    %0 = vector.load %arg1[%c0, %c0_0] : memref<512x128xbf16, #tpu.memory_space<vmem>>, vector<512x128xbf16>
    %c0_1 = arith.constant 0 : index
    %c0_2 = arith.constant 0 : index
    %1 = vector.load %arg2[%c0_1, %c0_2] : memref<128x128xbf16, #tpu.memory_space<vmem>>, vector<128x128xbf16>
    %cst = arith.constant dense<0.000000e+00> : vector<512x128xf32>
    %2 = tpu.matmul %0, %1, %cst {dimension_numbers = #tpu.dot_dimension_numbers<[1], [0], [0], [1], [0, 0, 1, 1], [], []>} : vector<512x128xbf16>, vector<128x128xbf16>, vector<512x128xf32> -> vector<512x128xf32>
    %cst_3 = arith.constant dense<0.000000e+00> : vector<128xf32>
    %3 = vector.multi_reduction <add>, %2, %cst_3 [0] : vector<512x128xf32> to vector<128xf32>
    %4 = vector.shape_cast %3 : vector<128xf32> to vector<1x128xf32>
    %cst_4 = arith.constant 0.001953125 : f32
    %5 = vector.broadcast %cst_4 : f32 to vector<1x128xf32>
    %6 = arith.mulf %4, %5 : vector<1x128xf32>
    %7 = arith.mulf %2, %2 : vector<512x128xf32>
    %cst_5 = arith.constant dense<0.000000e+00> : vector<128xf32>
    %8 = vector.multi_reduction <add>, %7, %cst_5 [0] : vector<512x128xf32> to vector<128xf32>
    %9 = vector.shape_cast %8 : vector<128xf32> to vector<1x128xf32>
    %cst_6 = arith.constant 0.001953125 : f32
    %10 = vector.broadcast %cst_6 : f32 to vector<1x128xf32>
    %11 = arith.mulf %9, %10 : vector<1x128xf32>
    %12 = arith.mulf %6, %6 : vector<1x128xf32>
    %13 = arith.subf %11, %12 : vector<1x128xf32>
    %c0_7 = arith.constant 0 : index
    %c0_8 = arith.constant 0 : index
    %14 = vector.load %arg3[%c0_7, %c0_8] : memref<1x128xf32, #tpu.memory_space<vmem>>, vector<1x128xf32>
    %cst_9 = arith.constant 9.99999974E-6 : f32
    %15 = vector.broadcast %cst_9 : f32 to vector<1x128xf32>
    %16 = arith.addf %13, %15 : vector<1x128xf32>
    %17 = math.rsqrt %16 : vector<1x128xf32>
    %18 = arith.mulf %14, %17 : vector<1x128xf32>
    %c0_10 = arith.constant 0 : index
    %c0_11 = arith.constant 0 : index
    %19 = vector.load %arg4[%c0_10, %c0_11] : memref<1x128xf32, #tpu.memory_space<vmem>>, vector<1x128xf32>
    %20 = arith.mulf %6, %18 : vector<1x128xf32>
    %21 = arith.subf %19, %20 : vector<1x128xf32>
    %22 = vector.broadcast %18 : vector<1x128xf32> to vector<512x128xf32>
    %23 = arith.mulf %2, %22 : vector<512x128xf32>
    %24 = vector.broadcast %21 : vector<1x128xf32> to vector<512x128xf32>
    %25 = arith.addf %23, %24 : vector<512x128xf32>
    %cst_12 = arith.constant 0.000000e+00 : f32
    %26 = vector.broadcast %cst_12 : f32 to vector<512x128xf32>
    %27 = arith.cmpf ogt, %25, %26 : vector<512x128xf32>
    %cst_13 = arith.constant 2.000000e-01 : f32
    %28 = vector.broadcast %cst_13 : f32 to vector<512x128xf32>
    %29 = arith.mulf %28, %25 : vector<512x128xf32>
    %30 = arith.select %27, %25, %29 : vector<512x128xi1>, vector<512x128xf32>
    %31 = arith.truncf %30 : vector<512x128xf32> to vector<512x128xbf16>
    %c0_14 = arith.constant 0 : index
    %c0_15 = arith.constant 0 : index
    %32 = vector.load %arg5[%c0_14, %c0_15] : memref<512x128xbf16, #tpu.memory_space<vmem>>, vector<512x128xbf16>
    tpu.vector_store %arg5[%c0_14, %c0_15], %31 {strides = array<i32>} : memref<512x128xbf16, #tpu.memory_space<vmem>>, vector<512x128xbf16>,
    return
  }
  func.func @transform_0(%arg0: i32) -> (i32, i32) {
    %c0_i32 = arith.constant 0 : i32
    %c0_i32_0 = arith.constant 0 : i32
    %c0_i32_1 = arith.constant 0 : i32
    return %c0_i32, %c0_i32_0 : i32, i32
  }
  func.func @transform_1(%arg0: i32) -> (i32, i32) {
    %c0_i32 = arith.constant 0 : i32
    %c0_i32_0 = arith.constant 0 : i32
    %c0_i32_1 = arith.constant 0 : i32
    return %c0_i32, %c0_i32_0 : i32, i32
  }
  func.func @transform_2(%arg0: i32) -> (i32, i32) {
    %c0_i32 = arith.constant 0 : i32
    %c0_i32_0 = arith.constant 0 : i32
    %c0_i32_1 = arith.constant 0 : i32
    return %c0_i32, %c0_i32_0 : i32, i32
  }
  func.func @transform_3(%arg0: i32) -> (i32, i32) {
    %c0_i32 = arith.constant 0 : i32
    %c0_i32_0 = arith.constant 0 : i32
    %c0_i32_1 = arith.constant 0 : i32
    return %c0_i32, %c0_i32_0 : i32, i32
  }
  func.func @transform_4(%arg0: i32) -> (i32, i32) {
    %c0_i32 = arith.constant 0 : i32
    %c0_i32_0 = arith.constant 0 : i32
    %c0_i32_1 = arith.constant 0 : i32
    return %c0_i32, %c0_i32_0 : i32, i32
  }
}

module attributes {stable_mosaic.version = 11 : i64} {
  func.func @_conv_bn_act_kernel(%arg0: i32, %arg1: memref<128x256xbf16, #tpu.memory_space<vmem>>, %arg2: memref<256x128xbf16, #tpu.memory_space<vmem>>, %arg3: memref<1x128xf32, #tpu.memory_space<vmem>>, %arg4: memref<1x128xf32, #tpu.memory_space<vmem>>, %arg5: memref<128x128xbf16, #tpu.memory_space<vmem>>) attributes {dimension_semantics = [#tpu.dimension_semantics<arbitrary>], iteration_bounds = array<i64: 1>, scalar_prefetch = 0 : i64, scratch_operands = 0 : i64, tpu.core_type = #tpu.core_type<tc>, window_params = [{pipeline_mode = #tpu.pipeline_mode<synchronous>, transform_indices = @transform_0, window_bounds = array<i64: 128, 256>}, {pipeline_mode = #tpu.pipeline_mode<synchronous>, transform_indices = @transform_1, window_bounds = array<i64: 256, 128>}, {pipeline_mode = #tpu.pipeline_mode<synchronous>, transform_indices = @transform_2, window_bounds = array<i64: 1, 128>}, {pipeline_mode = #tpu.pipeline_mode<synchronous>, transform_indices = @transform_3, window_bounds = array<i64: 1, 128>}, {pipeline_mode = #tpu.pipeline_mode<synchronous>, transform_indices = @transform_4, window_bounds = array<i64: 128, 128>}]} {
    %c0 = arith.constant 0 : index
    %c0_0 = arith.constant 0 : index
    %0 = vector.load %arg1[%c0, %c0_0] : memref<128x256xbf16, #tpu.memory_space<vmem>>, vector<128x256xbf16>
    %c0_1 = arith.constant 0 : index
    %c0_2 = arith.constant 0 : index
    %1 = vector.load %arg2[%c0_1, %c0_2] : memref<256x128xbf16, #tpu.memory_space<vmem>>, vector<256x128xbf16>
    %cst = arith.constant dense<0.000000e+00> : vector<128x128xf32>
    %2 = tpu.matmul %0, %1, %cst {dimension_numbers = #tpu.dot_dimension_numbers<[1], [0], [0], [1], [0, 0, 1, 1], [], []>} : vector<128x256xbf16>, vector<256x128xbf16>, vector<128x128xf32> -> vector<128x128xf32>
    %cst_3 = arith.constant dense<0.000000e+00> : vector<128xf32>
    %3 = vector.multi_reduction <add>, %2, %cst_3 [0] : vector<128x128xf32> to vector<128xf32>
    %4 = vector.shape_cast %3 : vector<128xf32> to vector<1x128xf32>
    %cst_4 = arith.constant 7.812500e-03 : f32
    %5 = vector.broadcast %cst_4 : f32 to vector<1x128xf32>
    %6 = arith.mulf %4, %5 : vector<1x128xf32>
    %7 = arith.mulf %2, %2 : vector<128x128xf32>
    %cst_5 = arith.constant dense<0.000000e+00> : vector<128xf32>
    %8 = vector.multi_reduction <add>, %7, %cst_5 [0] : vector<128x128xf32> to vector<128xf32>
    %9 = vector.shape_cast %8 : vector<128xf32> to vector<1x128xf32>
    %cst_6 = arith.constant 7.812500e-03 : f32
    %10 = vector.broadcast %cst_6 : f32 to vector<1x128xf32>
    %11 = arith.mulf %9, %10 : vector<1x128xf32>
    %12 = arith.mulf %6, %6 : vector<1x128xf32>
    %13 = arith.subf %11, %12 : vector<1x128xf32>
    %c0_7 = arith.constant 0 : index
    %c0_8 = arith.constant 0 : index
    %14 = vector.load %arg3[%c0_7, %c0_8] : memref<1x128xf32, #tpu.memory_space<vmem>>, vector<1x128xf32>
    %cst_9 = arith.constant 9.99999974E-6 : f32
    %15 = vector.broadcast %cst_9 : f32 to vector<1x128xf32>
    %16 = arith.addf %13, %15 : vector<1x128xf32>
    %17 = math.rsqrt %16 : vector<1x128xf32>
    %18 = arith.mulf %14, %17 : vector<1x128xf32>
    %c0_10 = arith.constant 0 : index
    %c0_11 = arith.constant 0 : index
    %19 = vector.load %arg4[%c0_10, %c0_11] : memref<1x128xf32, #tpu.memory_space<vmem>>, vector<1x128xf32>
    %20 = arith.mulf %6, %18 : vector<1x128xf32>
    %21 = arith.subf %19, %20 : vector<1x128xf32>
    %22 = vector.broadcast %18 : vector<1x128xf32> to vector<128x128xf32>
    %23 = arith.mulf %2, %22 : vector<128x128xf32>
    %24 = vector.broadcast %21 : vector<1x128xf32> to vector<128x128xf32>
    %25 = arith.addf %23, %24 : vector<128x128xf32>
    %cst_12 = arith.constant 0.000000e+00 : f32
    %26 = vector.broadcast %cst_12 : f32 to vector<128x128xf32>
    %27 = arith.cmpf ogt, %25, %26 : vector<128x128xf32>
    %cst_13 = arith.constant 2.000000e-01 : f32
    %28 = vector.broadcast %cst_13 : f32 to vector<128x128xf32>
    %29 = arith.mulf %28, %25 : vector<128x128xf32>
    %30 = arith.select %27, %25, %29 : vector<128x128xi1>, vector<128x128xf32>
    %31 = arith.truncf %30 : vector<128x128xf32> to vector<128x128xbf16>
    %c0_14 = arith.constant 0 : index
    %c0_15 = arith.constant 0 : index
    %32 = vector.load %arg5[%c0_14, %c0_15] : memref<128x128xbf16, #tpu.memory_space<vmem>>, vector<128x128xbf16>
    tpu.vector_store %arg5[%c0_14, %c0_15], %31 {strides = array<i32>} : memref<128x128xbf16, #tpu.memory_space<vmem>>, vector<128x128xbf16>,
    return
  }
  func.func @transform_0(%arg0: i32) -> (i32, i32) {
    %c0_i32 = arith.constant 0 : i32
    %c0_i32_0 = arith.constant 0 : i32
    %c0_i32_1 = arith.constant 0 : i32
    return %c0_i32, %c0_i32_0 : i32, i32
  }
  func.func @transform_1(%arg0: i32) -> (i32, i32) {
    %c0_i32 = arith.constant 0 : i32
    %c0_i32_0 = arith.constant 0 : i32
    %c0_i32_1 = arith.constant 0 : i32
    return %c0_i32, %c0_i32_0 : i32, i32
  }
  func.func @transform_2(%arg0: i32) -> (i32, i32) {
    %c0_i32 = arith.constant 0 : i32
    %c0_i32_0 = arith.constant 0 : i32
    %c0_i32_1 = arith.constant 0 : i32
    return %c0_i32, %c0_i32_0 : i32, i32
  }
  func.func @transform_3(%arg0: i32) -> (i32, i32) {
    %c0_i32 = arith.constant 0 : i32
    %c0_i32_0 = arith.constant 0 : i32
    %c0_i32_1 = arith.constant 0 : i32
    return %c0_i32, %c0_i32_0 : i32, i32
  }
  func.func @transform_4(%arg0: i32) -> (i32, i32) {
    %c0_i32 = arith.constant 0 : i32
    %c0_i32_0 = arith.constant 0 : i32
    %c0_i32_1 = arith.constant 0 : i32
    return %c0_i32, %c0_i32_0 : i32, i32
  }
}

module attributes {stable_mosaic.version = 11 : i64} {
  func.func @_conv_bn_act_kernel(%arg0: i32, %arg1: memref<32x512xbf16, #tpu.memory_space<vmem>>, %arg2: memref<512x128xbf16, #tpu.memory_space<vmem>>, %arg3: memref<1x128xf32, #tpu.memory_space<vmem>>, %arg4: memref<1x128xf32, #tpu.memory_space<vmem>>, %arg5: memref<32x128xbf16, #tpu.memory_space<vmem>>) attributes {dimension_semantics = [#tpu.dimension_semantics<arbitrary>], iteration_bounds = array<i64: 1>, scalar_prefetch = 0 : i64, scratch_operands = 0 : i64, tpu.core_type = #tpu.core_type<tc>, window_params = [{pipeline_mode = #tpu.pipeline_mode<synchronous>, transform_indices = @transform_0, window_bounds = array<i64: 32, 512>}, {pipeline_mode = #tpu.pipeline_mode<synchronous>, transform_indices = @transform_1, window_bounds = array<i64: 512, 128>}, {pipeline_mode = #tpu.pipeline_mode<synchronous>, transform_indices = @transform_2, window_bounds = array<i64: 1, 128>}, {pipeline_mode = #tpu.pipeline_mode<synchronous>, transform_indices = @transform_3, window_bounds = array<i64: 1, 128>}, {pipeline_mode = #tpu.pipeline_mode<synchronous>, transform_indices = @transform_4, window_bounds = array<i64: 32, 128>}]} {
    %c0 = arith.constant 0 : index
    %c0_0 = arith.constant 0 : index
    %0 = vector.load %arg1[%c0, %c0_0] : memref<32x512xbf16, #tpu.memory_space<vmem>>, vector<32x512xbf16>
    %c0_1 = arith.constant 0 : index
    %c0_2 = arith.constant 0 : index
    %1 = vector.load %arg2[%c0_1, %c0_2] : memref<512x128xbf16, #tpu.memory_space<vmem>>, vector<512x128xbf16>
    %cst = arith.constant dense<0.000000e+00> : vector<32x128xf32>
    %2 = tpu.matmul %0, %1, %cst {dimension_numbers = #tpu.dot_dimension_numbers<[1], [0], [0], [1], [0, 0, 1, 1], [], []>} : vector<32x512xbf16>, vector<512x128xbf16>, vector<32x128xf32> -> vector<32x128xf32>
    %cst_3 = arith.constant dense<0.000000e+00> : vector<128xf32>
    %3 = vector.multi_reduction <add>, %2, %cst_3 [0] : vector<32x128xf32> to vector<128xf32>
    %4 = vector.shape_cast %3 : vector<128xf32> to vector<1x128xf32>
    %cst_4 = arith.constant 3.125000e-02 : f32
    %5 = vector.broadcast %cst_4 : f32 to vector<1x128xf32>
    %6 = arith.mulf %4, %5 : vector<1x128xf32>
    %7 = arith.mulf %2, %2 : vector<32x128xf32>
    %cst_5 = arith.constant dense<0.000000e+00> : vector<128xf32>
    %8 = vector.multi_reduction <add>, %7, %cst_5 [0] : vector<32x128xf32> to vector<128xf32>
    %9 = vector.shape_cast %8 : vector<128xf32> to vector<1x128xf32>
    %cst_6 = arith.constant 3.125000e-02 : f32
    %10 = vector.broadcast %cst_6 : f32 to vector<1x128xf32>
    %11 = arith.mulf %9, %10 : vector<1x128xf32>
    %12 = arith.mulf %6, %6 : vector<1x128xf32>
    %13 = arith.subf %11, %12 : vector<1x128xf32>
    %c0_7 = arith.constant 0 : index
    %c0_8 = arith.constant 0 : index
    %14 = vector.load %arg3[%c0_7, %c0_8] : memref<1x128xf32, #tpu.memory_space<vmem>>, vector<1x128xf32>
    %cst_9 = arith.constant 9.99999974E-6 : f32
    %15 = vector.broadcast %cst_9 : f32 to vector<1x128xf32>
    %16 = arith.addf %13, %15 : vector<1x128xf32>
    %17 = math.rsqrt %16 : vector<1x128xf32>
    %18 = arith.mulf %14, %17 : vector<1x128xf32>
    %c0_10 = arith.constant 0 : index
    %c0_11 = arith.constant 0 : index
    %19 = vector.load %arg4[%c0_10, %c0_11] : memref<1x128xf32, #tpu.memory_space<vmem>>, vector<1x128xf32>
    %20 = arith.mulf %6, %18 : vector<1x128xf32>
    %21 = arith.subf %19, %20 : vector<1x128xf32>
    %22 = vector.broadcast %18 : vector<1x128xf32> to vector<32x128xf32>
    %23 = arith.mulf %2, %22 : vector<32x128xf32>
    %24 = vector.broadcast %21 : vector<1x128xf32> to vector<32x128xf32>
    %25 = arith.addf %23, %24 : vector<32x128xf32>
    %cst_12 = arith.constant 0.000000e+00 : f32
    %26 = vector.broadcast %cst_12 : f32 to vector<32x128xf32>
    %27 = arith.cmpf ogt, %25, %26 : vector<32x128xf32>
    %cst_13 = arith.constant 2.000000e-01 : f32
    %28 = vector.broadcast %cst_13 : f32 to vector<32x128xf32>
    %29 = arith.mulf %28, %25 : vector<32x128xf32>
    %30 = arith.select %27, %25, %29 : vector<32x128xi1>, vector<32x128xf32>
    %31 = arith.truncf %30 : vector<32x128xf32> to vector<32x128xbf16>
    %c0_14 = arith.constant 0 : index
    %c0_15 = arith.constant 0 : index
    %32 = vector.load %arg5[%c0_14, %c0_15] : memref<32x128xbf16, #tpu.memory_space<vmem>>, vector<32x128xbf16>
    tpu.vector_store %arg5[%c0_14, %c0_15], %31 {strides = array<i32>} : memref<32x128xbf16, #tpu.memory_space<vmem>>, vector<32x128xbf16>,
    return
  }
  func.func @transform_0(%arg0: i32) -> (i32, i32) {
    %c0_i32 = arith.constant 0 : i32
    %c0_i32_0 = arith.constant 0 : i32
    %c0_i32_1 = arith.constant 0 : i32
    return %c0_i32, %c0_i32_0 : i32, i32
  }
  func.func @transform_1(%arg0: i32) -> (i32, i32) {
    %c0_i32 = arith.constant 0 : i32
    %c0_i32_0 = arith.constant 0 : i32
    %c0_i32_1 = arith.constant 0 : i32
    return %c0_i32, %c0_i32_0 : i32, i32
  }
  func.func @transform_2(%arg0: i32) -> (i32, i32) {
    %c0_i32 = arith.constant 0 : i32
    %c0_i32_0 = arith.constant 0 : i32
    %c0_i32_1 = arith.constant 0 : i32
    return %c0_i32, %c0_i32_0 : i32, i32
  }
  func.func @transform_3(%arg0: i32) -> (i32, i32) {
    %c0_i32 = arith.constant 0 : i32
    %c0_i32_0 = arith.constant 0 : i32
    %c0_i32_1 = arith.constant 0 : i32
    return %c0_i32, %c0_i32_0 : i32, i32
  }
  func.func @transform_4(%arg0: i32) -> (i32, i32) {
    %c0_i32 = arith.constant 0 : i32
    %c0_i32_0 = arith.constant 0 : i32
    %c0_i32_1 = arith.constant 0 : i32
    return %c0_i32, %c0_i32_0 : i32, i32
  }
}

module attributes {stable_mosaic.version = 11 : i64} {
  func.func @_conv_act_kernel(%arg0: i32, %arg1: memref<8x1024xbf16, #tpu.memory_space<vmem>>, %arg2: memref<1024x128xbf16, #tpu.memory_space<vmem>>, %arg3: memref<8x128xf32, #tpu.memory_space<vmem>>) attributes {dimension_semantics = [#tpu.dimension_semantics<parallel>], iteration_bounds = array<i64: 1>, scalar_prefetch = 0 : i64, scratch_operands = 0 : i64, tpu.core_type = #tpu.core_type<tc>, window_params = [{transform_indices = @transform_0, window_bounds = array<i64: 8, 1024>}, {pipeline_mode = #tpu.pipeline_mode<synchronous>, transform_indices = @transform_1, window_bounds = array<i64: 1024, 128>}, {transform_indices = @transform_2, window_bounds = array<i64: 8, 128>}]} {
    %c0 = arith.constant 0 : index
    %c0_0 = arith.constant 0 : index
    %0 = vector.load %arg1[%c0, %c0_0] : memref<8x1024xbf16, #tpu.memory_space<vmem>>, vector<8x1024xbf16>
    %c0_1 = arith.constant 0 : index
    %c0_2 = arith.constant 0 : index
    %1 = vector.load %arg2[%c0_1, %c0_2] : memref<1024x128xbf16, #tpu.memory_space<vmem>>, vector<1024x128xbf16>
    %cst = arith.constant dense<0.000000e+00> : vector<8x128xf32>
    %2 = tpu.matmul %0, %1, %cst {dimension_numbers = #tpu.dot_dimension_numbers<[1], [0], [0], [1], [0, 0, 1, 1], [], []>} : vector<8x1024xbf16>, vector<1024x128xbf16>, vector<8x128xf32> -> vector<8x128xf32>
    %cst_3 = arith.constant 0.000000e+00 : f32
    %3 = vector.broadcast %cst_3 : f32 to vector<8x128xf32>
    %4 = arith.subf %3, %2 : vector<8x128xf32>
    %5 = math.exp %4 : vector<8x128xf32>
    %cst_4 = arith.constant 1.000000e+00 : f32
    %6 = vector.broadcast %cst_4 : f32 to vector<8x128xf32>
    %7 = arith.addf %6, %5 : vector<8x128xf32>
    %cst_5 = arith.constant 1.000000e+00 : f32
    %8 = vector.broadcast %cst_5 : f32 to vector<8x128xf32>
    %9 = arith.divf %8, %7 : vector<8x128xf32>
    %c0_6 = arith.constant 0 : index
    %c0_7 = arith.constant 0 : index
    %10 = vector.load %arg3[%c0_6, %c0_7] : memref<8x128xf32, #tpu.memory_space<vmem>>, vector<8x128xf32>
    tpu.vector_store %arg3[%c0_6, %c0_7], %9 {strides = array<i32>} : memref<8x128xf32, #tpu.memory_space<vmem>>, vector<8x128xf32>,
    return
  }
  func.func @transform_0(%arg0: i32) -> (i32, i32) {
    %c0_i32 = arith.constant 0 : i32
    %c0_i32_0 = arith.constant 0 : i32
    return %arg0, %c0_i32 : i32, i32
  }
  func.func @transform_1(%arg0: i32) -> (i32, i32) {
    %c0_i32 = arith.constant 0 : i32
    %c0_i32_0 = arith.constant 0 : i32
    %c0_i32_1 = arith.constant 0 : i32
    return %c0_i32, %c0_i32_0 : i32, i32
  }
  func.func @transform_2(%arg0: i32) -> (i32, i32) {
    %c0_i32 = arith.constant 0 : i32
    %c0_i32_0 = arith.constant 0 : i32
    return %arg0, %c0_i32 : i32, i32
  }
}

</mosaic_0001>

<bundles_post_ra>
// kernel: discriminator_forward.5
= control target key start
LH: loop header
LB: loop body
LE: loop exit
PB: predicated region body
PF: predicated region fallthrough
CT: control target
= control target key end

     0   :  { %s3524_s9 = smov 0   ;;  %s3768_s0 = inlined_call_operand.vmem [shape: bf16[2048,48], index: 0, kind: input, shape index: {}]   ;;  %s3769_s1 = inlined_call_operand.vmem [shape: bf16[48,128], index: 1, kind: input, shape index: {}]   ;;  %s3770_s2 = inlined_call_operand.vmem [shape: bf16[2048,128], index: 2, kind: output, shape index: {}]  }
   0x1 LB: > { %s2438_s10 = sadd.s32 4294967295, %s3507_s9   ;;  %p2442_p0 = scmp.ge.s32.totalorder %s3507_s9, 1  ;;  %s3507_s9 = sphi %s3524_s9, %s12_s9  }
   0x2   : > { %p113_p1 = scmp.lt.s32.totalorder %s3507_s9, 3 }
   0x4   : > { %p114_p2 = pnand %p2442_p0, %p113_p1 }
   0x5   : > { %v3434_v0 = vld [vmem:[%s3769_s1] sm:$0xff] (!%p114_p2)   ;;  %s2443_s13 = sshll.u32 (!%p114_p2), %s2438_s10, 7  ;;  %v3435_v1 = vld [vmem:[%s3769_s1 + $0x8] sm:$0xff] (!%p114_p2)   ;;  %v3436_v2 = vld [vmem:[%s3769_s1 + $0x10] sm:$0xff] (!%p114_p2)   ;;  %vm620_vm0 = vcmask (!%p114_p2), 392192  }
   0x6   : > { %117 = sbr.rel (%p114_p2) target bundleno = 361 (0x169), region = 28  ;;  %p136_p3 = scmp.lt.s32.totalorder (!%p114_p2), %s2443_s13, 255  ;;  %3286 = vmatprep.subr.bf16.mxu0 (!%p114_p2), %v3434_v0  ;;  %3420 = vmatprep.subr.bf16.mxu1 (!%p114_p2), %v3434_v0 }
   0x7   : > { %3287 = vmatpush3.bf16.msra.mxu0 (!%p114_p2), %v3434_v0  ;;  %3423 = vmatpush3.bf16.msra.mxu1 (!%p114_p2), %v3434_v0 }
   0x8   : > { %3288 = vmatprep.subr.bf16.mxu0 (!%p114_p2), %v3435_v1  ;;  %3421 = vmatprep.subr.bf16.mxu1 (!%p114_p2), %v3435_v1 }
   0xb   : > { %3289 = vmatpush3.bf16.msra.mxu0 (!%p114_p2), %v3435_v1  ;;  %3424 = vmatpush3.bf16.msra.mxu1 (!%p114_p2), %v3435_v1 }
   0xc   : > { %3290 = vmatprep.subr.bf16.mxu0 (!%p114_p2), %v3436_v2  ;;  %3422 = vmatprep.subr.bf16.mxu1 (!%p114_p2), %v3436_v2 }
   0xd   : > { %s3772_s13 = smov (!%p136_p3, %s2443_s13), 255 }
   0xe   : > { %s2444_s18 = sshll.u32 %s3772_s13, 2 }
   0xf   : > { %s3549_s21 = scalar_lea.vmem %s3768_s0, %s2444_s18  ;;  %3291 = vmatpush3.bf16.msra.mxu0 %v3436_v2  ;;  %3425 = vmatpush3.bf16.msra.mxu1 %v3436_v2  ;;  %s3684_s24 = scalar_lea.vmem %s3770_s2, %s2444_s18 }
  0x10   : > { %v3437_v3 = vld [vmem:[%s3549_s21] sm:$0xff]   ;;  %v3439_v5 = vld [vmem:[%s3549_s21 + $0x8] sm:$0xff]   ;;  %v3441_v7 = vld [vmem:[%s3549_s21 + $0x10] sm:$0xff]  }
  0x11   : > { %v3438_v4 = vld [vmem:[%s3549_s21 + $0x100] sm:$0xff]   ;;  %3292 = vmatprep.mubr.msk.bf16.mxu0 %vm620_vm0, %v3437_v3  ;;  %v3440_v6 = vld [vmem:[%s3549_s21 + $0x108] sm:$0xff]   ;;  %v3442_v8 = vld [vmem:[%s3549_s21 + $0x110] sm:$0xff]  }
  0x12   : > { %3356 = vmatprep.mubr.msk.bf16.mxu1 %vm620_vm0, %v3438_v4  ;;  %3293 = vmatmul.mubr.msk.bf16.vlgmr.msra.gmra.mrb[0].mxu0 %vm620_vm0, %v3439_v5  ;;  %v3443_v9 = vld [vmem:[%s3549_s21 + $0x18] sm:$0xff]   ;;  %v3445_v11 = vld [vmem:[%s3549_s21 + $0x20] sm:$0xff]   ;;  %v3447_v13 = vld [vmem:[%s3549_s21 + $0x28] sm:$0xff]  }
  0x13   : > { %3357 = vmatmul.mubr.msk.bf16.vlgmr.msra.gmra.mrb[0].mxu1 %vm620_vm0, %v3440_v6  ;;  %3296 = vmatprep.mubr.msk.bf16.mxu0 %vm620_vm0, %v3441_v7  ;;  %v3444_v10 = vld [vmem:[%s3549_s21 + $0x118] sm:$0xff]   ;;  %v3446_v12 = vld [vmem:[%s3549_s21 + $0x120] sm:$0xff]   ;;  %v3448_v14 = vld [vmem:[%s3549_s21 + $0x128] sm:$0xff]  }
  0x14   : > { %3360 = vmatprep.mubr.msk.bf16.mxu1 %vm620_vm0, %v3442_v8  ;;  %v3449_v15 = vld [vmem:[%s3549_s21 + $0x30] sm:$0xff]   ;;  %v3451_v17 = vld [vmem:[%s3549_s21 + $0x38] sm:$0xff]   ;;  %v3453_v19 = vld [vmem:[%s3549_s21 + $0x40] sm:$0xff]  }
  0x15   : > { %v3450_v16 = vld [vmem:[%s3549_s21 + $0x130] sm:$0xff]   ;;  %v3452_v18 = vld [vmem:[%s3549_s21 + $0x138] sm:$0xff]   ;;  %v3454_v20 = vld [vmem:[%s3549_s21 + $0x140] sm:$0xff]  }
  0x16   : > { %v3455_v21 = vld [vmem:[%s3549_s21 + $0x48] sm:$0xff]   ;;  %v3457_v23 = vld [vmem:[%s3549_s21 + $0x50] sm:$0xff]   ;;  %v3459_v25 = vld [vmem:[%s3549_s21 + $0x58] sm:$0xff]  }
  0x17   : > { %v3456_v22 = vld [vmem:[%s3549_s21 + $0x148] sm:$0xff]   ;;  %v3458_v24 = vld [vmem:[%s3549_s21 + $0x150] sm:$0xff]   ;;  %v3460_v26 = vld [vmem:[%s3549_s21 + $0x158] sm:$0xff]  }
  0x18   : > { %v3461_v27 = vld [vmem:[%s3549_s21 + $0x60] sm:$0xff]   ;;  %v3463_v29 = vld [vmem:[%s3549_s21 + $0x68] sm:$0xff]   ;;  %v3465_v31 = vld [vmem:[%s3549_s21 + $0x70] sm:$0xff]  }
  0x19   : > { %v3462_v28 = vld [vmem:[%s3549_s21 + $0x160] sm:$0xff]   ;;  %v3464_v30 = vld [vmem:[%s3549_s21 + $0x168] sm:$0xff]   ;;  %v3466_v32 = vld [vmem:[%s3549_s21 + $0x170] sm:$0xff]  }
  0x1a   : > { %3297 = vmatmul.mubr.msk.bf16.gmra.mrb[4].mxu0 %vm620_vm0, %v3443_v9  ;;  %v3467_v33 = vld [vmem:[%s3549_s21 + $0x78] sm:$0xff]   ;;  %v3469_v35 = vld [vmem:[%s3549_s21 + $0x80] sm:$0xff]   ;;  %v3471_v37 = vld [vmem:[%s3549_s21 + $0x88] sm:$0xff]  }
  0x1b   : > { %3361 = vmatmul.mubr.msk.bf16.gmra.mrb[4].mxu1 %vm620_vm0, %v3444_v10  ;;  %3300 = vmatprep.mubr.msk.bf16.mxu0 %vm620_vm0, %v3445_v11  ;;  %v3468_v34 = vld [vmem:[%s3549_s21 + $0x178] sm:$0xff]   ;;  %v3470_v36 = vld [vmem:[%s3549_s21 + $0x180] sm:$0xff]   ;;  %v3472_v38 = vld [vmem:[%s3549_s21 + $0x188] sm:$0xff]  }
  0x1c   : > { %3364 = vmatprep.mubr.msk.bf16.mxu1 %vm620_vm0, %v3446_v12  ;;  %v3473_v39 = vld [vmem:[%s3549_s21 + $0x90] sm:$0xff]   ;;  %v3475_v41 = vld [vmem:[%s3549_s21 + $0x98] sm:$0xff]   ;;  %v3477_v43 = vld [vmem:[%s3549_s21 + $0xa0] sm:$0xff]  }
  0x1d   : > { %v3474_v40 = vld [vmem:[%s3549_s21 + $0x190] sm:$0xff]   ;;  %v3476_v42 = vld [vmem:[%s3549_s21 + $0x198] sm:$0xff]   ;;  %v3478_v44 = vld [vmem:[%s3549_s21 + $0x1a0] sm:$0xff]  }
  0x1e   : > { %v3479_v45 = vld [vmem:[%s3549_s21 + $0xa8] sm:$0xff]   ;;  %v3481_v47 = vld [vmem:[%s3549_s21 + $0xb0] sm:$0xff]   ;;  %v3483_v49 = vld [vmem:[%s3549_s21 + $0xb8] sm:$0xff]  }
  0x1f   : > { %v3480_v46 = vld [vmem:[%s3549_s21 + $0x1a8] sm:$0xff]   ;;  %v3482_v48 = vld [vmem:[%s3549_s21 + $0x1b0] sm:$0xff]   ;;  %v3484_v50 = vld [vmem:[%s3549_s21 + $0x1b8] sm:$0xff]  }
  0x20   : > { %v3485_v51 = vld [vmem:[%s3549_s21 + $0xc0] sm:$0xff]   ;;  %v3487_v53 = vld [vmem:[%s3549_s21 + $0xc8] sm:$0xff]   ;;  %v3489_v55 = vld [vmem:[%s3549_s21 + $0xd0] sm:$0xff]  }
  0x21   : > { %v3486_v52 = vld [vmem:[%s3549_s21 + $0x1c0] sm:$0xff]   ;;  %v3488_v54 = vld [vmem:[%s3549_s21 + $0x1c8] sm:$0xff]   ;;  %v3490_v56 = vld [vmem:[%s3549_s21 + $0x1d0] sm:$0xff]  }
  0x22   : > { %3301 = vmatmul.mubr.msk.bf16.gmra.mrb[8].mxu0 %vm620_vm0, %v3447_v13  ;;  %v3491_v57 = vld [vmem:[%s3549_s21 + $0xd8] sm:$0xff]   ;;  %v3493_v59 = vld [vmem:[%s3549_s21 + $0xe0] sm:$0xff]   ;;  %v3495_v61 = vld [vmem:[%s3549_s21 + $0xe8] sm:$0xff]  }
  0x23   : > { %3365 = vmatmul.mubr.msk.bf16.gmra.mrb[8].mxu1 %vm620_vm0, %v3448_v14  ;;  %3304 = vmatprep.mubr.msk.bf16.mxu0 %vm620_vm0, %v3449_v15  ;;  %v3492_v58 = vld [vmem:[%s3549_s21 + $0x1d8] sm:$0xff]   ;;  %v3494_v60 = vld [vmem:[%s3549_s21 + $0x1e0] sm:$0xff]   ;;  %v3496_v62 = vld [vmem:[%s3549_s21 + $0x1e8] sm:$0xff]  }
  0x24   : > { %3368 = vmatprep.mubr.msk.bf16.mxu1 %vm620_vm0, %v3450_v16  ;;  %v3497_v63 = vld [vmem:[%s3549_s21 + $0xf0] sm:$0xff]   ;;  %v3499_v1 = vld [vmem:[%s3549_s21 + $0xf8] sm:$0xff]  }
  0x25   : > { %v3498_v0 = vld [vmem:[%s3549_s21 + $0x1f0] sm:$0xff]   ;;  %v3500_v2 = vld [vmem:[%s3549_s21 + $0x1f8] sm:$0xff]  }
  0x2a   : > { %3305 = vmatmul.mubr.msk.bf16.gmra.mrb[12].mxu0 %vm620_vm0, %v3451_v17 }
  0x2b   : > { %3369 = vmatmul.mubr.msk.bf16.gmra.mrb[12].mxu1 %vm620_vm0, %v3452_v18  ;;  %3308 = vmatprep.mubr.msk.bf16.mxu0 %vm620_vm0, %v3453_v19 }
  0x2c   : > { %3372 = vmatprep.mubr.msk.bf16.mxu1 %vm620_vm0, %v3454_v20 }
  0x32   : > { %3309 = vmatmul.mubr.msk.bf16.gmra.mrb[16].mxu0 %vm620_vm0, %v3455_v21 }
  0x33   : > { %3373 = vmatmul.mubr.msk.bf16.gmra.mrb[16].mxu1 %vm620_vm0, %v3456_v22  ;;  %3312 = vmatprep.mubr.msk.bf16.mxu0 %vm620_vm0, %v3457_v23 }
  0x34   : > { %3376 = vmatprep.mubr.msk.bf16.mxu1 %vm620_vm0, %v3458_v24 }
  0x3a   : > { %3313 = vmatmul.mubr.msk.bf16.gmra.mrb[20].mxu0 %vm620_vm0, %v3459_v25 }
  0x3b   : > { %3377 = vmatmul.mubr.msk.bf16.gmra.mrb[20].mxu1 %vm620_vm0, %v3460_v26  ;;  %3316 = vmatprep.mubr.msk.bf16.mxu0 %vm620_vm0, %v3461_v27 }
  0x3c   : > { %3380 = vmatprep.mubr.msk.bf16.mxu1 %vm620_vm0, %v3462_v28 }
  0x42   : > { %3317 = vmatmul.mubr.msk.bf16.gmra.mrb[24].mxu0 %vm620_vm0, %v3463_v29 }
  0x43   : > { %3381 = vmatmul.mubr.msk.bf16.gmra.mrb[24].mxu1 %vm620_vm0, %v3464_v30  ;;  %3320 = vmatprep.mubr.msk.bf16.mxu0 %vm620_vm0, %v3465_v31 }
  0x44   : > { %3384 = vmatprep.mubr.msk.bf16.mxu1 %vm620_vm0, %v3466_v32 }
  0x4a   : > { %3321 = vmatmul.mubr.msk.bf16.gmra.mrb[28].mxu0 %vm620_vm0, %v3467_v33 }
  0x4b   : > { %3385 = vmatmul.mubr.msk.bf16.gmra.mrb[28].mxu1 %vm620_vm0, %v3468_v34  ;;  %3324 = vmatprep.mubr.msk.bf16.mxu0 %vm620_vm0, %v3469_v35 }
  0x4c   : > { %3388 = vmatprep.mubr.msk.bf16.mxu1 %vm620_vm0, %v3470_v36 }
  0x52   : > { %3325 = vmatmul.mubr.msk.bf16.gmra.mrb[32].mxu0 %vm620_vm0, %v3471_v37 }
  0x53   : > { %3389 = vmatmul.mubr.msk.bf16.gmra.mrb[32].mxu1 %vm620_vm0, %v3472_v38  ;;  %3328 = vmatprep.mubr.msk.bf16.mxu0 %vm620_vm0, %v3473_v39 }
  0x54   : > { %3392 = vmatprep.mubr.msk.bf16.mxu1 %vm620_vm0, %v3474_v40 }
  0x5a   : > { %3329 = vmatmul.mubr.msk.bf16.gmra.mrb[36].mxu0 %vm620_vm0, %v3475_v41 }
  0x5b   : > { %3393 = vmatmul.mubr.msk.bf16.gmra.mrb[36].mxu1 %vm620_vm0, %v3476_v42  ;;  %3332 = vmatprep.mubr.msk.bf16.mxu0 %vm620_vm0, %v3477_v43 }
  0x5c   : > { %3396 = vmatprep.mubr.msk.bf16.mxu1 %vm620_vm0, %v3478_v44 }
  0x62   : > { %3333 = vmatmul.mubr.msk.bf16.gmra.mrb[40].mxu0 %vm620_vm0, %v3479_v45 }
  0x63   : > { %3397 = vmatmul.mubr.msk.bf16.gmra.mrb[40].mxu1 %vm620_vm0, %v3480_v46  ;;  %3336 = vmatprep.mubr.msk.bf16.mxu0 %vm620_vm0, %v3481_v47 }
  0x64   : > { %3400 = vmatprep.mubr.msk.bf16.mxu1 %vm620_vm0, %v3482_v48 }
  0x6a   : > { %3337 = vmatmul.mubr.msk.bf16.gmra.mrb[44].mxu0 %vm620_vm0, %v3483_v49 }
  0x6b   : > { %3401 = vmatmul.mubr.msk.bf16.gmra.mrb[44].mxu1 %vm620_vm0, %v3484_v50  ;;  %3340 = vmatprep.mubr.msk.bf16.mxu0 %vm620_vm0, %v3485_v51 }
  0x6c   : > { %3404 = vmatprep.mubr.msk.bf16.mxu1 %vm620_vm0, %v3486_v52 }
  0x72   : > { %3341 = vmatmul.mubr.msk.bf16.gmra.mrb[48].mxu0 %vm620_vm0, %v3487_v53 }
  0x73   : > { %3405 = vmatmul.mubr.msk.bf16.gmra.mrb[48].mxu1 %vm620_vm0, %v3488_v54  ;;  %3344 = vmatprep.mubr.msk.bf16.mxu0 %vm620_vm0, %v3489_v55 }
  0x74   : > { %3408 = vmatprep.mubr.msk.bf16.mxu1 %vm620_vm0, %v3490_v56 }
  0x7a   : > { %3345 = vmatmul.mubr.msk.bf16.gmra.mrb[52].mxu0 %vm620_vm0, %v3491_v57 }
  0x7b   : > { %3409 = vmatmul.mubr.msk.bf16.gmra.mrb[52].mxu1 %vm620_vm0, %v3492_v58  ;;  %3348 = vmatprep.mubr.msk.bf16.mxu0 %vm620_vm0, %v3493_v59 }
  0x7c   : > { %3412 = vmatprep.mubr.msk.bf16.mxu1 %vm620_vm0, %v3494_v60 }
  0x82   : > { %3349 = vmatmul.mubr.msk.bf16.gmra.mrb[56].mxu0 %vm620_vm0, %v3495_v61 }
  0x83   : > { %3413 = vmatmul.mubr.msk.bf16.gmra.mrb[56].mxu1 %vm620_vm0, %v3496_v62  ;;  %3352 = vmatprep.mubr.msk.bf16.mxu0 %vm620_vm0, %v3497_v63 }
  0x84   : > { %3416 = vmatprep.mubr.msk.bf16.mxu1 %vm620_vm0, %v3498_v0 }
  0x8a   : > { %3353 = vmatmul.mubr.msk.bf16.gmra.mrb[60].mxu0 %vm620_vm0, %v3499_v1 }
  0x8b   : > { %3417 = vmatmul.mubr.msk.bf16.gmra.mrb[60].mxu1 %vm620_vm0, %v3500_v2 }
  0xe5   : > { %v3294_v3 = vpop.f32.mrb[0].mxu0 }
  0xe6   : > { %v3358_v4 = vpop.f32.mrb[0].mxu1  ;;  %vm1360_vm1 = vcmp.gt.f32.partialorder %v3294_v3, 0.0  ;;  %v1488_v5 = vmul.f32 0.2, %v3294_v3  ;;  %v847_v7 = vpop.f32.mrb[1].mxu0 }
  0xe7   : > { %v1552_v6 = vmul.f32 0.2, %v3358_v4  ;;  %vm1424_vm2 = vcmp.gt.f32.partialorder %v3358_v4, 0.0  ;;  %v1103_v8 = vpop.f32.mrb[1].mxu1  ;;  %v1486_v9 = vmul.f32 0.2, %v847_v7 }
  0xe8   : > { %v3295_v10 = vpop.f32.mrb[2].mxu0  ;;  %v3359_v11 = vpop.f32.mrb[2].mxu1  ;;  %v1616_v12 = vsel %vm1360_vm1, %v3294_v3, %v1488_v5  ;;  %v1550_v13 = vmul.f32 0.2, %v1103_v8  ;;  %vm1358_vm4 = vcmp.gt.f32.partialorder %v847_v7, 0.0  ;;  %vm1422_vm6 = vcmp.gt.f32.partialorder %v1103_v8, 0.0 }
  0xe9   : > { %vm1361_vm3 = vcmp.gt.f32.partialorder %v3295_v10, 0.0  ;;  %v1489_v14 = vmul.f32 0.2, %v3295_v10  ;;  %v1680_v15 = vsel %vm1424_vm2, %v3358_v4, %v1552_v6  ;;  %vm1425_vm5 = vcmp.gt.f32.partialorder %v3359_v11, 0.0  ;;  %v850_v17 = vpop.f32.mrb[3].mxu0  ;;  %v1106_v18 = vpop.f32.mrb[3].mxu1 }
  0xea   : > { %v1553_v16 = vmul.f32 0.2, %v3359_v11  ;;  %vm1359_vm7 = vcmp.gt.f32.partialorder %v850_v17, 0.0  ;;  %v1487_v20 = vmul.f32 0.2, %v850_v17  ;;  %vm1423_vm8 = vcmp.gt.f32.partialorder %v1106_v18, 0.0 }
  0xeb   : > { %v1617_v19 = vsel %vm1361_vm3, %v3295_v10, %v1489_v14  ;;  %v1551_v23 = vmul.f32 0.2, %v1106_v18  ;;  %v1614_v24 = vsel %vm1358_vm4, %v847_v7, %v1486_v9  ;;  %v1678_v29 = vsel %vm1422_vm6, %v1103_v8, %v1550_v13 }
  0xec   : > { %v2844_v21 = vpack.c.bf16 %v1617_v19, %v1616_v12  ;;  %v1681_v22 = vsel %vm1425_vm5, %v3359_v11, %v1553_v16  ;;  %v1615_v26 = vsel %vm1359_vm7, %v850_v17, %v1487_v20 }
  0xed   : > { %v3004_v25 = vpack.c.bf16 %v1681_v22, %v1680_v15  ;;  %v3298_v27 = vpop.f32.mrb[4].mxu0  ;;  %v2839_v30 = vpack.c.bf16 %v1615_v26, %v1614_v24  ;;  %v1679_v31 = vsel %vm1423_vm8, %v1106_v18, %v1551_v23 }
  0xee   : > { %v3362_v28 = vpop.f32.mrb[4].mxu1  ;;  %3156 = vst [vmem:[%s3684_s24 + $0x8] sm:$0xff] %v2844_v21   ;;  %v1492_v32 = vmul.f32 0.2, %v3298_v27  ;;  %v863_v33 = vpop.f32.mrb[5].mxu0  ;;  %v2999_v35 = vpack.c.bf16 %v1679_v31, %v1678_v29  ;;  %vm1364_vm9 = vcmp.gt.f32.partialorder %v3298_v27, 0.0 }
  0xef   : > { %v1119_v34 = vpop.f32.mrb[5].mxu1  ;;  %3188 = vst [vmem:[%s3684_s24 + $0x108] sm:$0xff] %v3004_v25   ;;  %v1556_v36 = vmul.f32 0.2, %v3362_v28  ;;  %v3299_v37 = vpop.f32.mrb[6].mxu0  ;;  %2840 = vst [vmem:[%s3684_s24] sm:$0xff] %v2839_v30   ;;  %vm1428_vm10 = vcmp.gt.f32.partialorder %v3362_v28, 0.0 }
  0xf0   : > { %v3363_v38 = vpop.f32.mrb[6].mxu1  ;;  %v1490_v39 = vmul.f32 0.2, %v863_v33  ;;  %v1554_v40 = vmul.f32 0.2, %v1119_v34  ;;  %v866_v41 = vpop.f32.mrb[7].mxu0  ;;  %v1620_v44 = vsel %vm1364_vm9, %v3298_v27, %v1492_v32 }
  0xf1   : > { %3187 = vst [vmem:[%s3684_s24 + $0x100] sm:$0xff] %v2999_v35   ;;  %vm1362_vm11 = vcmp.gt.f32.partialorder %v863_v33, 0.0  ;;  %vm1365_vm12 = vcmp.gt.f32.partialorder %v3299_v37, 0.0  ;;  %v1493_v42 = vmul.f32 0.2, %v3299_v37  ;;  %vm1429_vm13 = vcmp.gt.f32.partialorder %v3363_v38, 0.0 }
  0xf2   : > { %v1122_v43 = vpop.f32.mrb[7].mxu1  ;;  %vm1426_vm14 = vcmp.gt.f32.partialorder %v1119_v34, 0.0  ;;  %v1557_v45 = vmul.f32 0.2, %v3363_v38  ;;  %vm1363_vm15 = vcmp.gt.f32.partialorder %v866_v41, 0.0  ;;  %v1684_v49 = vsel %vm1428_vm10, %v3362_v28, %v1556_v36 }
  0xf3   : > { %v1621_v46 = vsel %vm1365_vm12, %v3299_v37, %v1493_v42  ;;  %v1491_v47 = vmul.f32 0.2, %v866_v41  ;;  %vm1427_vm0 = vcmp.gt.f32.partialorder %v1122_v43, 0.0  ;;  %v1555_v48 = vmul.f32 0.2, %v1122_v43 }
  0xf4   : > { %v1618_v50 = vsel %vm1362_vm11, %v863_v33, %v1490_v39  ;;  %v2854_v51 = vpack.c.bf16 %v1621_v46, %v1620_v44  ;;  %v1685_v52 = vsel %vm1429_vm13, %v3363_v38, %v1557_v45  ;;  %v1682_v53 = vsel %vm1426_vm14, %v1119_v34, %v1554_v40 }
  0xf5   : > { %v3014_v54 = vpack.c.bf16 %v1685_v52, %v1684_v49  ;;  %v1619_v55 = vsel %vm1363_vm15, %v866_v41, %v1491_v47  ;;  %v1683_v56 = vsel %vm1427_vm0, %v1122_v43, %v1555_v48  ;;  %v3302_v57 = vpop.f32.mrb[8].mxu0 }
  0xf6   : > { %v3366_v58 = vpop.f32.mrb[8].mxu1  ;;  %3158 = vst [vmem:[%s3684_s24 + $0x18] sm:$0xff] %v2854_v51   ;;  %v2849_v59 = vpack.c.bf16 %v1619_v55, %v1618_v50  ;;  %v3009_v60 = vpack.c.bf16 %v1683_v56, %v1682_v53  ;;  %vm1368_vm1 = vcmp.gt.f32.partialorder %v3302_v57, 0.0  ;;  %v1496_v61 = vmul.f32 0.2, %v3302_v57  ;;  %v879_v62 = vpop.f32.mrb[9].mxu0 }
  0xf7   : > { %v1135_v63 = vpop.f32.mrb[9].mxu1  ;;  %3190 = vst [vmem:[%s3684_s24 + $0x118] sm:$0xff] %v3014_v54   ;;  %vm1432_vm2 = vcmp.gt.f32.partialorder %v3366_v58, 0.0  ;;  %v1560_v0 = vmul.f32 0.2, %v3366_v58  ;;  %v3303_v3 = vpop.f32.mrb[10].mxu0 }
  0xf8   : > { %3157 = vst [vmem:[%s3684_s24 + $0x10] sm:$0xff] %v2849_v59   ;;  %3189 = vst [vmem:[%s3684_s24 + $0x110] sm:$0xff] %v3009_v60   ;;  %v1494_v1 = vmul.f32 0.2, %v879_v62  ;;  %v1558_v2 = vmul.f32 0.2, %v1135_v63  ;;  %v1624_v5 = vsel %vm1368_vm1, %v3302_v57, %v1496_v61 }
  0xf9   : > { %v3367_v4 = vpop.f32.mrb[10].mxu1  ;;  %vm1366_vm3 = vcmp.gt.f32.partialorder %v879_v62, 0.0  ;;  %vm1369_vm4 = vcmp.gt.f32.partialorder %v3303_v3, 0.0  ;;  %v1497_v6 = vmul.f32 0.2, %v3303_v3  ;;  %v882_v7 = vpop.f32.mrb[11].mxu0  ;;  %v1688_v13 = vsel %vm1432_vm2, %v3366_v58, %v1560_v0 }
  0xfa   : > { %v1138_v8 = vpop.f32.mrb[11].mxu1  ;;  %vm1430_vm5 = vcmp.gt.f32.partialorder %v1135_v63, 0.0  ;;  %vm1433_vm6 = vcmp.gt.f32.partialorder %v3367_v4, 0.0  ;;  %v1561_v9 = vmul.f32 0.2, %v3367_v4  ;;  %vm1367_vm7 = vcmp.gt.f32.partialorder %v882_v7, 0.0 }
  0xfb   : > { %v1625_v10 = vsel %vm1369_vm4, %v3303_v3, %v1497_v6  ;;  %v1495_v11 = vmul.f32 0.2, %v882_v7  ;;  %vm1431_vm8 = vcmp.gt.f32.partialorder %v1138_v8, 0.0  ;;  %v1559_v12 = vmul.f32 0.2, %v1138_v8 }
  0xfc   : > { %v1622_v14 = vsel %vm1366_vm3, %v879_v62, %v1494_v1  ;;  %v2864_v15 = vpack.c.bf16 %v1625_v10, %v1624_v5  ;;  %v1689_v16 = vsel %vm1433_vm6, %v3367_v4, %v1561_v9  ;;  %v1686_v17 = vsel %vm1430_vm5, %v1135_v63, %v1558_v2 }
  0xfd   : > { %v3024_v18 = vpack.c.bf16 %v1689_v16, %v1688_v13  ;;  %v1623_v19 = vsel %vm1367_vm7, %v882_v7, %v1495_v11  ;;  %v1687_v20 = vsel %vm1431_vm8, %v1138_v8, %v1559_v12  ;;  %v3306_v21 = vpop.f32.mrb[12].mxu0 }
  0xfe   : > { %v3370_v22 = vpop.f32.mrb[12].mxu1  ;;  %3160 = vst [vmem:[%s3684_s24 + $0x28] sm:$0xff] %v2864_v15   ;;  %v2859_v23 = vpack.c.bf16 %v1623_v19, %v1622_v14  ;;  %v3019_v24 = vpack.c.bf16 %v1687_v20, %v1686_v17  ;;  %vm1372_vm9 = vcmp.gt.f32.partialorder %v3306_v21, 0.0  ;;  %v1500_v25 = vmul.f32 0.2, %v3306_v21  ;;  %v895_v26 = vpop.f32.mrb[13].mxu0 }
  0xff   : > { %v1151_v27 = vpop.f32.mrb[13].mxu1  ;;  %3192 = vst [vmem:[%s3684_s24 + $0x128] sm:$0xff] %v3024_v18   ;;  %vm1436_vm10 = vcmp.gt.f32.partialorder %v3370_v22, 0.0  ;;  %v1564_v28 = vmul.f32 0.2, %v3370_v22  ;;  %v3307_v31 = vpop.f32.mrb[14].mxu0 }
 0x100   : > { %3159 = vst [vmem:[%s3684_s24 + $0x20] sm:$0xff] %v2859_v23   ;;  %3191 = vst [vmem:[%s3684_s24 + $0x120] sm:$0xff] %v3019_v24   ;;  %v1498_v29 = vmul.f32 0.2, %v895_v26  ;;  %v1562_v30 = vmul.f32 0.2, %v1151_v27  ;;  %v1628_v33 = vsel %vm1372_vm9, %v3306_v21, %v1500_v25 }
 0x101   : > { %v3371_v32 = vpop.f32.mrb[14].mxu1  ;;  %vm1370_vm11 = vcmp.gt.f32.partialorder %v895_v26, 0.0  ;;  %vm1373_vm12 = vcmp.gt.f32.partialorder %v3307_v31, 0.0  ;;  %v1501_v34 = vmul.f32 0.2, %v3307_v31  ;;  %v898_v35 = vpop.f32.mrb[15].mxu0  ;;  %v1692_v41 = vsel %vm1436_vm10, %v3370_v22, %v1564_v28 }
 0x102   : > { %v1154_v36 = vpop.f32.mrb[15].mxu1  ;;  %vm1434_vm13 = vcmp.gt.f32.partialorder %v1151_v27, 0.0  ;;  %vm1437_vm14 = vcmp.gt.f32.partialorder %v3371_v32, 0.0  ;;  %v1565_v37 = vmul.f32 0.2, %v3371_v32  ;;  %vm1371_vm15 = vcmp.gt.f32.partialorder %v898_v35, 0.0 }
 0x103   : > { %v1629_v38 = vsel %vm1373_vm12, %v3307_v31, %v1501_v34  ;;  %v1499_v39 = vmul.f32 0.2, %v898_v35  ;;  %vm1435_vm0 = vcmp.gt.f32.partialorder %v1154_v36, 0.0  ;;  %v1563_v40 = vmul.f32 0.2, %v1154_v36 }
 0x104   : > { %v1626_v42 = vsel %vm1370_vm11, %v895_v26, %v1498_v29  ;;  %v2874_v43 = vpack.c.bf16 %v1629_v38, %v1628_v33  ;;  %v1693_v44 = vsel %vm1437_vm14, %v3371_v32, %v1565_v37  ;;  %v1690_v45 = vsel %vm1434_vm13, %v1151_v27, %v1562_v30 }
 0x105   : > { %v3034_v46 = vpack.c.bf16 %v1693_v44, %v1692_v41  ;;  %v1627_v47 = vsel %vm1371_vm15, %v898_v35, %v1499_v39  ;;  %v1691_v48 = vsel %vm1435_vm0, %v1154_v36, %v1563_v40  ;;  %v3310_v49 = vpop.f32.mrb[16].mxu0 }
 0x106   : > { %v3374_v50 = vpop.f32.mrb[16].mxu1  ;;  %3162 = vst [vmem:[%s3684_s24 + $0x38] sm:$0xff] %v2874_v43   ;;  %v2869_v51 = vpack.c.bf16 %v1627_v47, %v1626_v42  ;;  %v3029_v52 = vpack.c.bf16 %v1691_v48, %v1690_v45  ;;  %vm1376_vm1 = vcmp.gt.f32.partialorder %v3310_v49, 0.0  ;;  %v1504_v53 = vmul.f32 0.2, %v3310_v49  ;;  %v911_v54 = vpop.f32.mrb[17].mxu0 }
 0x107   : > { %v1167_v55 = vpop.f32.mrb[17].mxu1  ;;  %3194 = vst [vmem:[%s3684_s24 + $0x138] sm:$0xff] %v3034_v46   ;;  %vm1440_vm2 = vcmp.gt.f32.partialorder %v3374_v50, 0.0  ;;  %v1568_v56 = vmul.f32 0.2, %v3374_v50  ;;  %v3311_v59 = vpop.f32.mrb[18].mxu0 }
 0x108   : > { %3161 = vst [vmem:[%s3684_s24 + $0x30] sm:$0xff] %v2869_v51   ;;  %3193 = vst [vmem:[%s3684_s24 + $0x130] sm:$0xff] %v3029_v52   ;;  %v1502_v57 = vmul.f32 0.2, %v911_v54  ;;  %v1566_v58 = vmul.f32 0.2, %v1167_v55  ;;  %v1632_v61 = vsel %vm1376_vm1, %v3310_v49, %v1504_v53 }
 0x109   : > { %v3375_v60 = vpop.f32.mrb[18].mxu1  ;;  %vm1374_vm3 = vcmp.gt.f32.partialorder %v911_v54, 0.0  ;;  %vm1377_vm4 = vcmp.gt.f32.partialorder %v3311_v59, 0.0  ;;  %v1505_v62 = vmul.f32 0.2, %v3311_v59  ;;  %v914_v63 = vpop.f32.mrb[19].mxu0  ;;  %v1696_v5 = vsel %vm1440_vm2, %v3374_v50, %v1568_v56 }
 0x10a   : > { %v1170_v0 = vpop.f32.mrb[19].mxu1  ;;  %vm1438_vm5 = vcmp.gt.f32.partialorder %v1167_v55, 0.0  ;;  %vm1441_vm6 = vcmp.gt.f32.partialorder %v3375_v60, 0.0  ;;  %v1569_v1 = vmul.f32 0.2, %v3375_v60  ;;  %vm1375_vm7 = vcmp.gt.f32.partialorder %v914_v63, 0.0 }
 0x10b   : > { %v1633_v2 = vsel %vm1377_vm4, %v3311_v59, %v1505_v62  ;;  %v1503_v3 = vmul.f32 0.2, %v914_v63  ;;  %vm1439_vm8 = vcmp.gt.f32.partialorder %v1170_v0, 0.0  ;;  %v1567_v4 = vmul.f32 0.2, %v1170_v0 }
 0x10c   : > { %v1630_v6 = vsel %vm1374_vm3, %v911_v54, %v1502_v57  ;;  %v2884_v7 = vpack.c.bf16 %v1633_v2, %v1632_v61  ;;  %v1697_v8 = vsel %vm1441_vm6, %v3375_v60, %v1569_v1  ;;  %v1694_v9 = vsel %vm1438_vm5, %v1167_v55, %v1566_v58 }
 0x10d   : > { %v3044_v10 = vpack.c.bf16 %v1697_v8, %v1696_v5  ;;  %v1631_v11 = vsel %vm1375_vm7, %v914_v63, %v1503_v3  ;;  %v1695_v12 = vsel %vm1439_vm8, %v1170_v0, %v1567_v4  ;;  %v3314_v13 = vpop.f32.mrb[20].mxu0 }
 0x10e   : > { %v3378_v14 = vpop.f32.mrb[20].mxu1  ;;  %3164 = vst [vmem:[%s3684_s24 + $0x48] sm:$0xff] %v2884_v7   ;;  %v2879_v15 = vpack.c.bf16 %v1631_v11, %v1630_v6  ;;  %v3039_v16 = vpack.c.bf16 %v1695_v12, %v1694_v9  ;;  %vm1380_vm9 = vcmp.gt.f32.partialorder %v3314_v13, 0.0  ;;  %v1508_v17 = vmul.f32 0.2, %v3314_v13  ;;  %v927_v18 = vpop.f32.mrb[21].mxu0 }
 0x10f   : > { %v1183_v19 = vpop.f32.mrb[21].mxu1  ;;  %3196 = vst [vmem:[%s3684_s24 + $0x148] sm:$0xff] %v3044_v10   ;;  %vm1444_vm10 = vcmp.gt.f32.partialorder %v3378_v14, 0.0  ;;  %v1572_v20 = vmul.f32 0.2, %v3378_v14  ;;  %v3315_v23 = vpop.f32.mrb[22].mxu0 }
 0x110   : > { %3163 = vst [vmem:[%s3684_s24 + $0x40] sm:$0xff] %v2879_v15   ;;  %3195 = vst [vmem:[%s3684_s24 + $0x140] sm:$0xff] %v3039_v16   ;;  %v1506_v21 = vmul.f32 0.2, %v927_v18  ;;  %v1570_v22 = vmul.f32 0.2, %v1183_v19  ;;  %v1636_v25 = vsel %vm1380_vm9, %v3314_v13, %v1508_v17 }
 0x111   : > { %v3379_v24 = vpop.f32.mrb[22].mxu1  ;;  %vm1378_vm11 = vcmp.gt.f32.partialorder %v927_v18, 0.0  ;;  %vm1381_vm12 = vcmp.gt.f32.partialorder %v3315_v23, 0.0  ;;  %v1509_v26 = vmul.f32 0.2, %v3315_v23  ;;  %v930_v27 = vpop.f32.mrb[23].mxu0  ;;  %v1700_v33 = vsel %vm1444_vm10, %v3378_v14, %v1572_v20 }
 0x112   : > { %v1186_v28 = vpop.f32.mrb[23].mxu1  ;;  %vm1442_vm13 = vcmp.gt.f32.partialorder %v1183_v19, 0.0  ;;  %vm1445_vm14 = vcmp.gt.f32.partialorder %v3379_v24, 0.0  ;;  %v1573_v29 = vmul.f32 0.2, %v3379_v24  ;;  %vm1379_vm15 = vcmp.gt.f32.partialorder %v930_v27, 0.0 }
 0x113   : > { %v1637_v30 = vsel %vm1381_vm12, %v3315_v23, %v1509_v26  ;;  %v1507_v31 = vmul.f32 0.2, %v930_v27  ;;  %vm1443_vm0 = vcmp.gt.f32.partialorder %v1186_v28, 0.0  ;;  %v1571_v32 = vmul.f32 0.2, %v1186_v28 }
 0x114   : > { %v1634_v34 = vsel %vm1378_vm11, %v927_v18, %v1506_v21  ;;  %v2894_v35 = vpack.c.bf16 %v1637_v30, %v1636_v25  ;;  %v1701_v36 = vsel %vm1445_vm14, %v3379_v24, %v1573_v29  ;;  %v1698_v37 = vsel %vm1442_vm13, %v1183_v19, %v1570_v22 }
 0x115   : > { %v3054_v38 = vpack.c.bf16 %v1701_v36, %v1700_v33  ;;  %v1635_v39 = vsel %vm1379_vm15, %v930_v27, %v1507_v31  ;;  %v1699_v40 = vsel %vm1443_vm0, %v1186_v28, %v1571_v32  ;;  %v3318_v41 = vpop.f32.mrb[24].mxu0 }
 0x116   : > { %v3382_v42 = vpop.f32.mrb[24].mxu1  ;;  %3166 = vst [vmem:[%s3684_s24 + $0x58] sm:$0xff] %v2894_v35   ;;  %v2889_v43 = vpack.c.bf16 %v1635_v39, %v1634_v34  ;;  %v3049_v44 = vpack.c.bf16 %v1699_v40, %v1698_v37  ;;  %vm1384_vm1 = vcmp.gt.f32.partialorder %v3318_v41, 0.0  ;;  %v1512_v45 = vmul.f32 0.2, %v3318_v41  ;;  %v943_v46 = vpop.f32.mrb[25].mxu0 }
 0x117   : > { %v1199_v47 = vpop.f32.mrb[25].mxu1  ;;  %3198 = vst [vmem:[%s3684_s24 + $0x158] sm:$0xff] %v3054_v38   ;;  %vm1448_vm2 = vcmp.gt.f32.partialorder %v3382_v42, 0.0  ;;  %v1576_v48 = vmul.f32 0.2, %v3382_v42  ;;  %v3319_v51 = vpop.f32.mrb[26].mxu0 }
 0x118   : > { %3165 = vst [vmem:[%s3684_s24 + $0x50] sm:$0xff] %v2889_v43   ;;  %3197 = vst [vmem:[%s3684_s24 + $0x150] sm:$0xff] %v3049_v44   ;;  %v1510_v49 = vmul.f32 0.2, %v943_v46  ;;  %v1574_v50 = vmul.f32 0.2, %v1199_v47  ;;  %v1640_v53 = vsel %vm1384_vm1, %v3318_v41, %v1512_v45 }
 0x119   : > { %v3383_v52 = vpop.f32.mrb[26].mxu1  ;;  %vm1382_vm3 = vcmp.gt.f32.partialorder %v943_v46, 0.0  ;;  %vm1385_vm4 = vcmp.gt.f32.partialorder %v3319_v51, 0.0  ;;  %v1513_v54 = vmul.f32 0.2, %v3319_v51  ;;  %v946_v55 = vpop.f32.mrb[27].mxu0  ;;  %v1704_v61 = vsel %vm1448_vm2, %v3382_v42, %v1576_v48 }
 0x11a   : > { %v1202_v56 = vpop.f32.mrb[27].mxu1  ;;  %vm1446_vm5 = vcmp.gt.f32.partialorder %v1199_v47, 0.0  ;;  %vm1449_vm6 = vcmp.gt.f32.partialorder %v3383_v52, 0.0  ;;  %v1577_v57 = vmul.f32 0.2, %v3383_v52  ;;  %vm1383_vm7 = vcmp.gt.f32.partialorder %v946_v55, 0.0 }
 0x11b   : > { %v1641_v58 = vsel %vm1385_vm4, %v3319_v51, %v1513_v54  ;;  %v1511_v59 = vmul.f32 0.2, %v946_v55  ;;  %vm1447_vm8 = vcmp.gt.f32.partialorder %v1202_v56, 0.0  ;;  %v1575_v60 = vmul.f32 0.2, %v1202_v56 }
 0x11c   : > { %v1638_v62 = vsel %vm1382_vm3, %v943_v46, %v1510_v49  ;;  %v2904_v63 = vpack.c.bf16 %v1641_v58, %v1640_v53  ;;  %v1705_v0 = vsel %vm1449_vm6, %v3383_v52, %v1577_v57  ;;  %v1702_v1 = vsel %vm1446_vm5, %v1199_v47, %v1574_v50 }
 0x11d   : > { %v3064_v2 = vpack.c.bf16 %v1705_v0, %v1704_v61  ;;  %v1639_v3 = vsel %vm1383_vm7, %v946_v55, %v1511_v59  ;;  %v1703_v4 = vsel %vm1447_vm8, %v1202_v56, %v1575_v60  ;;  %v3322_v5 = vpop.f32.mrb[28].mxu0 }
 0x11e   : > { %v3386_v6 = vpop.f32.mrb[28].mxu1  ;;  %3168 = vst [vmem:[%s3684_s24 + $0x68] sm:$0xff] %v2904_v63   ;;  %v2899_v7 = vpack.c.bf16 %v1639_v3, %v1638_v62  ;;  %v3059_v8 = vpack.c.bf16 %v1703_v4, %v1702_v1  ;;  %vm1388_vm9 = vcmp.gt.f32.partialorder %v3322_v5, 0.0  ;;  %v1516_v9 = vmul.f32 0.2, %v3322_v5  ;;  %v959_v10 = vpop.f32.mrb[29].mxu0 }
 0x11f   : > { %v1215_v11 = vpop.f32.mrb[29].mxu1  ;;  %3200 = vst [vmem:[%s3684_s24 + $0x168] sm:$0xff] %v3064_v2   ;;  %vm1452_vm10 = vcmp.gt.f32.partialorder %v3386_v6, 0.0  ;;  %v1580_v12 = vmul.f32 0.2, %v3386_v6  ;;  %v3323_v15 = vpop.f32.mrb[30].mxu0 }
 0x120   : > { %3167 = vst [vmem:[%s3684_s24 + $0x60] sm:$0xff] %v2899_v7   ;;  %3199 = vst [vmem:[%s3684_s24 + $0x160] sm:$0xff] %v3059_v8   ;;  %v1514_v13 = vmul.f32 0.2, %v959_v10  ;;  %v1578_v14 = vmul.f32 0.2, %v1215_v11  ;;  %v1644_v17 = vsel %vm1388_vm9, %v3322_v5, %v1516_v9 }
 0x121   : > { %v3387_v16 = vpop.f32.mrb[30].mxu1  ;;  %vm1386_vm11 = vcmp.gt.f32.partialorder %v959_v10, 0.0  ;;  %vm1389_vm12 = vcmp.gt.f32.partialorder %v3323_v15, 0.0  ;;  %v1517_v18 = vmul.f32 0.2, %v3323_v15  ;;  %v962_v19 = vpop.f32.mrb[31].mxu0  ;;  %v1708_v25 = vsel %vm1452_vm10, %v3386_v6, %v1580_v12 }
 0x122   : > { %v1218_v20 = vpop.f32.mrb[31].mxu1  ;;  %vm1450_vm13 = vcmp.gt.f32.partialorder %v1215_v11, 0.0  ;;  %vm1453_vm14 = vcmp.gt.f32.partialorder %v3387_v16, 0.0  ;;  %v1581_v21 = vmul.f32 0.2, %v3387_v16  ;;  %vm1387_vm15 = vcmp.gt.f32.partialorder %v962_v19, 0.0 }
 0x123   : > { %v1645_v22 = vsel %vm1389_vm12, %v3323_v15, %v1517_v18  ;;  %v1515_v23 = vmul.f32 0.2, %v962_v19  ;;  %vm1451_vm0 = vcmp.gt.f32.partialorder %v1218_v20, 0.0  ;;  %v1579_v24 = vmul.f32 0.2, %v1218_v20 }
 0x124   : > { %v1642_v26 = vsel %vm1386_vm11, %v959_v10, %v1514_v13  ;;  %v2914_v27 = vpack.c.bf16 %v1645_v22, %v1644_v17  ;;  %v1709_v28 = vsel %vm1453_vm14, %v3387_v16, %v1581_v21  ;;  %v1706_v29 = vsel %vm1450_vm13, %v1215_v11, %v1578_v14 }
 0x125   : > { %v3074_v30 = vpack.c.bf16 %v1709_v28, %v1708_v25  ;;  %v1643_v31 = vsel %vm1387_vm15, %v962_v19, %v1515_v23  ;;  %v1707_v32 = vsel %vm1451_vm0, %v1218_v20, %v1579_v24  ;;  %v3326_v33 = vpop.f32.mrb[32].mxu0 }
 0x126   : > { %v3390_v34 = vpop.f32.mrb[32].mxu1  ;;  %3170 = vst [vmem:[%s3684_s24 + $0x78] sm:$0xff] %v2914_v27   ;;  %v2909_v35 = vpack.c.bf16 %v1643_v31, %v1642_v26  ;;  %v3069_v36 = vpack.c.bf16 %v1707_v32, %v1706_v29  ;;  %vm1392_vm1 = vcmp.gt.f32.partialorder %v3326_v33, 0.0  ;;  %v1520_v37 = vmul.f32 0.2, %v3326_v33  ;;  %v975_v38 = vpop.f32.mrb[33].mxu0 }
 0x127   : > { %v1231_v39 = vpop.f32.mrb[33].mxu1  ;;  %3202 = vst [vmem:[%s3684_s24 + $0x178] sm:$0xff] %v3074_v30   ;;  %vm1456_vm2 = vcmp.gt.f32.partialorder %v3390_v34, 0.0  ;;  %v1584_v40 = vmul.f32 0.2, %v3390_v34  ;;  %v3327_v43 = vpop.f32.mrb[34].mxu0 }
 0x128   : > { %3169 = vst [vmem:[%s3684_s24 + $0x70] sm:$0xff] %v2909_v35   ;;  %3201 = vst [vmem:[%s3684_s24 + $0x170] sm:$0xff] %v3069_v36   ;;  %v1518_v41 = vmul.f32 0.2, %v975_v38  ;;  %v1582_v42 = vmul.f32 0.2, %v1231_v39  ;;  %v1648_v45 = vsel %vm1392_vm1, %v3326_v33, %v1520_v37 }
 0x129   : > { %v3391_v44 = vpop.f32.mrb[34].mxu1  ;;  %vm1390_vm3 = vcmp.gt.f32.partialorder %v975_v38, 0.0  ;;  %vm1393_vm4 = vcmp.gt.f32.partialorder %v3327_v43, 0.0  ;;  %v1521_v46 = vmul.f32 0.2, %v3327_v43  ;;  %v978_v47 = vpop.f32.mrb[35].mxu0  ;;  %v1712_v53 = vsel %vm1456_vm2, %v3390_v34, %v1584_v40 }
 0x12a   : > { %v1234_v48 = vpop.f32.mrb[35].mxu1  ;;  %vm1454_vm5 = vcmp.gt.f32.partialorder %v1231_v39, 0.0  ;;  %vm1457_vm6 = vcmp.gt.f32.partialorder %v3391_v44, 0.0  ;;  %v1585_v49 = vmul.f32 0.2, %v3391_v44  ;;  %vm1391_vm7 = vcmp.gt.f32.partialorder %v978_v47, 0.0 }
 0x12b   : > { %v1649_v50 = vsel %vm1393_vm4, %v3327_v43, %v1521_v46  ;;  %v1519_v51 = vmul.f32 0.2, %v978_v47  ;;  %vm1455_vm8 = vcmp.gt.f32.partialorder %v1234_v48, 0.0  ;;  %v1583_v52 = vmul.f32 0.2, %v1234_v48 }
 0x12c   : > { %v1646_v54 = vsel %vm1390_vm3, %v975_v38, %v1518_v41  ;;  %v2924_v55 = vpack.c.bf16 %v1649_v50, %v1648_v45  ;;  %v1713_v56 = vsel %vm1457_vm6, %v3391_v44, %v1585_v49  ;;  %v1710_v57 = vsel %vm1454_vm5, %v1231_v39, %v1582_v42 }
 0x12d   : > { %v3084_v58 = vpack.c.bf16 %v1713_v56, %v1712_v53  ;;  %v1647_v59 = vsel %vm1391_vm7, %v978_v47, %v1519_v51  ;;  %v1711_v60 = vsel %vm1455_vm8, %v1234_v48, %v1583_v52  ;;  %v3330_v61 = vpop.f32.mrb[36].mxu0 }
 0x12e   : > { %v3394_v62 = vpop.f32.mrb[36].mxu1  ;;  %3172 = vst [vmem:[%s3684_s24 + $0x88] sm:$0xff] %v2924_v55   ;;  %v2919_v63 = vpack.c.bf16 %v1647_v59, %v1646_v54  ;;  %v3079_v0 = vpack.c.bf16 %v1711_v60, %v1710_v57  ;;  %vm1396_vm9 = vcmp.gt.f32.partialorder %v3330_v61, 0.0  ;;  %v1524_v1 = vmul.f32 0.2, %v3330_v61  ;;  %v991_v2 = vpop.f32.mrb[37].mxu0 }
 0x12f   : > { %v1247_v3 = vpop.f32.mrb[37].mxu1  ;;  %3204 = vst [vmem:[%s3684_s24 + $0x188] sm:$0xff] %v3084_v58   ;;  %vm1460_vm10 = vcmp.gt.f32.partialorder %v3394_v62, 0.0  ;;  %v1588_v4 = vmul.f32 0.2, %v3394_v62  ;;  %v3331_v7 = vpop.f32.mrb[38].mxu0 }
 0x130   : > { %3171 = vst [vmem:[%s3684_s24 + $0x80] sm:$0xff] %v2919_v63   ;;  %3203 = vst [vmem:[%s3684_s24 + $0x180] sm:$0xff] %v3079_v0   ;;  %v1522_v5 = vmul.f32 0.2, %v991_v2  ;;  %v1586_v6 = vmul.f32 0.2, %v1247_v3  ;;  %v1652_v9 = vsel %vm1396_vm9, %v3330_v61, %v1524_v1 }
 0x131   : > { %v3395_v8 = vpop.f32.mrb[38].mxu1  ;;  %vm1394_vm11 = vcmp.gt.f32.partialorder %v991_v2, 0.0  ;;  %vm1397_vm12 = vcmp.gt.f32.partialorder %v3331_v7, 0.0  ;;  %v1525_v10 = vmul.f32 0.2, %v3331_v7  ;;  %v994_v11 = vpop.f32.mrb[39].mxu0  ;;  %v1716_v17 = vsel %vm1460_vm10, %v3394_v62, %v1588_v4 }
 0x132   : > { %v1250_v12 = vpop.f32.mrb[39].mxu1  ;;  %vm1458_vm13 = vcmp.gt.f32.partialorder %v1247_v3, 0.0  ;;  %vm1461_vm14 = vcmp.gt.f32.partialorder %v3395_v8, 0.0  ;;  %v1589_v13 = vmul.f32 0.2, %v3395_v8  ;;  %vm1395_vm15 = vcmp.gt.f32.partialorder %v994_v11, 0.0 }
 0x133   : > { %v1653_v14 = vsel %vm1397_vm12, %v3331_v7, %v1525_v10  ;;  %v1523_v15 = vmul.f32 0.2, %v994_v11  ;;  %vm1459_vm0 = vcmp.gt.f32.partialorder %v1250_v12, 0.0  ;;  %v1587_v16 = vmul.f32 0.2, %v1250_v12 }
 0x134   : > { %v1650_v18 = vsel %vm1394_vm11, %v991_v2, %v1522_v5  ;;  %v2934_v19 = vpack.c.bf16 %v1653_v14, %v1652_v9  ;;  %v1717_v20 = vsel %vm1461_vm14, %v3395_v8, %v1589_v13  ;;  %v1714_v21 = vsel %vm1458_vm13, %v1247_v3, %v1586_v6 }
 0x135   : > { %v3094_v22 = vpack.c.bf16 %v1717_v20, %v1716_v17  ;;  %v1651_v23 = vsel %vm1395_vm15, %v994_v11, %v1523_v15  ;;  %v1715_v24 = vsel %vm1459_vm0, %v1250_v12, %v1587_v16  ;;  %v3334_v25 = vpop.f32.mrb[40].mxu0 }
 0x136   : > { %v3398_v26 = vpop.f32.mrb[40].mxu1  ;;  %3174 = vst [vmem:[%s3684_s24 + $0x98] sm:$0xff] %v2934_v19   ;;  %v2929_v27 = vpack.c.bf16 %v1651_v23, %v1650_v18  ;;  %v3089_v28 = vpack.c.bf16 %v1715_v24, %v1714_v21  ;;  %vm1400_vm1 = vcmp.gt.f32.partialorder %v3334_v25, 0.0  ;;  %v1528_v29 = vmul.f32 0.2, %v3334_v25  ;;  %v1007_v30 = vpop.f32.mrb[41].mxu0 }
 0x137   : > { %v1263_v31 = vpop.f32.mrb[41].mxu1  ;;  %3206 = vst [vmem:[%s3684_s24 + $0x198] sm:$0xff] %v3094_v22   ;;  %vm1464_vm2 = vcmp.gt.f32.partialorder %v3398_v26, 0.0  ;;  %v1592_v32 = vmul.f32 0.2, %v3398_v26  ;;  %v3335_v35 = vpop.f32.mrb[42].mxu0 }
 0x138   : > { %3173 = vst [vmem:[%s3684_s24 + $0x90] sm:$0xff] %v2929_v27   ;;  %3205 = vst [vmem:[%s3684_s24 + $0x190] sm:$0xff] %v3089_v28   ;;  %v1526_v33 = vmul.f32 0.2, %v1007_v30  ;;  %v1590_v34 = vmul.f32 0.2, %v1263_v31  ;;  %v1656_v37 = vsel %vm1400_vm1, %v3334_v25, %v1528_v29 }
 0x139   : > { %v3399_v36 = vpop.f32.mrb[42].mxu1  ;;  %vm1398_vm3 = vcmp.gt.f32.partialorder %v1007_v30, 0.0  ;;  %vm1401_vm4 = vcmp.gt.f32.partialorder %v3335_v35, 0.0  ;;  %v1529_v38 = vmul.f32 0.2, %v3335_v35  ;;  %v1010_v39 = vpop.f32.mrb[43].mxu0  ;;  %v1720_v45 = vsel %vm1464_vm2, %v3398_v26, %v1592_v32 }
 0x13a   : > { %v1266_v40 = vpop.f32.mrb[43].mxu1  ;;  %vm1462_vm5 = vcmp.gt.f32.partialorder %v1263_v31, 0.0  ;;  %vm1465_vm6 = vcmp.gt.f32.partialorder %v3399_v36, 0.0  ;;  %v1593_v41 = vmul.f32 0.2, %v3399_v36  ;;  %vm1399_vm7 = vcmp.gt.f32.partialorder %v1010_v39, 0.0 }
 0x13b   : > { %v1657_v42 = vsel %vm1401_vm4, %v3335_v35, %v1529_v38  ;;  %v1527_v43 = vmul.f32 0.2, %v1010_v39  ;;  %vm1463_vm8 = vcmp.gt.f32.partialorder %v1266_v40, 0.0  ;;  %v1591_v44 = vmul.f32 0.2, %v1266_v40 }
 0x13c   : > { %v1654_v46 = vsel %vm1398_vm3, %v1007_v30, %v1526_v33  ;;  %v2944_v47 = vpack.c.bf16 %v1657_v42, %v1656_v37  ;;  %v1721_v48 = vsel %vm1465_vm6, %v3399_v36, %v1593_v41  ;;  %v1718_v49 = vsel %vm1462_vm5, %v1263_v31, %v1590_v34 }
 0x13d   : > { %v3104_v50 = vpack.c.bf16 %v1721_v48, %v1720_v45  ;;  %v1655_v51 = vsel %vm1399_vm7, %v1010_v39, %v1527_v43  ;;  %v1719_v52 = vsel %vm1463_vm8, %v1266_v40, %v1591_v44  ;;  %v3338_v53 = vpop.f32.mrb[44].mxu0 }
 0x13e   : > { %v3402_v54 = vpop.f32.mrb[44].mxu1  ;;  %3176 = vst [vmem:[%s3684_s24 + $0xa8] sm:$0xff] %v2944_v47   ;;  %v2939_v55 = vpack.c.bf16 %v1655_v51, %v1654_v46  ;;  %v3099_v56 = vpack.c.bf16 %v1719_v52, %v1718_v49  ;;  %vm1404_vm9 = vcmp.gt.f32.partialorder %v3338_v53, 0.0  ;;  %v1532_v57 = vmul.f32 0.2, %v3338_v53  ;;  %v1023_v58 = vpop.f32.mrb[45].mxu0 }
 0x13f   : > { %v1279_v59 = vpop.f32.mrb[45].mxu1  ;;  %3208 = vst [vmem:[%s3684_s24 + $0x1a8] sm:$0xff] %v3104_v50   ;;  %vm1468_vm10 = vcmp.gt.f32.partialorder %v3402_v54, 0.0  ;;  %v1596_v60 = vmul.f32 0.2, %v3402_v54  ;;  %v3339_v63 = vpop.f32.mrb[46].mxu0 }
 0x140   : > { %3175 = vst [vmem:[%s3684_s24 + $0xa0] sm:$0xff] %v2939_v55   ;;  %3207 = vst [vmem:[%s3684_s24 + $0x1a0] sm:$0xff] %v3099_v56   ;;  %v1530_v61 = vmul.f32 0.2, %v1023_v58  ;;  %v1594_v62 = vmul.f32 0.2, %v1279_v59  ;;  %v1660_v1 = vsel %vm1404_vm9, %v3338_v53, %v1532_v57 }
 0x141   : > { %v3403_v0 = vpop.f32.mrb[46].mxu1  ;;  %vm1402_vm11 = vcmp.gt.f32.partialorder %v1023_v58, 0.0  ;;  %vm1405_vm12 = vcmp.gt.f32.partialorder %v3339_v63, 0.0  ;;  %v1533_v2 = vmul.f32 0.2, %v3339_v63  ;;  %v1026_v3 = vpop.f32.mrb[47].mxu0  ;;  %v1724_v9 = vsel %vm1468_vm10, %v3402_v54, %v1596_v60 }
 0x142   : > { %v1282_v4 = vpop.f32.mrb[47].mxu1  ;;  %vm1466_vm13 = vcmp.gt.f32.partialorder %v1279_v59, 0.0  ;;  %vm1469_vm14 = vcmp.gt.f32.partialorder %v3403_v0, 0.0  ;;  %v1597_v5 = vmul.f32 0.2, %v3403_v0  ;;  %vm1403_vm15 = vcmp.gt.f32.partialorder %v1026_v3, 0.0 }
 0x143   : > { %v1661_v6 = vsel %vm1405_vm12, %v3339_v63, %v1533_v2  ;;  %v1531_v7 = vmul.f32 0.2, %v1026_v3  ;;  %vm1467_vm0 = vcmp.gt.f32.partialorder %v1282_v4, 0.0  ;;  %v1595_v8 = vmul.f32 0.2, %v1282_v4 }
 0x144   : > { %v1658_v10 = vsel %vm1402_vm11, %v1023_v58, %v1530_v61  ;;  %v2954_v11 = vpack.c.bf16 %v1661_v6, %v1660_v1  ;;  %v1725_v12 = vsel %vm1469_vm14, %v3403_v0, %v1597_v5  ;;  %v1722_v13 = vsel %vm1466_vm13, %v1279_v59, %v1594_v62 }
 0x145   : > { %v3114_v14 = vpack.c.bf16 %v1725_v12, %v1724_v9  ;;  %v1659_v15 = vsel %vm1403_vm15, %v1026_v3, %v1531_v7  ;;  %v1723_v16 = vsel %vm1467_vm0, %v1282_v4, %v1595_v8  ;;  %v3342_v17 = vpop.f32.mrb[48].mxu0 }
 0x146   : > { %v3406_v18 = vpop.f32.mrb[48].mxu1  ;;  %3178 = vst [vmem:[%s3684_s24 + $0xb8] sm:$0xff] %v2954_v11   ;;  %v2949_v19 = vpack.c.bf16 %v1659_v15, %v1658_v10  ;;  %v3109_v20 = vpack.c.bf16 %v1723_v16, %v1722_v13  ;;  %vm1408_vm1 = vcmp.gt.f32.partialorder %v3342_v17, 0.0  ;;  %v1536_v21 = vmul.f32 0.2, %v3342_v17  ;;  %v1039_v22 = vpop.f32.mrb[49].mxu0 }
 0x147   : > { %v1295_v23 = vpop.f32.mrb[49].mxu1  ;;  %3210 = vst [vmem:[%s3684_s24 + $0x1b8] sm:$0xff] %v3114_v14   ;;  %vm1472_vm2 = vcmp.gt.f32.partialorder %v3406_v18, 0.0  ;;  %v1600_v24 = vmul.f32 0.2, %v3406_v18  ;;  %v3343_v27 = vpop.f32.mrb[50].mxu0 }
 0x148   : > { %3177 = vst [vmem:[%s3684_s24 + $0xb0] sm:$0xff] %v2949_v19   ;;  %3209 = vst [vmem:[%s3684_s24 + $0x1b0] sm:$0xff] %v3109_v20   ;;  %v1534_v25 = vmul.f32 0.2, %v1039_v22  ;;  %v1598_v26 = vmul.f32 0.2, %v1295_v23  ;;  %v1664_v29 = vsel %vm1408_vm1, %v3342_v17, %v1536_v21 }
 0x149   : > { %v3407_v28 = vpop.f32.mrb[50].mxu1  ;;  %vm1406_vm3 = vcmp.gt.f32.partialorder %v1039_v22, 0.0  ;;  %vm1409_vm4 = vcmp.gt.f32.partialorder %v3343_v27, 0.0  ;;  %v1537_v30 = vmul.f32 0.2, %v3343_v27  ;;  %v1042_v31 = vpop.f32.mrb[51].mxu0  ;;  %v1728_v37 = vsel %vm1472_vm2, %v3406_v18, %v1600_v24 }
 0x14a   : > { %v1298_v32 = vpop.f32.mrb[51].mxu1  ;;  %vm1470_vm5 = vcmp.gt.f32.partialorder %v1295_v23, 0.0  ;;  %vm1473_vm6 = vcmp.gt.f32.partialorder %v3407_v28, 0.0  ;;  %v1601_v33 = vmul.f32 0.2, %v3407_v28  ;;  %vm1407_vm7 = vcmp.gt.f32.partialorder %v1042_v31, 0.0 }
 0x14b   : > { %v1665_v34 = vsel %vm1409_vm4, %v3343_v27, %v1537_v30  ;;  %v1535_v35 = vmul.f32 0.2, %v1042_v31  ;;  %vm1471_vm8 = vcmp.gt.f32.partialorder %v1298_v32, 0.0  ;;  %v1599_v36 = vmul.f32 0.2, %v1298_v32 }
 0x14c   : > { %v1662_v38 = vsel %vm1406_vm3, %v1039_v22, %v1534_v25  ;;  %v2964_v39 = vpack.c.bf16 %v1665_v34, %v1664_v29  ;;  %v1729_v40 = vsel %vm1473_vm6, %v3407_v28, %v1601_v33  ;;  %v1726_v41 = vsel %vm1470_vm5, %v1295_v23, %v1598_v26 }
 0x14d   : > { %v3124_v42 = vpack.c.bf16 %v1729_v40, %v1728_v37  ;;  %v1663_v43 = vsel %vm1407_vm7, %v1042_v31, %v1535_v35  ;;  %v1727_v44 = vsel %vm1471_vm8, %v1298_v32, %v1599_v36  ;;  %v3346_v45 = vpop.f32.mrb[52].mxu0 }
 0x14e   : > { %v3410_v46 = vpop.f32.mrb[52].mxu1  ;;  %3180 = vst [vmem:[%s3684_s24 + $0xc8] sm:$0xff] %v2964_v39   ;;  %v2959_v47 = vpack.c.bf16 %v1663_v43, %v1662_v38  ;;  %v3119_v48 = vpack.c.bf16 %v1727_v44, %v1726_v41  ;;  %vm1412_vm9 = vcmp.gt.f32.partialorder %v3346_v45, 0.0  ;;  %v1540_v49 = vmul.f32 0.2, %v3346_v45  ;;  %v1055_v50 = vpop.f32.mrb[53].mxu0 }
 0x14f   : > { %v1311_v51 = vpop.f32.mrb[53].mxu1  ;;  %3212 = vst [vmem:[%s3684_s24 + $0x1c8] sm:$0xff] %v3124_v42   ;;  %vm1476_vm10 = vcmp.gt.f32.partialorder %v3410_v46, 0.0  ;;  %v1604_v52 = vmul.f32 0.2, %v3410_v46  ;;  %v3347_v55 = vpop.f32.mrb[54].mxu0 }
 0x150   : > { %3179 = vst [vmem:[%s3684_s24 + $0xc0] sm:$0xff] %v2959_v47   ;;  %3211 = vst [vmem:[%s3684_s24 + $0x1c0] sm:$0xff] %v3119_v48   ;;  %v1538_v53 = vmul.f32 0.2, %v1055_v50  ;;  %v1602_v54 = vmul.f32 0.2, %v1311_v51  ;;  %v1668_v57 = vsel %vm1412_vm9, %v3346_v45, %v1540_v49 }
 0x151   : > { %v3411_v56 = vpop.f32.mrb[54].mxu1  ;;  %vm1410_vm11 = vcmp.gt.f32.partialorder %v1055_v50, 0.0  ;;  %vm1413_vm12 = vcmp.gt.f32.partialorder %v3347_v55, 0.0  ;;  %v1541_v58 = vmul.f32 0.2, %v3347_v55  ;;  %v1058_v59 = vpop.f32.mrb[55].mxu0  ;;  %v1732_v1 = vsel %vm1476_vm10, %v3410_v46, %v1604_v52 }
 0x152   : > { %v1314_v60 = vpop.f32.mrb[55].mxu1  ;;  %vm1474_vm13 = vcmp.gt.f32.partialorder %v1311_v51, 0.0  ;;  %vm1477_vm14 = vcmp.gt.f32.partialorder %v3411_v56, 0.0  ;;  %v1605_v61 = vmul.f32 0.2, %v3411_v56  ;;  %vm1411_vm15 = vcmp.gt.f32.partialorder %v1058_v59, 0.0 }
 0x153   : > { %v1669_v62 = vsel %vm1413_vm12, %v3347_v55, %v1541_v58  ;;  %v1539_v63 = vmul.f32 0.2, %v1058_v59  ;;  %vm1475_vm0 = vcmp.gt.f32.partialorder %v1314_v60, 0.0  ;;  %v1603_v0 = vmul.f32 0.2, %v1314_v60 }
 0x154   : > { %v1666_v2 = vsel %vm1410_vm11, %v1055_v50, %v1538_v53  ;;  %v2974_v3 = vpack.c.bf16 %v1669_v62, %v1668_v57  ;;  %v1733_v4 = vsel %vm1477_vm14, %v3411_v56, %v1605_v61  ;;  %v1730_v5 = vsel %vm1474_vm13, %v1311_v51, %v1602_v54 }
 0x155   : > { %v3134_v6 = vpack.c.bf16 %v1733_v4, %v1732_v1  ;;  %v1667_v7 = vsel %vm1411_vm15, %v1058_v59, %v1539_v63  ;;  %v1731_v8 = vsel %vm1475_vm0, %v1314_v60, %v1603_v0  ;;  %v3350_v9 = vpop.f32.mrb[56].mxu0 }
 0x156   : > { %v3414_v10 = vpop.f32.mrb[56].mxu1  ;;  %3182 = vst [vmem:[%s3684_s24 + $0xd8] sm:$0xff] %v2974_v3   ;;  %v2969_v11 = vpack.c.bf16 %v1667_v7, %v1666_v2  ;;  %v3129_v12 = vpack.c.bf16 %v1731_v8, %v1730_v5  ;;  %vm1416_vm1 = vcmp.gt.f32.partialorder %v3350_v9, 0.0  ;;  %v1544_v13 = vmul.f32 0.2, %v3350_v9  ;;  %v1071_v14 = vpop.f32.mrb[57].mxu0 }
 0x157   : > { %v1327_v15 = vpop.f32.mrb[57].mxu1  ;;  %3214 = vst [vmem:[%s3684_s24 + $0x1d8] sm:$0xff] %v3134_v6   ;;  %vm1480_vm2 = vcmp.gt.f32.partialorder %v3414_v10, 0.0  ;;  %v1608_v16 = vmul.f32 0.2, %v3414_v10  ;;  %v3351_v19 = vpop.f32.mrb[58].mxu0 }
 0x158   : > { %3181 = vst [vmem:[%s3684_s24 + $0xd0] sm:$0xff] %v2969_v11   ;;  %3213 = vst [vmem:[%s3684_s24 + $0x1d0] sm:$0xff] %v3129_v12   ;;  %v1542_v17 = vmul.f32 0.2, %v1071_v14  ;;  %v1606_v18 = vmul.f32 0.2, %v1327_v15  ;;  %v1672_v21 = vsel %vm1416_vm1, %v3350_v9, %v1544_v13 }
 0x159   : > { %v3415_v20 = vpop.f32.mrb[58].mxu1  ;;  %vm1414_vm3 = vcmp.gt.f32.partialorder %v1071_v14, 0.0  ;;  %vm1417_vm4 = vcmp.gt.f32.partialorder %v3351_v19, 0.0  ;;  %v1545_v22 = vmul.f32 0.2, %v3351_v19  ;;  %v1074_v23 = vpop.f32.mrb[59].mxu0  ;;  %v1736_v29 = vsel %vm1480_vm2, %v3414_v10, %v1608_v16 }
 0x15a   : > { %v1330_v24 = vpop.f32.mrb[59].mxu1  ;;  %vm1478_vm5 = vcmp.gt.f32.partialorder %v1327_v15, 0.0  ;;  %vm1481_vm6 = vcmp.gt.f32.partialorder %v3415_v20, 0.0  ;;  %v1609_v25 = vmul.f32 0.2, %v3415_v20  ;;  %vm1415_vm7 = vcmp.gt.f32.partialorder %v1074_v23, 0.0 }
 0x15b   : > { %v1673_v26 = vsel %vm1417_vm4, %v3351_v19, %v1545_v22  ;;  %v1543_v27 = vmul.f32 0.2, %v1074_v23  ;;  %vm1479_vm8 = vcmp.gt.f32.partialorder %v1330_v24, 0.0  ;;  %v1607_v28 = vmul.f32 0.2, %v1330_v24 }
 0x15c   : > { %v1670_v30 = vsel %vm1414_vm3, %v1071_v14, %v1542_v17  ;;  %v2984_v31 = vpack.c.bf16 %v1673_v26, %v1672_v21  ;;  %v1737_v32 = vsel %vm1481_vm6, %v3415_v20, %v1609_v25  ;;  %v1734_v33 = vsel %vm1478_vm5, %v1327_v15, %v1606_v18 }
 0x15d   : > { %v3144_v34 = vpack.c.bf16 %v1737_v32, %v1736_v29  ;;  %v1671_v35 = vsel %vm1415_vm7, %v1074_v23, %v1543_v27  ;;  %v1735_v36 = vsel %vm1479_vm8, %v1330_v24, %v1607_v28  ;;  %v3354_v37 = vpop.f32.mrb[60].mxu0 }
 0x15e   : > { %v3418_v38 = vpop.f32.mrb[60].mxu1  ;;  %3184 = vst [vmem:[%s3684_s24 + $0xe8] sm:$0xff] %v2984_v31   ;;  %v2979_v39 = vpack.c.bf16 %v1671_v35, %v1670_v30  ;;  %v3139_v40 = vpack.c.bf16 %v1735_v36, %v1734_v33  ;;  %vm1420_vm9 = vcmp.gt.f32.partialorder %v3354_v37, 0.0  ;;  %v1548_v41 = vmul.f32 0.2, %v3354_v37  ;;  %v1087_v42 = vpop.f32.mrb[61].mxu0 }
 0x15f   : > { %v1343_v43 = vpop.f32.mrb[61].mxu1  ;;  %3216 = vst [vmem:[%s3684_s24 + $0x1e8] sm:$0xff] %v3144_v34   ;;  %vm1484_vm10 = vcmp.gt.f32.partialorder %v3418_v38, 0.0  ;;  %v1612_v44 = vmul.f32 0.2, %v3418_v38  ;;  %v3355_v47 = vpop.f32.mrb[62].mxu0 }
 0x160   : > { %3183 = vst [vmem:[%s3684_s24 + $0xe0] sm:$0xff] %v2979_v39   ;;  %3215 = vst [vmem:[%s3684_s24 + $0x1e0] sm:$0xff] %v3139_v40   ;;  %v1546_v45 = vmul.f32 0.2, %v1087_v42  ;;  %v1610_v46 = vmul.f32 0.2, %v1343_v43  ;;  %v1676_v49 = vsel %vm1420_vm9, %v3354_v37, %v1548_v41 }
 0x161   : > { %v3419_v48 = vpop.f32.mrb[62].mxu1  ;;  %vm1418_vm11 = vcmp.gt.f32.partialorder %v1087_v42, 0.0  ;;  %vm1421_vm12 = vcmp.gt.f32.partialorder %v3355_v47, 0.0  ;;  %v1549_v50 = vmul.f32 0.2, %v3355_v47  ;;  %v1090_v51 = vpop.f32.mrb[63].mxu0  ;;  %v1740_v57 = vsel %vm1484_vm10, %v3418_v38, %v1612_v44 }
 0x162   : > { %v1346_v52 = vpop.f32.mrb[63].mxu1  ;;  %vm1482_vm13 = vcmp.gt.f32.partialorder %v1343_v43, 0.0  ;;  %vm1485_vm14 = vcmp.gt.f32.partialorder %v3419_v48, 0.0  ;;  %v1613_v53 = vmul.f32 0.2, %v3419_v48  ;;  %vm1419_vm15 = vcmp.gt.f32.partialorder %v1090_v51, 0.0 }
 0x163   : > { %v1677_v54 = vsel %vm1421_vm12, %v3355_v47, %v1549_v50  ;;  %v1547_v55 = vmul.f32 0.2, %v1090_v51  ;;  %vm1483_vm0 = vcmp.gt.f32.partialorder %v1346_v52, 0.0  ;;  %v1611_v56 = vmul.f32 0.2, %v1346_v52 }
 0x164   : > { %v1674_v58 = vsel %vm1418_vm11, %v1087_v42, %v1546_v45  ;;  %v2994_v59 = vpack.c.bf16 %v1677_v54, %v1676_v49  ;;  %v1741_v60 = vsel %vm1485_vm14, %v3419_v48, %v1613_v53  ;;  %v1738_v61 = vsel %vm1482_vm13, %v1343_v43, %v1610_v46 }
 0x165   : > { %v3154_v62 = vpack.c.bf16 %v1741_v60, %v1740_v57  ;;  %v1675_v63 = vsel %vm1419_vm15, %v1090_v51, %v1547_v55  ;;  %v1739_v0 = vsel %vm1483_vm0, %v1346_v52, %v1611_v56 }
 0x166   : > { %3186 = vst [vmem:[%s3684_s24 + $0xf8] sm:$0xff] %v2994_v59   ;;  %v2989_v1 = vpack.c.bf16 %v1675_v63, %v1674_v58  ;;  %v3149_v2 = vpack.c.bf16 %v1739_v0, %v1738_v61 }
 0x167   : > { %3218 = vst [vmem:[%s3684_s24 + $0x1f8] sm:$0xff] %v3154_v62  }
 0x168   : > { %3185 = vst [vmem:[%s3684_s24 + $0xf0] sm:$0xff] %v2989_v1   ;;  %3217 = vst [vmem:[%s3684_s24 + $0x1f0] sm:$0xff] %v3149_v2  }
 0x169 PF: > { %s12_s9 = sadd.s32 1, %s3507_s9  }
 0x16a   : > { %p9_p4 = scmp.ge.s32.totalorder %s12_s9, 4  }
 0x16c   :  { %11 = sbr.rel (!%p9_p4) target bundleno = 1 (0x1), region = 58 }

// kernel: discriminator_forward.6
= control target key start
LH: loop header
LB: loop body
LE: loop exit
PB: predicated region body
PF: predicated region fallthrough
CT: control target
= control target key end

     0   :  { %s3773_s1 = inlined_call_operand.vmem [shape: bf16[128,128], index: 1, kind: input, shape index: {}]   ;;  %s3774_s0 = inlined_call_operand.vmem [shape: bf16[512,128], index: 0, kind: input, shape index: {}]   ;;  %s3775_s2 = inlined_call_operand.vmem [shape: f32[1,128], index: 2, kind: input, shape index: {}]   ;;  %s3776_s3 = inlined_call_operand.vmem [shape: f32[1,128], index: 3, kind: input, shape index: {}]   ;;  %s3777_s4 = inlined_call_operand.vmem [shape: bf16[512,128], index: 4, kind: output, shape index: {}]  }
   0x1   :  { %v1991_v0 = vld [vmem:[%s3773_s1] sm:$0xff]   ;;  %v1992_v1 = vld [vmem:[%s3773_s1 + $0x8] sm:$0xff]   ;;  %v1993_v2 = vld [vmem:[%s3773_s1 + $0x10] sm:$0xff]  }
   0x2   :  { %1895 = vmatprep.subr.bf16.mxu0 %v1991_v0  ;;  %1975 = vmatprep.subr.bf16.mxu1 %v1991_v0  ;;  %v1994_v3 = vld [vmem:[%s3773_s1 + $0x18] sm:$0xff]   ;;  %v1999_v4 = vld [vmem:[%s3774_s0] sm:$0xff]   ;;  %v1996_v6 = vld [vmem:[%s3773_s1 + $0x28] sm:$0xff]  }
   0x3   :  { %1896 = vmatpush3.bf16.msra.mxu0 %v1991_v0  ;;  %1983 = vmatpush3.bf16.msra.mxu1 %v1991_v0  ;;  %v1995_v5 = vld [vmem:[%s3773_s1 + $0x20] sm:$0xff]   ;;  %v1997_v7 = vld [vmem:[%s3773_s1 + $0x30] sm:$0xff]   ;;  %v1998_v8 = vld [vmem:[%s3773_s1 + $0x38] sm:$0xff]  }
   0x4   :  { %1897 = vmatprep.subr.bf16.mxu0 %v1992_v1  ;;  %1976 = vmatprep.subr.bf16.mxu1 %v1992_v1  ;;  %v2015_v9 = vld [vmem:[%s3774_s0 + $0x80] sm:$0xff]   ;;  %v2000_v10 = vld [vmem:[%s3774_s0 + $0x8] sm:$0xff]   ;;  %v2001_v11 = vld [vmem:[%s3774_s0 + $0x10] sm:$0xff]  }
   0x5   :  { %1911 = vmatprep.mubr.bf16.mxu0 %v1999_v4  ;;  %1943 = vmatprep.mubr.bf16.mxu1 %v2015_v9  ;;  %v2016_v12 = vld [vmem:[%s3774_s0 + $0x88] sm:$0xff]   ;;  %v2017_v13 = vld [vmem:[%s3774_s0 + $0x90] sm:$0xff]   ;;  %v2002_v14 = vld [vmem:[%s3774_s0 + $0x18] sm:$0xff]  }
   0x6   :  { %v2003_v15 = vld [vmem:[%s3774_s0 + $0x20] sm:$0xff]   ;;  %v2018_v16 = vld [vmem:[%s3774_s0 + $0x98] sm:$0xff]   ;;  %v2004_v18 = vld [vmem:[%s3774_s0 + $0x28] sm:$0xff]  }
   0x7   :  { %1898 = vmatpush3.bf16.msra.mxu0 %v1992_v1  ;;  %1984 = vmatpush3.bf16.msra.mxu1 %v1992_v1  ;;  %v2019_v17 = vld [vmem:[%s3774_s0 + $0xa0] sm:$0xff]   ;;  %v2020_v19 = vld [vmem:[%s3774_s0 + $0xa8] sm:$0xff]   ;;  %v2005_v20 = vld [vmem:[%s3774_s0 + $0x30] sm:$0xff]  }
   0x8   :  { %1899 = vmatprep.subr.bf16.mxu0 %v1993_v2  ;;  %1977 = vmatprep.subr.bf16.mxu1 %v1993_v2  ;;  %v2021_v21 = vld [vmem:[%s3774_s0 + $0xb0] sm:$0xff]   ;;  %v2006_v22 = vld [vmem:[%s3774_s0 + $0x38] sm:$0xff]   ;;  %v2007_v24 = vld [vmem:[%s3774_s0 + $0x40] sm:$0xff]  }
   0x9   :  { %v2022_v23 = vld [vmem:[%s3774_s0 + $0xb8] sm:$0xff]   ;;  %v2023_v25 = vld [vmem:[%s3774_s0 + $0xc0] sm:$0xff]   ;;  %v2008_v26 = vld [vmem:[%s3774_s0 + $0x48] sm:$0xff]  }
   0xa   :  { %v2024_v27 = vld [vmem:[%s3774_s0 + $0xc8] sm:$0xff]   ;;  %v2009_v28 = vld [vmem:[%s3774_s0 + $0x50] sm:$0xff]   ;;  %v2010_v30 = vld [vmem:[%s3774_s0 + $0x58] sm:$0xff]  }
   0xb   :  { %1900 = vmatpush3.bf16.msra.mxu0 %v1993_v2  ;;  %1985 = vmatpush3.bf16.msra.mxu1 %v1993_v2  ;;  %v2025_v29 = vld [vmem:[%s3774_s0 + $0xd0] sm:$0xff]   ;;  %v2026_v31 = vld [vmem:[%s3774_s0 + $0xd8] sm:$0xff]   ;;  %v2011_v32 = vld [vmem:[%s3774_s0 + $0x60] sm:$0xff]  }
   0xc   :  { %1901 = vmatprep.subr.bf16.mxu0 %v1994_v3  ;;  %1978 = vmatprep.subr.bf16.mxu1 %v1994_v3  ;;  %v2027_v33 = vld [vmem:[%s3774_s0 + $0xe0] sm:$0xff]   ;;  %v2012_v34 = vld [vmem:[%s3774_s0 + $0x68] sm:$0xff]   ;;  %v2013_v36 = vld [vmem:[%s3774_s0 + $0x70] sm:$0xff]  }
   0xd   :  { %v2028_v35 = vld [vmem:[%s3774_s0 + $0xe8] sm:$0xff]   ;;  %v2029_v37 = vld [vmem:[%s3774_s0 + $0xf0] sm:$0xff]   ;;  %v2014_v38 = vld [vmem:[%s3774_s0 + $0x78] sm:$0xff]  }
   0xe   :  { %v2030_v39 = vld [vmem:[%s3774_s0 + $0xf8] sm:$0xff]  }
   0xf   :  { %1902 = vmatpush3.bf16.msra.mxu0 %v1994_v3  ;;  %1986 = vmatpush3.bf16.msra.mxu1 %v1994_v3 }
  0x10   :  { %1903 = vmatprep.subr.bf16.mxu0 %v1995_v5  ;;  %1979 = vmatprep.subr.bf16.mxu1 %v1995_v5 }
  0x13   :  { %1904 = vmatpush3.bf16.msra.mxu0 %v1995_v5  ;;  %1987 = vmatpush3.bf16.msra.mxu1 %v1995_v5 }
  0x14   :  { %1905 = vmatprep.subr.bf16.mxu0 %v1996_v6  ;;  %1980 = vmatprep.subr.bf16.mxu1 %v1996_v6 }
  0x17   :  { %1906 = vmatpush3.bf16.msra.mxu0 %v1996_v6  ;;  %1988 = vmatpush3.bf16.msra.mxu1 %v1996_v6 }
  0x18   :  { %1907 = vmatprep.subr.bf16.mxu0 %v1997_v7  ;;  %1981 = vmatprep.subr.bf16.mxu1 %v1997_v7 }
  0x1b   :  { %1908 = vmatpush3.bf16.msra.mxu0 %v1997_v7  ;;  %1989 = vmatpush3.bf16.msra.mxu1 %v1997_v7 }
  0x1c   :  { %1909 = vmatprep.subr.bf16.mxu0 %v1998_v8  ;;  %1982 = vmatprep.subr.bf16.mxu1 %v1998_v8 }
  0x1f   :  { %1910 = vmatpush3.bf16.msra.mxu0 %v1998_v8  ;;  %1990 = vmatpush3.bf16.msra.mxu1 %v1998_v8 }
  0x22   :  { %1912 = vmatmul.mubr.bf16.vlgmr.msra.gmra.mrb[0].mxu0 %v2000_v10  ;;  %1944 = vmatmul.mubr.bf16.vlgmr.msra.gmra.mrb[0].mxu1 %v2016_v12 }
  0x23   :  { %1915 = vmatprep.mubr.bf16.mxu0 %v2001_v11  ;;  %1947 = vmatprep.mubr.bf16.mxu1 %v2017_v13 }
  0x2a   :  { %1916 = vmatmul.mubr.bf16.gmra.mrb[4].mxu0 %v2002_v14  ;;  %1948 = vmatmul.mubr.bf16.gmra.mrb[4].mxu1 %v2018_v16 }
  0x2b   :  { %1919 = vmatprep.mubr.bf16.mxu0 %v2003_v15  ;;  %1951 = vmatprep.mubr.bf16.mxu1 %v2019_v17 }
  0x32   :  { %1920 = vmatmul.mubr.bf16.gmra.mrb[8].mxu0 %v2004_v18  ;;  %1952 = vmatmul.mubr.bf16.gmra.mrb[8].mxu1 %v2020_v19 }
  0x33   :  { %1923 = vmatprep.mubr.bf16.mxu0 %v2005_v20  ;;  %1955 = vmatprep.mubr.bf16.mxu1 %v2021_v21 }
  0x3a   :  { %1924 = vmatmul.mubr.bf16.gmra.mrb[12].mxu0 %v2006_v22  ;;  %1956 = vmatmul.mubr.bf16.gmra.mrb[12].mxu1 %v2022_v23 }
  0x3b   :  { %1927 = vmatprep.mubr.bf16.mxu0 %v2007_v24  ;;  %1959 = vmatprep.mubr.bf16.mxu1 %v2023_v25 }
  0x42   :  { %1928 = vmatmul.mubr.bf16.gmra.mrb[16].mxu0 %v2008_v26  ;;  %1960 = vmatmul.mubr.bf16.gmra.mrb[16].mxu1 %v2024_v27 }
  0x43   :  { %1931 = vmatprep.mubr.bf16.mxu0 %v2009_v28  ;;  %1963 = vmatprep.mubr.bf16.mxu1 %v2025_v29 }
  0x4a   :  { %1932 = vmatmul.mubr.bf16.gmra.mrb[20].mxu0 %v2010_v30  ;;  %1964 = vmatmul.mubr.bf16.gmra.mrb[20].mxu1 %v2026_v31 }
  0x4b   :  { %1935 = vmatprep.mubr.bf16.mxu0 %v2011_v32  ;;  %1967 = vmatprep.mubr.bf16.mxu1 %v2027_v33 }
  0x52   :  { %1936 = vmatmul.mubr.bf16.gmra.mrb[24].mxu0 %v2012_v34  ;;  %1968 = vmatmul.mubr.bf16.gmra.mrb[24].mxu1 %v2028_v35 }
  0x53   :  { %1939 = vmatprep.mubr.bf16.mxu0 %v2013_v36  ;;  %1971 = vmatprep.mubr.bf16.mxu1 %v2029_v37 }
  0x5a   :  { %1940 = vmatmul.mubr.bf16.gmra.mrb[28].mxu0 %v2014_v38  ;;  %1972 = vmatmul.mubr.bf16.gmra.mrb[28].mxu1 %v2030_v39 }
  0xf5   :  { %v2178_v40 = vpop.f32.mrb[0].mxu0  ;;  %v2180_v41 = vpop.f32.mrb[0].mxu1 }
  0xf6   :  { %v2182_v42 = vpop.f32.mrb[1].mxu0  ;;  %v2184_v43 = vpop.f32.mrb[1].mxu1  ;;  %v699_v51 = vmul.f32 %v2178_v40, %v2178_v40 }
  0xf7   :  { %v2186_v44 = vpop.f32.mrb[2].mxu0  ;;  %v2188_v45 = vpop.f32.mrb[2].mxu1  ;;  %v697_v48 = vmul.f32 %v2182_v42, %v2182_v42 }
  0xf8   :  { %v2190_v46 = vpop.f32.mrb[3].mxu0  ;;  %v2192_v47 = vpop.f32.mrb[3].mxu1  ;;  %v700_v54 = vmul.f32 %v2186_v44, %v2186_v44 }
  0xf9   :  { %v627_v49 = vadd.f32 %v2190_v46, %v2182_v42  ;;  %v698_v50 = vmul.f32 %v2190_v46, %v2190_v46 }
  0xfb   :  { %v628_v52 = vadd.f32 %v2178_v40, %v627_v49  ;;  %v761_v53 = vadd.f32 %v698_v50, %v697_v48 }
  0xfd   :  { %v762_v55 = vadd.f32 %v761_v53, %v699_v51  ;;  %v2205_v56 = vpop.f32.mrb[4].mxu0  ;;  %v629_v57 = vadd.f32 %v2186_v44, %v628_v52  ;;  %v2208_v58 = vpop.f32.mrb[4].mxu1 }
  0xfe   :  { %v2210_v59 = vpop.f32.mrb[5].mxu0  ;;  %v2212_v60 = vpop.f32.mrb[5].mxu1  ;;  %v703_v7 = vmul.f32 %v2205_v56, %v2205_v56 }
  0xff   :  { %v630_v61 = vadd.f32 %v629_v57, %v2210_v59  ;;  %v701_v62 = vmul.f32 %v2210_v59, %v2210_v59  ;;  %v763_v63 = vadd.f32 %v762_v55, %v700_v54  ;;  %v2217_v0 = vpop.f32.mrb[6].mxu0  ;;  %v2219_v1 = vpop.f32.mrb[6].mxu1 }
 0x100   :  { %v2221_v2 = vpop.f32.mrb[7].mxu0  ;;  %v2223_v3 = vpop.f32.mrb[7].mxu1  ;;  %v704_v10 = vmul.f32 %v2217_v0, %v2217_v0 }
 0x101   :  { %v764_v4 = vadd.f32 %v763_v63, %v701_v62  ;;  %v631_v5 = vadd.f32 %v630_v61, %v2221_v2  ;;  %v702_v6 = vmul.f32 %v2221_v2, %v2221_v2 }
 0x103   :  { %v632_v8 = vadd.f32 %v2205_v56, %v631_v5  ;;  %v765_v9 = vadd.f32 %v764_v4, %v702_v6 }
 0x105   :  { %v766_v11 = vadd.f32 %v765_v9, %v703_v7  ;;  %v2233_v12 = vpop.f32.mrb[8].mxu0  ;;  %v633_v13 = vadd.f32 %v2217_v0, %v632_v8  ;;  %v2236_v14 = vpop.f32.mrb[8].mxu1 }
 0x106   :  { %v2238_v15 = vpop.f32.mrb[9].mxu0  ;;  %v2240_v16 = vpop.f32.mrb[9].mxu1  ;;  %v707_v27 = vmul.f32 %v2233_v12, %v2233_v12 }
 0x107   :  { %v634_v17 = vadd.f32 %v633_v13, %v2238_v15  ;;  %v705_v18 = vmul.f32 %v2238_v15, %v2238_v15  ;;  %v767_v19 = vadd.f32 %v766_v11, %v704_v10  ;;  %v2245_v20 = vpop.f32.mrb[10].mxu0  ;;  %v2247_v21 = vpop.f32.mrb[10].mxu1 }
 0x108   :  { %v2249_v22 = vpop.f32.mrb[11].mxu0  ;;  %v2251_v23 = vpop.f32.mrb[11].mxu1  ;;  %v708_v30 = vmul.f32 %v2245_v20, %v2245_v20 }
 0x109   :  { %v768_v24 = vadd.f32 %v767_v19, %v705_v18  ;;  %v635_v25 = vadd.f32 %v634_v17, %v2249_v22  ;;  %v706_v26 = vmul.f32 %v2249_v22, %v2249_v22 }
 0x10b   :  { %v636_v28 = vadd.f32 %v2233_v12, %v635_v25  ;;  %v769_v29 = vadd.f32 %v768_v24, %v706_v26 }
 0x10d   :  { %v770_v31 = vadd.f32 %v769_v29, %v707_v27  ;;  %v2261_v32 = vpop.f32.mrb[12].mxu0  ;;  %v637_v33 = vadd.f32 %v2245_v20, %v636_v28  ;;  %v2264_v34 = vpop.f32.mrb[12].mxu1 }
 0x10e   :  { %v2266_v35 = vpop.f32.mrb[13].mxu0  ;;  %v2268_v36 = vpop.f32.mrb[13].mxu1  ;;  %v711_v55 = vmul.f32 %v2261_v32, %v2261_v32 }
 0x10f   :  { %v638_v37 = vadd.f32 %v637_v33, %v2266_v35  ;;  %v709_v38 = vmul.f32 %v2266_v35, %v2266_v35  ;;  %v771_v39 = vadd.f32 %v770_v31, %v708_v30  ;;  %v2273_v48 = vpop.f32.mrb[14].mxu0  ;;  %v2275_v49 = vpop.f32.mrb[14].mxu1 }
 0x110   :  { %3833 = vst [vmem:[#allocation2_spill] sm:$0xff] %v2273_v48  ;;  %v2277_v50 = vpop.f32.mrb[15].mxu0  ;;  %v2279_v51 = vpop.f32.mrb[15].mxu1  ;;  %v712_v62 = vmul.f32 %v2273_v48, %v2273_v48 }
 0x111   :  { %v772_v52 = vadd.f32 %v771_v39, %v709_v38  ;;  %v639_v53 = vadd.f32 %v638_v37, %v2277_v50  ;;  %v710_v54 = vmul.f32 %v2277_v50, %v2277_v50 }
 0x113   :  { %v640_v57 = vadd.f32 %v2261_v32, %v639_v53  ;;  %v773_v61 = vadd.f32 %v772_v52, %v710_v54 }
 0x115   :  { %v774_v63 = vadd.f32 %v773_v61, %v711_v55  ;;  %v2289_v4 = vpop.f32.mrb[16].mxu0  ;;  %v641_v5 = vadd.f32 %v2273_v48, %v640_v57  ;;  %v2292_v6 = vpop.f32.mrb[16].mxu1  ;;  %v730_v48 = vmul.f32 %v2192_v47, %v2192_v47 }
 0x116   :  { %3834 = vst [vmem:[#allocation3_spill] sm:$0xff] %v2289_v4  ;;  %v2294_v7 = vpop.f32.mrb[17].mxu0  ;;  %v2296_v8 = vpop.f32.mrb[17].mxu1  ;;  %v715_v27 = vmul.f32 %v2289_v4, %v2289_v4 }
 0x117   :  { %3835 = vst [vmem:[#allocation4_spill] sm:$0xff] %v2294_v7  ;;  %v642_v9 = vadd.f32 %v641_v5, %v2294_v7  ;;  %v713_v10 = vmul.f32 %v2294_v7, %v2294_v7  ;;  %v775_v11 = vadd.f32 %v774_v63, %v712_v62  ;;  %v2301_v13 = vpop.f32.mrb[18].mxu0  ;;  %v2303_v17 = vpop.f32.mrb[18].mxu1 }
 0x118   :  { %3836 = vst [vmem:[#allocation5_spill] sm:$0xff] %v2301_v13  ;;  %v2305_v18 = vpop.f32.mrb[19].mxu0  ;;  %v2307_v19 = vpop.f32.mrb[19].mxu1  ;;  %v716_v30 = vmul.f32 %v2301_v13, %v2301_v13 }
 0x119   :  { %3837 = vst [vmem:[#allocation6_spill] sm:$0xff] %v2305_v18  ;;  %v776_v24 = vadd.f32 %v775_v11, %v713_v10  ;;  %v643_v25 = vadd.f32 %v642_v9, %v2305_v18  ;;  %v714_v26 = vmul.f32 %v2305_v18, %v2305_v18 }
 0x11b   :  { %v644_v28 = vadd.f32 %v2289_v4, %v643_v25  ;;  %v777_v29 = vadd.f32 %v776_v24, %v714_v26 }
 0x11d   :  { %v778_v31 = vadd.f32 %v777_v29, %v715_v27  ;;  %v2317_v33 = vpop.f32.mrb[20].mxu0  ;;  %v645_v37 = vadd.f32 %v2301_v13, %v644_v28  ;;  %v2320_v38 = vpop.f32.mrb[20].mxu1 }
 0x11e   :  { %3838 = vst [vmem:[#allocation7_spill] sm:$0xff] %v2317_v33  ;;  %3839 = vst [vmem:[#allocation8_spill] sm:$0xff] %v2320_v38  ;;  %v2322_v39 = vpop.f32.mrb[21].mxu0  ;;  %v2324_v52 = vpop.f32.mrb[21].mxu1  ;;  %v719_v11 = vmul.f32 %v2317_v33, %v2317_v33 }
 0x11f   :  { %3840 = vst [vmem:[#allocation9_spill] sm:$0xff] %v2322_v39  ;;  %v646_v53 = vadd.f32 %v645_v37, %v2322_v39  ;;  %v717_v54 = vmul.f32 %v2322_v39, %v2322_v39  ;;  %v779_v55 = vadd.f32 %v778_v31, %v716_v30  ;;  %v2329_v57 = vpop.f32.mrb[22].mxu0  ;;  %v2331_v61 = vpop.f32.mrb[22].mxu1 }
 0x120   :  { %3841 = vst [vmem:[#allocation10_spill] sm:$0xff] %v2329_v57  ;;  %3842 = vst [vmem:[#allocation11_spill] sm:$0xff] %v2331_v61  ;;  %v2333_v62 = vpop.f32.mrb[23].mxu0  ;;  %v2335_v63 = vpop.f32.mrb[23].mxu1  ;;  %v720_v26 = vmul.f32 %v2329_v57, %v2329_v57 }
 0x121   :  { %3843 = vst [vmem:[#allocation12_spill] sm:$0xff] %v2333_v62  ;;  %v780_v5 = vadd.f32 %v779_v55, %v717_v54  ;;  %v647_v9 = vadd.f32 %v646_v53, %v2333_v62  ;;  %v718_v10 = vmul.f32 %v2333_v62, %v2333_v62 }
 0x123   :  { %v648_v24 = vadd.f32 %v2317_v33, %v647_v9  ;;  %v781_v25 = vadd.f32 %v780_v5, %v718_v10 }
 0x125   :  { %v782_v27 = vadd.f32 %v781_v25, %v719_v11  ;;  %v2345_v28 = vpop.f32.mrb[24].mxu0  ;;  %v649_v29 = vadd.f32 %v2329_v57, %v648_v24  ;;  %v2348_v30 = vpop.f32.mrb[24].mxu1 }
 0x126   :  { %3844 = vst [vmem:[#allocation13_spill] sm:$0xff] %v2345_v28  ;;  %3845 = vst [vmem:[#allocation14_spill] sm:$0xff] %v2348_v30  ;;  %v2350_v31 = vpop.f32.mrb[25].mxu0  ;;  %v2352_v37 = vpop.f32.mrb[25].mxu1 }
 0x127   :  { %3846 = vst [vmem:[#allocation15_spill] sm:$0xff] %v2350_v31  ;;  %3847 = vst [vmem:[#allocation16_spill] sm:$0xff] %v2352_v37  ;;  %v650_v53 = vadd.f32 %v649_v29, %v2350_v31  ;;  %v721_v54 = vmul.f32 %v2350_v31, %v2350_v31  ;;  %v783_v55 = vadd.f32 %v782_v27, %v720_v26  ;;  %v2357_v5 = vpop.f32.mrb[26].mxu0  ;;  %v2359_v9 = vpop.f32.mrb[26].mxu1 }
 0x128   :  { %3848 = vst [vmem:[#allocation17_spill] sm:$0xff] %v2357_v5  ;;  %3849 = vst [vmem:[#allocation18_spill] sm:$0xff] %v2359_v9  ;;  %v2361_v10 = vpop.f32.mrb[27].mxu0  ;;  %v2363_v11 = vpop.f32.mrb[27].mxu1  ;;  %v723_v29 = vmul.f32 %v2345_v28, %v2345_v28  ;;  %v724_v27 = vmul.f32 %v2357_v5, %v2357_v5 }
 0x129   :  { %3850 = vst [vmem:[#allocation19_spill] sm:$0xff] %v2361_v10  ;;  %3851 = vst [vmem:[#allocation20_spill] sm:$0xff] %v2363_v11  ;;  %v784_v24 = vadd.f32 %v783_v55, %v721_v54  ;;  %v651_v25 = vadd.f32 %v650_v53, %v2361_v10  ;;  %v722_v57 = vmul.f32 %v2361_v10, %v2361_v10 }
 0x12b   :  { %v652_v31 = vadd.f32 %v2345_v28, %v651_v25  ;;  %v785_v26 = vadd.f32 %v784_v24, %v722_v57 }
 0x12d   :  { %v786_v33 = vadd.f32 %v785_v26, %v723_v29  ;;  %v2373_v62 = vpop.f32.mrb[28].mxu0  ;;  %v653_v39 = vadd.f32 %v2357_v5, %v652_v31  ;;  %v2376_v54 = vpop.f32.mrb[28].mxu1 }
 0x12e   :  { %3852 = vst [vmem:[#allocation21_spill] sm:$0xff] %v2376_v54  ;;  %v2378_v53 = vpop.f32.mrb[29].mxu0  ;;  %v2380_v55 = vpop.f32.mrb[29].mxu1 }
 0x12f   :  { %3853 = vst [vmem:[#allocation22_spill] sm:$0xff] %v2378_v53  ;;  %3854 = vst [vmem:[#allocation23_spill] sm:$0xff] %v2380_v55  ;;  %v654_v10 = vadd.f32 %v653_v39, %v2378_v53  ;;  %v725_v25 = vmul.f32 %v2378_v53, %v2378_v53  ;;  %v787_v57 = vadd.f32 %v786_v33, %v724_v27  ;;  %v2385_v24 = vpop.f32.mrb[30].mxu0  ;;  %v2387_v28 = vpop.f32.mrb[30].mxu1 }
 0x130   :  { %v2389_v29 = vpop.f32.mrb[31].mxu0  ;;  %v2391_v26 = vpop.f32.mrb[31].mxu1  ;;  %v727_v39 = vmul.f32 %v2373_v62, %v2373_v62  ;;  %v728_v27 = vmul.f32 %v2385_v24, %v2385_v24 }
 0x131   :  { %3855 = vst [vmem:[#allocation24_spill] sm:$0xff] %v2389_v29  ;;  %3856 = vst [vmem:[#allocation25_spill] sm:$0xff] %v2391_v26  ;;  %v788_v31 = vadd.f32 %v787_v57, %v725_v25  ;;  %v655_v5 = vadd.f32 %v654_v10, %v2389_v29  ;;  %v726_v13 = vmul.f32 %v2389_v29, %v2389_v29 }
 0x132   :  { %v729_v25 = vmul.f32 %v2184_v43, %v2184_v43 }
 0x133   :  { %v656_v53 = vadd.f32 %v2373_v62, %v655_v5  ;;  %v789_v33 = vadd.f32 %v788_v31, %v726_v13  ;;  %v731_v13 = vmul.f32 %v2180_v41, %v2180_v41 }
 0x135   :  { %v790_v4 = vadd.f32 %v789_v33, %v727_v39  ;;  %v657_v18 = vadd.f32 %v2385_v24, %v656_v53  ;;  %v732_v53 = vmul.f32 %v2188_v45, %v2188_v45 }
 0x137   :  { %v658_v10 = vadd.f32 %v657_v18, %v2184_v43  ;;  %v791_v57 = vadd.f32 %v790_v4, %v728_v27  ;;  %v733_v4 = vmul.f32 %v2212_v60, %v2212_v60 }
 0x139   :  { %v792_v7 = vadd.f32 %v791_v57, %v729_v25  ;;  %v659_v29 = vadd.f32 %v658_v10, %v2192_v47  ;;  %v734_v57 = vmul.f32 %v2223_v3, %v2223_v3 }
 0x13b   :  { %v660_v5 = vadd.f32 %v2180_v41, %v659_v29  ;;  %v793_v31 = vadd.f32 %v792_v7, %v730_v48  ;;  %v735_v48 = vmul.f32 %v2208_v58, %v2208_v58 }
 0x13d   :  { %v794_v39 = vadd.f32 %v793_v31, %v731_v13  ;;  %v661_v33 = vadd.f32 %v2188_v45, %v660_v5  ;;  %v736_v13 = vmul.f32 %v2219_v1, %v2219_v1 }
 0x13f   :  { %v662_v18 = vadd.f32 %v661_v33, %v2212_v60  ;;  %v795_v27 = vadd.f32 %v794_v39, %v732_v53  ;;  %v737_v53 = vmul.f32 %v2240_v16, %v2240_v16 }
 0x141   :  { %v796_v25 = vadd.f32 %v795_v27, %v733_v4  ;;  %v663_v10 = vadd.f32 %v662_v18, %v2223_v3  ;;  %v738_v27 = vmul.f32 %v2251_v23, %v2251_v23 }
 0x143   :  { %v664_v7 = vadd.f32 %v2208_v58, %v663_v10  ;;  %v797_v29 = vadd.f32 %v796_v25, %v734_v57  ;;  %v739_v25 = vmul.f32 %v2236_v14, %v2236_v14 }
 0x145   :  { %v798_v5 = vadd.f32 %v797_v29, %v735_v48  ;;  %v665_v31 = vadd.f32 %v2219_v1, %v664_v7  ;;  %v740_v48 = vmul.f32 %v2247_v21, %v2247_v21 }
 0x147   :  { %v666_v39 = vadd.f32 %v665_v31, %v2240_v16  ;;  %v799_v33 = vadd.f32 %v798_v5, %v736_v13  ;;  %v741_v13 = vmul.f32 %v2268_v36, %v2268_v36 }
 0x149   :  { %v800_v4 = vadd.f32 %v799_v33, %v737_v53  ;;  %v667_v18 = vadd.f32 %v666_v39, %v2251_v23  ;;  %v742_v33 = vmul.f32 %v2279_v51, %v2279_v51 }
 0x14b   :  { %v668_v10 = vadd.f32 %v2236_v14, %v667_v18  ;;  %v801_v57 = vadd.f32 %v800_v4, %v738_v27  ;;  %v743_v4 = vmul.f32 %v2264_v34, %v2264_v34 }
 0x14d   :  { %v802_v7 = vadd.f32 %v801_v57, %v739_v25  ;;  %v669_v29 = vadd.f32 %v2247_v21, %v668_v10  ;;  %v744_v25 = vmul.f32 %v2275_v49, %v2275_v49 }
 0x14f   :  { %v670_v5 = vadd.f32 %v669_v29, %v2268_v36  ;;  %v803_v31 = vadd.f32 %v802_v7, %v740_v48  ;;  %v745_v48 = vmul.f32 %v2296_v8, %v2296_v8 }
 0x151   :  { %v804_v53 = vadd.f32 %v803_v31, %v741_v13  ;;  %v671_v39 = vadd.f32 %v670_v5, %v2279_v51  ;;  %v746_v31 = vmul.f32 %v2307_v19, %v2307_v19 }
 0x153   :  { %v672_v18 = vadd.f32 %v2264_v34, %v671_v39  ;;  %v805_v27 = vadd.f32 %v804_v53, %v742_v33  ;;  %v747_v53 = vmul.f32 %v2292_v6, %v2292_v6 }
 0x155   :  { %v806_v10 = vadd.f32 %v805_v27, %v743_v4  ;;  %v673_v57 = vadd.f32 %v2275_v49, %v672_v18  ;;  %v748_v4 = vmul.f32 %v2303_v17, %v2303_v17 }
 0x157   :  { %v674_v7 = vadd.f32 %v673_v57, %v2296_v8  ;;  %v807_v29 = vadd.f32 %v806_v10, %v744_v25  ;;  %v749_v25 = vmul.f32 %v2324_v52, %v2324_v52 }
 0x159   :  { %v808_v13 = vadd.f32 %v807_v29, %v745_v48  ;;  %v675_v5 = vadd.f32 %v674_v7, %v2307_v19  ;;  %v750_v29 = vmul.f32 %v2335_v63, %v2335_v63 }
 0x15b   :  { %v676_v39 = vadd.f32 %v2292_v6, %v675_v5  ;;  %v809_v33 = vadd.f32 %v808_v13, %v746_v31  ;;  %v751_v13 = vmul.f32 %v2320_v38, %v2320_v38 }
 0x15d   :  { %v810_v18 = vadd.f32 %v809_v33, %v747_v53  ;;  %v677_v27 = vadd.f32 %v2303_v17, %v676_v39  ;;  %v752_v53 = vmul.f32 %v2331_v61, %v2331_v61 }
 0x15f   :  { %v678_v10 = vadd.f32 %v677_v27, %v2324_v52  ;;  %v811_v57 = vadd.f32 %v810_v18, %v748_v4  ;;  %v753_v4 = vmul.f32 %v2352_v37, %v2352_v37 }
 0x161   :  { %v812_v48 = vadd.f32 %v811_v57, %v749_v25  ;;  %v679_v7 = vadd.f32 %v678_v10, %v2335_v63  ;;  %v754_v57 = vmul.f32 %v2363_v11, %v2363_v11 }
 0x163   :  { %v680_v5 = vadd.f32 %v2320_v38, %v679_v7  ;;  %v813_v31 = vadd.f32 %v812_v48, %v750_v29  ;;  %v755_v48 = vmul.f32 %v2348_v30, %v2348_v30 }
 0x165   :  { %v814_v39 = vadd.f32 %v813_v31, %v751_v13  ;;  %v681_v33 = vadd.f32 %v2331_v61, %v680_v5  ;;  %v756_v13 = vmul.f32 %v2359_v9, %v2359_v9 }
 0x167   :  { %v682_v18 = vadd.f32 %v681_v33, %v2352_v37  ;;  %v815_v27 = vadd.f32 %v814_v39, %v752_v53  ;;  %v757_v53 = vmul.f32 %v2380_v55, %v2380_v55 }
 0x169   :  { %v816_v25 = vadd.f32 %v815_v27, %v753_v4  ;;  %v683_v10 = vadd.f32 %v682_v18, %v2363_v11  ;;  %v758_v27 = vmul.f32 %v2391_v26, %v2391_v26 }
 0x16b   :  { %v684_v7 = vadd.f32 %v2348_v30, %v683_v10  ;;  %v817_v29 = vadd.f32 %v816_v25, %v754_v57  ;;  %v759_v25 = vmul.f32 %v2376_v54, %v2376_v54 }
 0x16d   :  { %v818_v5 = vadd.f32 %v817_v29, %v755_v48  ;;  %v685_v31 = vadd.f32 %v2359_v9, %v684_v7  ;;  %v760_v48 = vmul.f32 %v2387_v28, %v2387_v28 }
 0x16f   :  { %v686_v39 = vadd.f32 %v685_v31, %v2380_v55  ;;  %v819_v33 = vadd.f32 %v818_v5, %v756_v13 }
 0x171   :  { %v820_v4 = vadd.f32 %v819_v33, %v757_v53  ;;  %v687_v18 = vadd.f32 %v686_v39, %v2391_v26 }
 0x173   :  { %v688_v10 = vadd.f32 %v2376_v54, %v687_v18  ;;  %v821_v57 = vadd.f32 %v820_v4, %v758_v27 }
 0x175   :  { %v689_v7 = vadd.f32 %v2387_v28, %v688_v10  ;;  %v822_v29 = vadd.f32 %v821_v57, %v759_v25  ;;  %v841_v25 = vlaneseq  ;;  %v833_v57 = vld [vmem:[%s3775_s2] sm:$0x1] }
 0x177   :  { %v690_v31 = vrot.slane %v689_v7, 4  ;;  %v823_v13 = vadd.f32 %v822_v29, %v760_v48  ;;  %v2498_v10 = vshrl.u32 %v841_v25, 7  ;;  %v3864_v25 = vld [vmem:[#allocation7_spill] sm:$0xff] }
 0x179   :  { %v691_v5 = vadd.f32 %v690_v31, %v689_v7  ;;  %v824_v53 = vrot.slane %v823_v13, 4  ;;  %v3802_v48 = vsub.s32 0, %v2498_v10  ;;  %v3857_v31 = vld [vmem:[#allocation2_spill] sm:$0xff] }
 0x17b   :  { %v692_v39 = vrot.slane %v691_v5, 2  ;;  %v825_v33 = vadd.f32 %v824_v53, %v823_v13  ;;  %v3858_v13 = vld [vmem:[#allocation4_spill] sm:$0xff]  ;;  %v3860_v53 = vld [vmem:[#allocation3_spill] sm:$0xff] }
 0x17d   :  { %v693_v55 = vadd.f32 %v692_v39, %v691_v5  ;;  %v826_v26 = vrot.slane %v825_v33, 2  ;;  %v3859_v5 = vld [vmem:[#allocation6_spill] sm:$0xff]  ;;  %v3861_v39 = vld [vmem:[#allocation5_spill] sm:$0xff] }
 0x17f   :  { %v694_v9 = vrot.slane %v693_v55, 1  ;;  %v827_v30 = vadd.f32 %v826_v26, %v825_v33  ;;  %v3862_v33 = vld [vmem:[#allocation9_spill] sm:$0xff] }
 0x181   :  { %v695_v11 = vadd.f32 %v694_v9, %v693_v55  ;;  %v828_v37 = vrot.slane %v827_v30, 1 }
 0x183   :  { %v696_v18 = vmul.f32 0.001953125, %v695_v11  ;;  %v829_v4 = vadd.f32 %v828_v37, %v827_v30  ;;  %v2507_v30 = vld [vmem:[%s3776_s3] sm:$0x1] }
 0x185   :  { %v830_v27 = vmul.f32 0.001953125, %v829_v4  ;;  %v831_v54 = vmul.f32 %v696_v18, %v696_v18  ;;  %v3863_v4 = vld [vmem:[#allocation12_spill] sm:$0xff] }
 0x187   :  { %v832_v61 = vsub.f32 %v830_v27, %v831_v54 }
 0x189   :  { %v834_v38 = vadd.f32 1e-05, %v832_v61  ;;  %v3870_v61 = vld [vmem:[#allocation22_spill] sm:$0xff] }
 0x18b   :  { %2031 = vrsqrt.f32 %v834_v38 }
 0x195   :  { %v2032_v7 = vpop.eup %2031 }
 0x196   :  { %v836_v26 = vmul.f32 %v2032_v7, %v833_v57  ;;  %v3865_v7 = vld [vmem:[#allocation10_spill] sm:$0xff] }
 0x198   :  { %v2509_v37 = vmul.f32 %v836_v26, %v696_v18  ;;  %v2513_v38 = vrot.slane %v836_v26, %v3802_v48  ;;  %v3871_v48 = vld [vmem:[#allocation24_spill] sm:$0xff] }
 0x19a   :  { %v2519_v9 = vmul.f32 %v2513_v38, %v2182_v42  ;;  %v2523_v11 = vmul.f32 %v2513_v38, %v2190_v46  ;;  %v2527_v54 = vmul.f32 %v2178_v40, %v2513_v38  ;;  %v2531_v55 = vmul.f32 %v2186_v44, %v2513_v38 }
 0x19b   :  { %v2535_v29 = vmul.f32 %v2513_v38, %v2210_v59  ;;  %v2539_v42 = vmul.f32 %v2513_v38, %v2221_v2  ;;  %v2543_v46 = vmul.f32 %v2205_v56, %v2513_v38  ;;  %v2547_v40 = vmul.f32 %v2217_v0, %v2513_v38 }
 0x19c   :  { %v2551_v44 = vmul.f32 %v2513_v38, %v2238_v15  ;;  %v2555_v59 = vmul.f32 %v2513_v38, %v2249_v22  ;;  %v2559_v2 = vmul.f32 %v2233_v12, %v2513_v38  ;;  %v2563_v56 = vmul.f32 %v2245_v20, %v2513_v38 }
 0x19d   :  { %v2567_v0 = vmul.f32 %v2513_v38, %v2266_v35  ;;  %v2571_v15 = vmul.f32 %v2513_v38, %v2277_v50  ;;  %v2575_v22 = vmul.f32 %v2261_v32, %v2513_v38  ;;  %v2579_v12 = vmul.f32 %v3857_v31, %v2513_v38  ;;  %v3866_v31 = vld [vmem:[#allocation15_spill] sm:$0xff] }
 0x19e   :  { %v2583_v20 = vmul.f32 %v2513_v38, %v3858_v13  ;;  %v2587_v35 = vmul.f32 %v2513_v38, %v3859_v5  ;;  %v2591_v50 = vmul.f32 %v3860_v53, %v2513_v38  ;;  %v2595_v32 = vmul.f32 %v3861_v39, %v2513_v38  ;;  %v3867_v5 = vld [vmem:[#allocation19_spill] sm:$0xff]  ;;  %v3868_v39 = vld [vmem:[#allocation13_spill] sm:$0xff] }
 0x19f   :  { %v2599_v18 = vmul.f32 %v2513_v38, %v3862_v33  ;;  %v2603_v27 = vmul.f32 %v2513_v38, %v3863_v4  ;;  %v2607_v57 = vmul.f32 %v3864_v25, %v2513_v38  ;;  %v2611_v26 = vmul.f32 %v3865_v7, %v2513_v38  ;;  %v3869_v4 = vld [vmem:[#allocation17_spill] sm:$0xff] }
 0x1a0   :  { %v2615_v13 = vmul.f32 %v2513_v38, %v3866_v31  ;;  %v2619_v53 = vmul.f32 %v2513_v38, %v3867_v5  ;;  %v2623_v33 = vmul.f32 %v3868_v39, %v2513_v38  ;;  %v2627_v25 = vmul.f32 %v3869_v4, %v2513_v38 }
 0x1a1   :  { %v2631_v7 = vmul.f32 %v2513_v38, %v3870_v61  ;;  %v2635_v31 = vmul.f32 %v2513_v38, %v3871_v48  ;;  %v2639_v5 = vmul.f32 %v2373_v62, %v2513_v38  ;;  %v2643_v39 = vmul.f32 %v2385_v24, %v2513_v38 }
 0x1a2   :  { %v2647_v4 = vmul.f32 %v2513_v38, %v2184_v43  ;;  %v2651_v61 = vmul.f32 %v2513_v38, %v2192_v47  ;;  %v2655_v48 = vmul.f32 %v2180_v41, %v2513_v38  ;;  %v2659_v62 = vmul.f32 %v2188_v45, %v2513_v38 }
 0x1a3   :  { %v2663_v24 = vmul.f32 %v2513_v38, %v2212_v60  ;;  %v2667_v43 = vmul.f32 %v2513_v38, %v2223_v3  ;;  %v2671_v47 = vmul.f32 %v2208_v58, %v2513_v38  ;;  %v2675_v41 = vmul.f32 %v2219_v1, %v2513_v38 }
 0x1a4   :  { %v2679_v45 = vmul.f32 %v2513_v38, %v2240_v16  ;;  %v2683_v60 = vmul.f32 %v2513_v38, %v2251_v23  ;;  %v2687_v3 = vmul.f32 %v2236_v14, %v2513_v38  ;;  %v2691_v58 = vmul.f32 %v2247_v21, %v2513_v38 }
 0x1a5   :  { %v2695_v1 = vmul.f32 %v2513_v38, %v2268_v36  ;;  %v2699_v16 = vmul.f32 %v2513_v38, %v2279_v51  ;;  %v2703_v23 = vmul.f32 %v2264_v34, %v2513_v38  ;;  %v2707_v14 = vmul.f32 %v2275_v49, %v2513_v38 }
 0x1a6   :  { %v2711_v21 = vmul.f32 %v2513_v38, %v2296_v8  ;;  %v2715_v36 = vmul.f32 %v2513_v38, %v2307_v19  ;;  %v2719_v51 = vmul.f32 %v2292_v6, %v2513_v38  ;;  %v2723_v34 = vmul.f32 %v2303_v17, %v2513_v38 }
 0x1a7   :  { %v2727_v49 = vmul.f32 %v2513_v38, %v2324_v52  ;;  %v2731_v8 = vmul.f32 %v2513_v38, %v2335_v63 }
 0x1a8   :  { %3872 = vst [vmem:[#allocation2_spill] sm:$0xff] %v2711_v21  ;;  %3873 = vst [vmem:[#allocation4_spill] sm:$0xff] %v2715_v36  ;;  %v3878_v21 = vld [vmem:[#allocation8_spill] sm:$0xff]  ;;  %v3880_v36 = vld [vmem:[#allocation11_spill] sm:$0xff] }
 0x1a9   :  { %3874 = vst [vmem:[#allocation6_spill] sm:$0xff] %v2719_v51  ;;  %3875 = vst [vmem:[#allocation3_spill] sm:$0xff] %v2723_v34  ;;  %v2735_v19 = vmul.f32 %v3878_v21, %v2513_v38  ;;  %v2739_v6 = vmul.f32 %v3880_v36, %v2513_v38  ;;  %v3882_v51 = vld [vmem:[#allocation16_spill] sm:$0xff] }
 0x1aa   :  { %3876 = vst [vmem:[#allocation5_spill] sm:$0xff] %v2727_v49  ;;  %3877 = vst [vmem:[#allocation9_spill] sm:$0xff] %v2731_v8  ;;  %v2743_v17 = vmul.f32 %v2513_v38, %v3882_v51  ;;  %v3884_v34 = vld [vmem:[#allocation20_spill] sm:$0xff]  ;;  %v3885_v49 = vld [vmem:[#allocation14_spill] sm:$0xff] }
 0x1ab   :  { %3879 = vst [vmem:[#allocation12_spill] sm:$0xff] %v2735_v19  ;;  %3881 = vst [vmem:[#allocation7_spill] sm:$0xff] %v2739_v6  ;;  %v2747_v52 = vmul.f32 %v2513_v38, %v3884_v34  ;;  %v2751_v63 = vmul.f32 %v3885_v49, %v2513_v38  ;;  %v3887_v8 = vld [vmem:[#allocation18_spill] sm:$0xff]  ;;  %v3889_v19 = vld [vmem:[#allocation23_spill] sm:$0xff]  ;;  %v2771_v49 = vmul.f32 %v2387_v28, %v2513_v38 }
 0x1ac   :  { %3883 = vst [vmem:[#allocation10_spill] sm:$0xff] %v2743_v17  ;;  %v2755_v21 = vmul.f32 %v3887_v8, %v2513_v38  ;;  %v2759_v36 = vmul.f32 %v2513_v38, %v3889_v19  ;;  %v3890_v6 = vld [vmem:[#allocation25_spill] sm:$0xff]  ;;  %v3893_v8 = vsub.f32 %v2507_v30, %v2509_v37 }
 0x1ad   :  { %3886 = vst [vmem:[#allocation15_spill] sm:$0xff] %v2751_v63  ;;  %v2763_v51 = vmul.f32 %v2513_v38, %v3890_v6  ;;  %v3891_v17 = vld [vmem:[#allocation21_spill] sm:$0xff]  ;;  %v3892_v63 = vsub.s32 0, %v2498_v10 }
 0x1ae   :  { %3888 = vst [vmem:[#allocation19_spill] sm:$0xff] %v2755_v21  ;;  %v2767_v34 = vmul.f32 %v3891_v17, %v2513_v38 }
 0x1af   :  { %v2778_v21 = vrot.slane %v3893_v8, %v3892_v63 }
 0x1b0   :  { %v3901_v63 = vld [vmem:[#allocation3_spill] sm:$0xff] }
 0x1b1   :  { %v2782_v19 = vadd.f32 %v2778_v21, %v2519_v9  ;;  %v2786_v6 = vadd.f32 %v2778_v21, %v2523_v11  ;;  %v2790_v17 = vadd.f32 %v2778_v21, %v2527_v54  ;;  %v2794_v28 = vadd.f32 %v2778_v21, %v2531_v55  ;;  %v3903_v8 = vld [vmem:[#allocation5_spill] sm:$0xff] }
 0x1b2   :  { %v2798_v10 = vadd.f32 %v2778_v21, %v2535_v29  ;;  %v2802_v30 = vadd.f32 %v2778_v21, %v2539_v42  ;;  %v2806_v37 = vadd.f32 %v2778_v21, %v2543_v46  ;;  %v2810_v38 = vadd.f32 %v2778_v21, %v2547_v40 }
 0x1b3   :  { %v2814_v9 = vadd.f32 %v2778_v21, %v2551_v44  ;;  %v2818_v11 = vadd.f32 %v2778_v21, %v2555_v59  ;;  %v2822_v54 = vadd.f32 %v2778_v21, %v2559_v2  ;;  %v2826_v55 = vadd.f32 %v2778_v21, %v2563_v56 }
 0x1b4   :  { %v2830_v29 = vadd.f32 %v2778_v21, %v2567_v0  ;;  %v2834_v42 = vadd.f32 %v2778_v21, %v2571_v15  ;;  %v2838_v46 = vadd.f32 %v2778_v21, %v2575_v22  ;;  %v2842_v40 = vadd.f32 %v2778_v21, %v2579_v12 }
 0x1b5   :  { %v2846_v44 = vadd.f32 %v2778_v21, %v2583_v20  ;;  %v2850_v59 = vadd.f32 %v2778_v21, %v2587_v35  ;;  %v2854_v2 = vadd.f32 %v2778_v21, %v2591_v50  ;;  %v2858_v56 = vadd.f32 %v2778_v21, %v2595_v32 }
 0x1b6   :  { %v2862_v0 = vadd.f32 %v2778_v21, %v2599_v18  ;;  %v2866_v15 = vadd.f32 %v2778_v21, %v2603_v27  ;;  %v2870_v22 = vadd.f32 %v2778_v21, %v2607_v57  ;;  %v2874_v12 = vadd.f32 %v2778_v21, %v2611_v26 }
 0x1b7   :  { %v2878_v20 = vadd.f32 %v2778_v21, %v2615_v13  ;;  %v2882_v35 = vadd.f32 %v2778_v21, %v2619_v53  ;;  %v2886_v50 = vadd.f32 %v2778_v21, %v2623_v33  ;;  %v2890_v32 = vadd.f32 %v2778_v21, %v2627_v25 }
 0x1b8   :  { %v2894_v18 = vadd.f32 %v2778_v21, %v2631_v7  ;;  %v2898_v27 = vadd.f32 %v2778_v21, %v2635_v31  ;;  %v2902_v57 = vadd.f32 %v2778_v21, %v2639_v5  ;;  %v2906_v26 = vadd.f32 %v2778_v21, %v2643_v39 }
 0x1b9   :  { %v2910_v13 = vadd.f32 %v2778_v21, %v2647_v4  ;;  %v2914_v53 = vadd.f32 %v2778_v21, %v2651_v61  ;;  %v2918_v33 = vadd.f32 %v2778_v21, %v2655_v48  ;;  %v2922_v25 = vadd.f32 %v2778_v21, %v2659_v62 }
 0x1ba   :  { %v2926_v7 = vadd.f32 %v2778_v21, %v2663_v24  ;;  %v2930_v31 = vadd.f32 %v2778_v21, %v2667_v43  ;;  %v2934_v5 = vadd.f32 %v2778_v21, %v2671_v47  ;;  %v2938_v39 = vadd.f32 %v2778_v21, %v2675_v41 }
 0x1bb   :  { %v2942_v4 = vadd.f32 %v2778_v21, %v2679_v45  ;;  %v2946_v61 = vadd.f32 %v2778_v21, %v2683_v60  ;;  %v2950_v48 = vadd.f32 %v2778_v21, %v2687_v3  ;;  %v2954_v62 = vadd.f32 %v2778_v21, %v2691_v58  ;;  %v3895_v45 = vld [vmem:[#allocation2_spill] sm:$0xff]  ;;  %v3897_v3 = vld [vmem:[#allocation4_spill] sm:$0xff] }
 0x1bc   :  { %v2958_v24 = vadd.f32 %v2778_v21, %v2695_v1  ;;  %v2962_v43 = vadd.f32 %v2778_v21, %v2699_v16  ;;  %v2966_v47 = vadd.f32 %v2778_v21, %v2703_v23  ;;  %v2970_v41 = vadd.f32 %v2778_v21, %v2707_v14  ;;  %v3899_v1 = vld [vmem:[#allocation6_spill] sm:$0xff] }
 0x1bd   :  { %v2974_v60 = vadd.f32 %v2778_v21, %v3895_v45  ;;  %v2978_v58 = vadd.f32 %v2778_v21, %v3897_v3  ;;  %v2982_v16 = vadd.f32 %v2778_v21, %v3899_v1  ;;  %v2986_v23 = vadd.f32 %v2778_v21, %v3901_v63 }
 0x1be   :  { %3894 = vst [vmem:[#allocation13_spill] sm:$0xff] %v2970_v41  ;;  %v2990_v14 = vadd.f32 %v2778_v21, %v3903_v8  ;;  %v3905_v41 = vld [vmem:[#allocation9_spill] sm:$0xff]  ;;  %v3010_v8 = vadd.f32 %v2778_v21, %v2747_v52  ;;  %v3030_v52 = vadd.f32 %v2778_v21, %v2767_v34  ;;  %vm980_vm0 = vcmp.gt.f32.partialorder %v2782_v19, 0.0 }
 0x1bf   :  { %3896 = vst [vmem:[#allocation17_spill] sm:$0xff] %v2974_v60  ;;  %3898 = vst [vmem:[#allocation22_spill] sm:$0xff] %v2978_v58  ;;  %v2994_v45 = vadd.f32 %v2778_v21, %v3905_v41  ;;  %v3907_v60 = vld [vmem:[#allocation12_spill] sm:$0xff]  ;;  %v3909_v58 = vld [vmem:[#allocation7_spill] sm:$0xff]  ;;  %vm981_vm1 = vcmp.gt.f32.partialorder %v2786_v6, 0.0  ;;  %vm982_vm2 = vcmp.gt.f32.partialorder %v2790_v17, 0.0 }
 0x1c0   :  { %3900 = vst [vmem:[#allocation24_spill] sm:$0xff] %v2982_v16  ;;  %3902 = vst [vmem:[#allocation8_spill] sm:$0xff] %v2986_v23  ;;  %v2998_v3 = vadd.f32 %v2778_v21, %v3907_v60  ;;  %v3002_v1 = vadd.f32 %v2778_v21, %v3909_v58  ;;  %v3911_v16 = vld [vmem:[#allocation10_spill] sm:$0xff]  ;;  %v3022_v58 = vadd.f32 %v2778_v21, %v2759_v36  ;;  %vm983_vm3 = vcmp.gt.f32.partialorder %v2794_v28, 0.0 }
 0x1c1   :  { %3904 = vst [vmem:[#allocation11_spill] sm:$0xff] %v2990_v14  ;;  %3906 = vst [vmem:[#allocation16_spill] sm:$0xff] %v2994_v45  ;;  %v3006_v63 = vadd.f32 %v2778_v21, %v3911_v16  ;;  %v3914_v14 = vld [vmem:[#allocation15_spill] sm:$0xff]  ;;  %v3026_v16 = vadd.f32 %v2778_v21, %v2763_v51  ;;  %vm984_vm4 = vcmp.gt.f32.partialorder %v2798_v10, 0.0  ;;  %vm985_vm5 = vcmp.gt.f32.partialorder %v2802_v30, 0.0 }
 0x1c2   :  { %3908 = vst [vmem:[#allocation20_spill] sm:$0xff] %v2998_v3  ;;  %3910 = vst [vmem:[#allocation14_spill] sm:$0xff] %v3002_v1  ;;  %v3014_v41 = vadd.f32 %v2778_v21, %v3914_v14  ;;  %v3916_v45 = vld [vmem:[#allocation19_spill] sm:$0xff]  ;;  %v3034_v14 = vadd.f32 %v2778_v21, %v2771_v49  ;;  %vm986_vm6 = vcmp.gt.f32.partialorder %v2806_v37, 0.0  ;;  %vm987_vm7 = vcmp.gt.f32.partialorder %v2810_v38, 0.0 }
 0x1c3   :  { %3912 = vst [vmem:[#allocation18_spill] sm:$0xff] %v3006_v63  ;;  %3913 = vst [vmem:[#allocation23_spill] sm:$0xff] %v3010_v8  ;;  %v3018_v60 = vadd.f32 %v2778_v21, %v3916_v45  ;;  %vm988_vm8 = vcmp.gt.f32.partialorder %v2814_v9, 0.0  ;;  %vm989_vm9 = vcmp.gt.f32.partialorder %v2818_v11, 0.0  ;;  %v1044_v21 = vmul.f32 0.2, %v2782_v19 }
 0x1c4   :  { %3915 = vst [vmem:[#allocation25_spill] sm:$0xff] %v3014_v41  ;;  %3918 = vst [vmem:[#allocation2_spill] sm:$0xff] %v3022_v58  ;;  %v1045_v36 = vmul.f32 0.2, %v2786_v6  ;;  %v1046_v51 = vmul.f32 0.2, %v2790_v17 }
 0x1c5   :  { %3917 = vst [vmem:[#allocation21_spill] sm:$0xff] %v3018_v60  ;;  %3919 = vst [vmem:[#allocation4_spill] sm:$0xff] %v3026_v16  ;;  %vm990_vm10 = vcmp.gt.f32.partialorder %v2822_v54, 0.0  ;;  %v1047_v34 = vmul.f32 0.2, %v2794_v28  ;;  %vm991_vm11 = vcmp.gt.f32.partialorder %v2826_v55, 0.0  ;;  %v3060_v58 = vsel %vm980_vm0, %v2782_v19, %v1044_v21 }
 0x1c6   :  { %3920 = vst [vmem:[#allocation6_spill] sm:$0xff] %v3030_v52  ;;  %3921 = vst [vmem:[#allocation3_spill] sm:$0xff] %v3034_v14  ;;  %v1048_v49 = vmul.f32 0.2, %v2798_v10  ;;  %v1049_v45 = vmul.f32 0.2, %v2802_v30  ;;  %v3071_v63 = vsel %vm981_vm1, %v2786_v6, %v1045_v36 }
 0x1c7   :  { %v1050_v14 = vmul.f32 0.2, %v2806_v37  ;;  %v1051_v52 = vmul.f32 0.2, %v2810_v38  ;;  %v1052_v16 = vmul.f32 0.2, %v2814_v9  ;;  %v3101_v3 = vsel %vm983_vm3, %v2794_v28, %v1047_v34 }
 0x1c8   :  { %3922 = vst [vmem:[#allocation5_spill] sm:$0xff] %v3060_v58  ;;  %vm992_vm12 = vcmp.gt.f32.partialorder %v2830_v29, 0.0  ;;  %v1053_v60 = vmul.f32 0.2, %v2818_v11  ;;  %v1054_v41 = vmul.f32 0.2, %v2822_v54  ;;  %v3086_v58 = vsel %vm982_vm2, %v2790_v17, %v1046_v51 }
 0x1c9   :  { %v3066_v8 = vmul.f32 0.2, %v2826_v55  ;;  %3923 = vst [vmem:[#allocation9_spill] sm:$0xff] %v3071_v63  ;;  %vm993_vm13 = vcmp.gt.f32.partialorder %v2834_v42, 0.0  ;;  %v3075_v1 = vmul.f32 0.2, %v2830_v29 }
 0x1ca   :  { %v3078_v19 = vmul.f32 0.2, %v2834_v42  ;;  %v3081_v21 = vmul.f32 0.2, %v2838_v46  ;;  %3924 = vst [vmem:[#allocation12_spill] sm:$0xff] %v3086_v58  ;;  %vm994_vm14 = vcmp.gt.f32.partialorder %v2838_v46, 0.0 }
 0x1cb   :  { %v3090_v6 = vmul.f32 0.2, %v2842_v40  ;;  %v3093_v36 = vmul.f32 0.2, %v2846_v44  ;;  %v3096_v63 = vmul.f32 0.2, %v2850_v59 }
 0x1cc   :  { %3926 = vst [vmem:[#allocation10_spill] sm:$0xff] %v3101_v3  ;;  %vm995_vm15 = vcmp.gt.f32.partialorder %v2842_v40, 0.0  ;;  %v3105_v17 = vmul.f32 0.2, %v2854_v2  ;;  %v3108_v51 = vmul.f32 0.2, %v2858_v56 }
 0x1cd   :  { %3925 = vst [vmem:[#allocation7_spill] sm:$0xff] %v3096_v63  ;;  %v3111_v58 = vmul.f32 0.2, %v2862_v0  ;;  %v3116_v63 = vsel %vm984_vm4, %v2798_v10, %v1048_v49  ;;  %vm996_vm0 = vcmp.gt.f32.partialorder %v2846_v44, 0.0  ;;  %v3120_v28 = vmul.f32 0.2, %v2866_v15 }
 0x1ce   :  { %3928 = vst [vmem:[#allocation19_spill] sm:$0xff] %v3116_v63  ;;  %v3123_v34 = vmul.f32 0.2, %v2870_v22  ;;  %v3126_v3 = vmul.f32 0.2, %v2874_v12  ;;  %vm997_vm1 = vcmp.gt.f32.partialorder %v2850_v59, 0.0 }
 0x1cf   :  { %3927 = vst [vmem:[#allocation15_spill] sm:$0xff] %v3111_v58  ;;  %v3131_v58 = vsel %vm985_vm5, %v2802_v30, %v1049_v45  ;;  %v3135_v10 = vmul.f32 0.2, %v2878_v20  ;;  %v3138_v49 = vmul.f32 0.2, %v2882_v35  ;;  %vm998_vm2 = vcmp.gt.f32.partialorder %v2854_v2, 0.0 }
 0x1d0   :  { %3929 = vst [vmem:[#allocation26_spill] sm:$0xff] %v3126_v3  ;;  %3930 = vst [vmem:[#allocation27_spill] sm:$0xff] %v3131_v58  ;;  %v3141_v63 = vmul.f32 0.2, %v2886_v50  ;;  %v3146_v3 = vsel %vm986_vm6, %v2806_v37, %v1050_v14  ;;  %v3150_v30 = vmul.f32 0.2, %v2890_v32 }
 0x1d1   :  { %3932 = vst [vmem:[#allocation29_spill] sm:$0xff] %v3146_v3  ;;  %v3153_v45 = vmul.f32 0.2, %v2894_v18  ;;  %v3156_v58 = vmul.f32 0.2, %v2898_v27  ;;  %vm999_vm3 = vcmp.gt.f32.partialorder %v2858_v56, 0.0 }
 0x1d2   :  { %3931 = vst [vmem:[#allocation28_spill] sm:$0xff] %v3141_v63  ;;  %v3161_v63 = vsel %vm987_vm7, %v2810_v38, %v1051_v52  ;;  %v3167_v37 = vmul.f32 0.2, %v2902_v57  ;;  %v3170_v14 = vmul.f32 0.2, %v2906_v26  ;;  %v3178_v38 = vsel %vm988_vm8, %v2814_v9, %v1052_v16 }
 0x1d3   :  { %3933 = vst [vmem:[#allocation30_spill] sm:$0xff] %v3161_v63  ;;  %v3173_v3 = vmul.f32 0.2, %v2910_v13  ;;  %3935 = vst [vmem:[#allocation32_spill] sm:$0xff] %v3178_v38  ;;  %vm1002_vm6 = vcmp.gt.f32.partialorder %v2870_v22, 0.0  ;;  %v3196_v9 = vsel %vm989_vm9, %v2818_v11, %v1053_v60  ;;  %vm1006_vm8 = vcmp.gt.f32.partialorder %v2886_v50, 0.0 }
 0x1d4   :  { %v3185_v52 = vmul.f32 0.2, %v2914_v53  ;;  %v3188_v63 = vmul.f32 0.2, %v2918_v33  ;;  %3937 = vst [vmem:[#allocation34_spill] sm:$0xff] %v3196_v9  ;;  %v3214_v11 = vsel %vm990_vm10, %v2822_v54, %v1054_v41  ;;  %vm1010_vm9 = vcmp.gt.f32.partialorder %v2902_v57, 0.0 }
 0x1d5   :  { %3934 = vst [vmem:[#allocation31_spill] sm:$0xff] %v3173_v3  ;;  %v3191_v3 = vmul.f32 0.2, %v2922_v25  ;;  %v3203_v16 = vmul.f32 0.2, %v2926_v7  ;;  %3939 = vst [vmem:[#allocation36_spill] sm:$0xff] %v3214_v11  ;;  %v3233_v54 = vsel %vm991_vm11, %v2826_v55, %v3066_v8  ;;  %v3252_v55 = vsel %vm992_vm12, %v2830_v29, %v3075_v1 }
 0x1d6   :  { %v3206_v38 = vmul.f32 0.2, %v2930_v31  ;;  %v3221_v60 = vmul.f32 0.2, %v2938_v39  ;;  %v3224_v9 = vmul.f32 0.2, %v2942_v4  ;;  %v3271_v29 = vsel %vm993_vm13, %v2834_v42, %v3078_v19 }
 0x1d7   :  { %3936 = vst [vmem:[#allocation33_spill] sm:$0xff] %v3191_v3  ;;  %v3209_v3 = vmul.f32 0.2, %v2934_v5  ;;  %3941 = vst [vmem:[#allocation38_spill] sm:$0xff] %v3233_v54  ;;  %vm1014_vm10 = vcmp.gt.f32.partialorder %v2918_v33, 0.0  ;;  %vm1018_vm11 = vcmp.gt.f32.partialorder %v2934_v5, 0.0  ;;  %v3290_v42 = vsel %vm994_vm14, %v2838_v46, %v3081_v21 }
 0x1d8   :  { %v3240_v41 = vmul.f32 0.2, %v2950_v48  ;;  %v3243_v11 = vmul.f32 0.2, %v2954_v62  ;;  %3945 = vst [vmem:[#allocation42_spill] sm:$0xff] %v3252_v55  ;;  %3950 = vst [vmem:[#allocation45_spill] sm:$0xff] %v3271_v29  ;;  %v3309_v46 = vsel %vm995_vm15, %v2842_v40, %v3090_v6  ;;  %v3322_v40 = vsel %vm996_vm0, %v2846_v44, %v3093_v36 }
 0x1d9   :  { %3938 = vst [vmem:[#allocation35_spill] sm:$0xff] %v3209_v3  ;;  %v3227_v3 = vmul.f32 0.2, %v2946_v61  ;;  %v3259_v8 = vmul.f32 0.2, %v2962_v43  ;;  %vm1022_vm12 = vcmp.gt.f32.partialorder %v2950_v48, 0.0 }
 0x1da   :  { %3942 = vst [vmem:[#allocation39_spill] sm:$0xff] %v3240_v41  ;;  %3943 = vst [vmem:[#allocation40_spill] sm:$0xff] %v3243_v11  ;;  %v3262_v54 = vmul.f32 0.2, %v2966_v47  ;;  %v3951_v1 = vld [vmem:[#allocation17_spill] sm:$0xff]  ;;  %vm1026_vm13 = vcmp.gt.f32.partialorder %v2966_v47, 0.0 }
 0x1db   :  { %3940 = vst [vmem:[#allocation37_spill] sm:$0xff] %v3227_v3  ;;  %v3246_v3 = vmul.f32 0.2, %v2958_v24  ;;  %3946 = vst [vmem:[#allocation43_spill] sm:$0xff] %v3259_v8  ;;  %v3278_v55 = vmul.f32 0.2, %v3951_v1 }
 0x1dc   :  { %3947 = vst [vmem:[#allocation44_spill] sm:$0xff] %v3262_v54  ;;  %v3953_v54 = vld [vmem:[#allocation22_spill] sm:$0xff]  ;;  %3957 = vst [vmem:[#allocation49_spill] sm:$0xff] %v3290_v42  ;;  %v3297_v19 = vmul.f32 0.2, %v2986_v23  ;;  %v3959_v29 = vld [vmem:[#allocation11_spill] sm:$0xff] }
 0x1dd   :  { %3944 = vst [vmem:[#allocation41_spill] sm:$0xff] %v3246_v3  ;;  %v3948_v3 = vld [vmem:[#allocation13_spill] sm:$0xff]  ;;  %3952 = vst [vmem:[#allocation46_spill] sm:$0xff] %v3278_v55  ;;  %v3281_v8 = vmul.f32 0.2, %v3953_v54  ;;  %v3964_v21 = vld [vmem:[#allocation20_spill] sm:$0xff] }
 0x1de   :  { %v3265_v11 = vmul.f32 0.2, %v3948_v3  ;;  %3958 = vst [vmem:[#allocation50_spill] sm:$0xff] %v3297_v19  ;;  %3963 = vst [vmem:[#allocation53_spill] sm:$0xff] %v3309_v46  ;;  %v1098_v42 = vmul.f32 0.2, %v3964_v21 }
 0x1df   :  { %3954 = vst [vmem:[#allocation47_spill] sm:$0xff] %v3281_v8  ;;  %v3300_v8 = vmul.f32 0.2, %v3959_v29  ;;  %v3966_v54 = vld [vmem:[#allocation18_spill] sm:$0xff]  ;;  %3967 = vst [vmem:[#allocation54_spill] sm:$0xff] %v3322_v40  ;;  %vm1034_vm15 = vcmp.gt.f32.partialorder %v3964_v21, 0.0 }
 0x1e0   :  { %3949 = vst [vmem:[#allocation13_spill] sm:$0xff] %v3265_v11  ;;  %v3955_v11 = vld [vmem:[#allocation24_spill] sm:$0xff]  ;;  %v3968_v6 = vld [vmem:[#allocation23_spill] sm:$0xff]  ;;  %v3970_v23 = vld [vmem:[#allocation21_spill] sm:$0xff]  ;;  %vm3978_vm7 = vcmp.gt.f32.partialorder %v2862_v0, 0.0 }
 0x1e1   :  { %v3284_v41 = vmul.f32 0.2, %v3955_v11  ;;  %3960 = vst [vmem:[#allocation51_spill] sm:$0xff] %v3300_v8  ;;  %vm1030_vm14 = vcmp.gt.f32.partialorder %v3955_v11, 0.0  ;;  %v3965_v8 = vld [vmem:[#allocation14_spill] sm:$0xff]  ;;  %v3971_v1 = vld [vmem:[#allocation7_spill] sm:$0xff] }
 0x1e2   :  { %v1099_v19 = vmul.f32 0.2, %v3965_v8  ;;  %v1101_v46 = vmul.f32 0.2, %v3968_v6  ;;  %v1103_v11 = vmul.f32 0.2, %v3970_v23  ;;  %v3335_v44 = vsel %vm997_vm1, %v2850_v59, %v3971_v1 }
 0x1e3   :  { %3956 = vst [vmem:[#allocation48_spill] sm:$0xff] %v3284_v41  ;;  %v3961_v41 = vld [vmem:[#allocation16_spill] sm:$0xff]  ;;  %v3973_v36 = vld [vmem:[#allocation2_spill] sm:$0xff]  ;;  %v3348_v59 = vsel %vm998_vm2, %v2854_v2, %v3105_v17  ;;  %v3976_v1 = vld [vmem:[#allocation3_spill] sm:$0xff]  ;;  %vm3979_vm2 = vcmp.gt.f32.partialorder %v2866_v15, 0.0  ;;  %v3375_v17 = vsel %vm1002_vm6, %v2870_v22, %v3123_v34  ;;  %vm3985_vm6 = vcmp.gt.f32.partialorder %v2890_v32, 0.0 }
 0x1e4   :  { %v3303_v55 = vmul.f32 0.2, %v3961_v41  ;;  %v3969_v41 = vld [vmem:[#allocation25_spill] sm:$0xff]  ;;  %vm1040_vm4 = vcmp.gt.f32.partialorder %v3973_v36, 0.0  ;;  %v3974_v40 = vld [vmem:[#allocation4_spill] sm:$0xff]  ;;  %v3975_v8 = vld [vmem:[#allocation6_spill] sm:$0xff]  ;;  %v3369_v2 = vsel %vm3979_vm2, %v2866_v15, %v3120_v28 }
 0x1e5   :  { %v1102_v29 = vmul.f32 0.2, %v3969_v41  ;;  %3972 = vst [vmem:[#allocation25_spill] sm:$0xff] %v3335_v44  ;;  %vm1038_vm0 = vcmp.gt.f32.partialorder %v3969_v41, 0.0  ;;  %v1104_v6 = vmul.f32 0.2, %v3973_v36  ;;  %v3357_v36 = vsel %vm999_vm3, %v2858_v56, %v3108_v51 }
 0x1e6   :  { %3962 = vst [vmem:[#allocation52_spill] sm:$0xff] %v3303_v55  ;;  %v1100_v55 = vmul.f32 0.2, %v3966_v54  ;;  %v1105_v54 = vmul.f32 0.2, %v3974_v40  ;;  %vm1042_vm1 = vcmp.gt.f32.partialorder %v3975_v8, 0.0 }
 0x1e7   :  { %v1106_v21 = vmul.f32 0.2, %v3975_v8  ;;  %vm1043_vm5 = vcmp.gt.f32.partialorder %v3976_v1, 0.0  ;;  %v1107_v44 = vmul.f32 0.2, %v3976_v1  ;;  %v3977_v40 = vld [vmem:[#allocation15_spill] sm:$0xff] }
 0x1e8   :  { %v3363_v23 = vsel %vm3978_vm7, %v2862_v0, %v3977_v40  ;;  %v3980_v56 = vld [vmem:[#allocation26_spill] sm:$0xff]  ;;  %vm3981_vm3 = vcmp.gt.f32.partialorder %v2874_v12, 0.0  ;;  %vm3982_vm7 = vcmp.gt.f32.partialorder %v2878_v20, 0.0  ;;  %vm3983_vm2 = vcmp.gt.f32.partialorder %v2882_v35, 0.0  ;;  %v3984_v22 = vld [vmem:[#allocation28_spill] sm:$0xff] }
 0x1e9   :  { %v3381_v51 = vsel %vm3981_vm3, %v2874_v12, %v3980_v56  ;;  %v3387_v0 = vsel %vm3982_vm7, %v2878_v20, %v3135_v10  ;;  %v3393_v15 = vsel %vm3983_vm2, %v2882_v35, %v3138_v49  ;;  %v3399_v28 = vsel %vm1006_vm8, %v2886_v50, %v3984_v22  ;;  %v4018_v40 = vld [vmem:[#allocation24_spill] sm:$0xff] }
 0x1ea   :  { %v3405_v12 = vsel %vm3985_vm6, %v2890_v32, %v3150_v30  ;;  %vm3986_vm3 = vcmp.gt.f32.partialorder %v2894_v18, 0.0  ;;  %vm3987_vm7 = vcmp.gt.f32.partialorder %v2898_v27, 0.0  ;;  %v3423_v50 = vsel %vm1010_vm9, %v2902_v57, %v3167_v37  ;;  %v4020_v22 = vld [vmem:[#allocation8_spill] sm:$0xff] }
 0x1eb   :  { %v3411_v20 = vsel %vm3986_vm3, %v2894_v18, %v3153_v45  ;;  %v3417_v35 = vsel %vm3987_vm7, %v2898_v27, %v3156_v58  ;;  %vm3988_vm8 = vcmp.gt.f32.partialorder %v2906_v26, 0.0  ;;  %v3989_v18 = vld [vmem:[#allocation31_spill] sm:$0xff]  ;;  %vm3990_vm2 = vcmp.gt.f32.partialorder %v2910_v13, 0.0 }
 0x1ec   :  { %v3429_v32 = vsel %vm3988_vm8, %v2906_v26, %v3170_v14  ;;  %v3435_v34 = vsel %vm3990_vm2, %v2910_v13, %v3989_v18  ;;  %vm3991_vm6 = vcmp.gt.f32.partialorder %v2914_v53, 0.0  ;;  %v3447_v57 = vsel %vm1014_vm10, %v2918_v33, %v3188_v63  ;;  %v3992_v26 = vld [vmem:[#allocation33_spill] sm:$0xff]  ;;  %v3996_v33 = vld [vmem:[#allocation35_spill] sm:$0xff] }
 0x1ed   :  { %v3441_v27 = vsel %vm3991_vm6, %v2914_v53, %v3185_v52  ;;  %vm3993_vm9 = vcmp.gt.f32.partialorder %v2922_v25, 0.0  ;;  %vm3994_vm3 = vcmp.gt.f32.partialorder %v2926_v7, 0.0  ;;  %vm3995_vm7 = vcmp.gt.f32.partialorder %v2930_v31, 0.0  ;;  %v4012_v52 = vld [vmem:[#allocation17_spill] sm:$0xff] }
 0x1ee   :  { %v3453_v58 = vsel %vm3993_vm9, %v2922_v25, %v3992_v26  ;;  %v3459_v13 = vsel %vm3994_vm3, %v2926_v7, %v3203_v16  ;;  %v3465_v53 = vsel %vm3995_vm7, %v2930_v31, %v3206_v38  ;;  %v3471_v63 = vsel %vm1018_vm11, %v2934_v5, %v3996_v33  ;;  %v3999_v31 = vld [vmem:[#allocation37_spill] sm:$0xff]  ;;  %v4001_v5 = vld [vmem:[#allocation39_spill] sm:$0xff]  ;;  %v4015_v16 = vld [vmem:[#allocation22_spill] sm:$0xff] }
 0x1ef   :  { %vm3997_vm10 = vcmp.gt.f32.partialorder %v2938_v39, 0.0  ;;  %vm3998_vm8 = vcmp.gt.f32.partialorder %v2942_v4, 0.0  ;;  %vm4000_vm2 = vcmp.gt.f32.partialorder %v2946_v61, 0.0  ;;  %v3495_v49 = vsel %vm1022_vm12, %v2950_v48, %v4001_v5  ;;  %v4008_v48 = vld [vmem:[#allocation44_spill] sm:$0xff]  ;;  %v4022_v26 = vld [vmem:[#allocation51_spill] sm:$0xff] }
 0x1f0   :  { %v3477_v25 = vsel %vm3997_vm10, %v2938_v39, %v3221_v60  ;;  %v3483_v7 = vsel %vm3998_vm8, %v2942_v4, %v3224_v9  ;;  %v3489_v10 = vsel %vm4000_vm2, %v2946_v61, %v3999_v31  ;;  %v4002_v39 = vld [vmem:[#allocation40_spill] sm:$0xff]  ;;  %vm4003_vm11 = vcmp.gt.f32.partialorder %v2954_v62, 0.0  ;;  %v4004_v4 = vld [vmem:[#allocation41_spill] sm:$0xff]  ;;  %v4006_v61 = vld [vmem:[#allocation43_spill] sm:$0xff] }
 0x1f1   :  { %v3501_v30 = vsel %vm4003_vm11, %v2954_v62, %v4002_v39  ;;  %vm4005_vm6 = vcmp.gt.f32.partialorder %v2958_v24, 0.0  ;;  %vm4007_vm9 = vcmp.gt.f32.partialorder %v2962_v43, 0.0  ;;  %v3519_v14 = vsel %vm1026_vm13, %v2966_v47, %v4008_v48  ;;  %v4009_v62 = vld [vmem:[#allocation13_spill] sm:$0xff]  ;;  %v4017_v47 = vld [vmem:[#allocation48_spill] sm:$0xff]  ;;  %v4023_v33 = vld [vmem:[#allocation11_spill] sm:$0xff] }
 0x1f2   :  { %v3507_v45 = vsel %vm4005_vm6, %v2958_v24, %v4004_v4  ;;  %v3513_v37 = vsel %vm4007_vm9, %v2962_v43, %v4006_v61  ;;  %vm4010_vm12 = vcmp.gt.f32.partialorder %v3948_v3, 0.0  ;;  %v4011_v24 = vld [vmem:[#allocation46_spill] sm:$0xff]  ;;  %vm4013_vm3 = vcmp.gt.f32.partialorder %v4012_v52, 0.0  ;;  %v4014_v43 = vld [vmem:[#allocation47_spill] sm:$0xff]  ;;  %v4025_v5 = vld [vmem:[#allocation52_spill] sm:$0xff] }
 0x1f3   :  { %v3525_v38 = vsel %vm4010_vm12, %v3948_v3, %v4009_v62  ;;  %v3531_v9 = vsel %vm4013_vm3, %v4012_v52, %v4011_v24  ;;  %vm4016_vm7 = vcmp.gt.f32.partialorder %v4015_v16, 0.0  ;;  %v3543_v56 = vsel %vm1030_vm14, %v4018_v40, %v4017_v47  ;;  %v4019_v3 = vld [vmem:[#allocation50_spill] sm:$0xff]  ;;  %v4026_v39 = vld [vmem:[#allocation16_spill] sm:$0xff]  ;;  %v4035_v40 = vld [vmem:[#allocation21_spill] sm:$0xff] }
 0x1f4   :  { %v3537_v60 = vsel %vm4016_vm7, %v4015_v16, %v4014_v43  ;;  %vm4021_vm13 = vcmp.gt.f32.partialorder %v4020_v22, 0.0  ;;  %vm4024_vm10 = vcmp.gt.f32.partialorder %v4023_v33, 0.0  ;;  %vm4027_vm8 = vcmp.gt.f32.partialorder %v4026_v39, 0.0  ;;  %v4028_v61 = vld [vmem:[#allocation20_spill] sm:$0xff]  ;;  %v4029_v62 = vld [vmem:[#allocation14_spill] sm:$0xff]  ;;  %v4033_v16 = vld [vmem:[#allocation23_spill] sm:$0xff] }
 0x1f5   :  { %v3549_v18 = vsel %vm4021_vm13, %v4020_v22, %v4019_v3  ;;  %v3555_v31 = vsel %vm4024_vm10, %v4023_v33, %v4022_v26  ;;  %v3561_v4 = vsel %vm4027_vm8, %v4026_v39, %v4025_v5  ;;  %v3566_v48 = vsel %vm1034_vm15, %v4028_v61, %v1098_v42  ;;  %v4031_v52 = vld [vmem:[#allocation18_spill] sm:$0xff]  ;;  %v4038_v22 = vld [vmem:[#allocation4_spill] sm:$0xff]  ;;  %v4043_v26 = vld [vmem:[#allocation9_spill] sm:$0xff] }
 0x1f6   :  { %vm4030_vm14 = vcmp.gt.f32.partialorder %v4029_v62, 0.0  ;;  %vm4032_vm2 = vcmp.gt.f32.partialorder %v4031_v52, 0.0  ;;  %vm4034_vm11 = vcmp.gt.f32.partialorder %v4033_v16, 0.0  ;;  %v3586_v42 = vsel %vm1038_vm0, %v3969_v41, %v1102_v29  ;;  %v4037_v3 = vld [vmem:[#allocation2_spill] sm:$0xff]  ;;  %v4042_v29 = vld [vmem:[#allocation5_spill] sm:$0xff]  ;;  %v4046_v61 = vld [vmem:[#allocation19_spill] sm:$0xff] }
 0x1f7   :  { %v3571_v24 = vsel %vm4030_vm14, %v4029_v62, %v1099_v19  ;;  %v3576_v43 = vsel %vm4032_vm2, %v4031_v52, %v1100_v55  ;;  %v3581_v47 = vsel %vm4034_vm11, %v4033_v16, %v1101_v46  ;;  %vm4036_vm15 = vcmp.gt.f32.partialorder %v4035_v40, 0.0  ;;  %v4045_v5 = vld [vmem:[#allocation10_spill] sm:$0xff]  ;;  %v4047_v62 = vld [vmem:[#allocation27_spill] sm:$0xff]  ;;  %v4048_v52 = vld [vmem:[#allocation29_spill] sm:$0xff] }
 0x1f8   :  { %v3591_v19 = vsel %vm4036_vm15, %v4035_v40, %v1103_v11  ;;  %v3596_v55 = vsel %vm1040_vm4, %v4037_v3, %v1104_v6  ;;  %vm4039_vm6 = vcmp.gt.f32.partialorder %v4038_v22, 0.0  ;;  %v3606_v41 = vsel %vm1042_vm1, %v3975_v8, %v1106_v21  ;;  %v4044_v6 = vld [vmem:[#allocation12_spill] sm:$0xff]  ;;  %v4049_v16 = vld [vmem:[#allocation30_spill] sm:$0xff] }
 0x1f9   :  { %v3601_v46 = vsel %vm4039_vm6, %v4038_v22, %v1105_v54  ;;  %4041 = vst [vmem:[#allocation6_spill] sm:$0xff] %v3606_v41  ;;  %v3611_v11 = vsel %vm1043_vm5, %v3976_v1, %v1107_v44  ;;  %v1667_v33 = vpack.c.bf16 %v4043_v26, %v4042_v29  ;;  %v1672_v39 = vpack.c.bf16 %v4045_v5, %v4044_v6  ;;  %v4050_v3 = vld [vmem:[#allocation32_spill] sm:$0xff]  ;;  %v4051_v8 = vld [vmem:[#allocation34_spill] sm:$0xff]  ;;  %v4055_v1 = vld [vmem:[#allocation45_spill] sm:$0xff] }
 0x1fa   :  { %4040 = vst [vmem:[#allocation7_spill] sm:$0xff] %v3601_v46  ;;  %v1677_v54 = vpack.c.bf16 %v4047_v62, %v4046_v61  ;;  %v1682_v40 = vpack.c.bf16 %v4049_v16, %v4048_v52  ;;  %v1687_v21 = vpack.c.bf16 %v4051_v8, %v4050_v3  ;;  %v4052_v22 = vld [vmem:[#allocation36_spill] sm:$0xff]  ;;  %v4053_v41 = vld [vmem:[#allocation38_spill] sm:$0xff]  ;;  %v4056_v26 = vld [vmem:[#allocation49_spill] sm:$0xff] }
 0x1fb   :  { %v1692_v46 = vpack.c.bf16 %v4053_v41, %v4052_v22  ;;  %1668 = vst [vmem:[%s3777_s4] sm:$0xff] %v1667_v33   ;;  %1824 = vst [vmem:[%s3777_s4 + $0x8] sm:$0xff] %v1672_v39   ;;  %v4054_v44 = vld [vmem:[#allocation42_spill] sm:$0xff]  ;;  %v4057_v6 = vld [vmem:[#allocation53_spill] sm:$0xff]  ;;  %v1712_v41 = vpack.c.bf16 %v3357_v36, %v3348_v59  ;;  %v1717_v33 = vpack.c.bf16 %v3369_v2, %v3363_v23 }
 0x1fc   :  { %v1697_v29 = vpack.c.bf16 %v4055_v1, %v4054_v44  ;;  %v1702_v5 = vpack.c.bf16 %v4057_v6, %v4056_v26  ;;  %v4058_v61 = vld [vmem:[#allocation54_spill] sm:$0xff]  ;;  %v4059_v62 = vld [vmem:[#allocation25_spill] sm:$0xff]  ;;  %1825 = vst [vmem:[%s3777_s4 + $0x10] sm:$0xff] %v1677_v54   ;;  %1826 = vst [vmem:[%s3777_s4 + $0x18] sm:$0xff] %v1682_v40   ;;  %v1722_v36 = vpack.c.bf16 %v3381_v51, %v3375_v17 }
 0x1fd   :  { %v1707_v52 = vpack.c.bf16 %v4059_v62, %v4058_v61  ;;  %1827 = vst [vmem:[%s3777_s4 + $0x20] sm:$0xff] %v1687_v21   ;;  %1828 = vst [vmem:[%s3777_s4 + $0x28] sm:$0xff] %v1692_v46   ;;  %v1727_v59 = vpack.c.bf16 %v3393_v15, %v3387_v0  ;;  %v1732_v39 = vpack.c.bf16 %v3405_v12, %v3399_v28 }
 0x1fe   :  { %1829 = vst [vmem:[%s3777_s4 + $0x30] sm:$0xff] %v1697_v29   ;;  %1830 = vst [vmem:[%s3777_s4 + $0x38] sm:$0xff] %v1702_v5   ;;  %v1737_v23 = vpack.c.bf16 %v3417_v35, %v3411_v20  ;;  %v1742_v2 = vpack.c.bf16 %v3429_v32, %v3423_v50  ;;  %v1747_v17 = vpack.c.bf16 %v3441_v27, %v3435_v34 }
 0x1ff   :  { %1831 = vst [vmem:[%s3777_s4 + $0x40] sm:$0xff] %v1707_v52   ;;  %1832 = vst [vmem:[%s3777_s4 + $0x48] sm:$0xff] %v1712_v41   ;;  %v1752_v51 = vpack.c.bf16 %v3453_v58, %v3447_v57  ;;  %v1757_v0 = vpack.c.bf16 %v3465_v53, %v3459_v13  ;;  %v1762_v15 = vpack.c.bf16 %v3477_v25, %v3471_v63 }
 0x200   :  { %1833 = vst [vmem:[%s3777_s4 + $0x50] sm:$0xff] %v1717_v33   ;;  %1834 = vst [vmem:[%s3777_s4 + $0x58] sm:$0xff] %v1722_v36   ;;  %v1767_v28 = vpack.c.bf16 %v3489_v10, %v3483_v7  ;;  %v1772_v12 = vpack.c.bf16 %v3501_v30, %v3495_v49  ;;  %v1777_v20 = vpack.c.bf16 %v3513_v37, %v3507_v45  ;;  %v4061_v63 = vld [vmem:[#allocation6_spill] sm:$0xff] }
 0x201   :  { %1835 = vst [vmem:[%s3777_s4 + $0x60] sm:$0xff] %v1727_v59   ;;  %1836 = vst [vmem:[%s3777_s4 + $0x68] sm:$0xff] %v1732_v39   ;;  %v1782_v35 = vpack.c.bf16 %v3525_v38, %v3519_v14  ;;  %v1787_v50 = vpack.c.bf16 %v3537_v60, %v3531_v9  ;;  %v1792_v32 = vpack.c.bf16 %v3549_v18, %v3543_v56  ;;  %v4060_v13 = vld [vmem:[#allocation7_spill] sm:$0xff] }
 0x202   :  { %1837 = vst [vmem:[%s3777_s4 + $0x70] sm:$0xff] %v1737_v23   ;;  %1838 = vst [vmem:[%s3777_s4 + $0x78] sm:$0xff] %v1742_v2   ;;  %v1797_v34 = vpack.c.bf16 %v3561_v4, %v3555_v31  ;;  %v1802_v27 = vpack.c.bf16 %v3571_v24, %v3566_v48  ;;  %v1807_v57 = vpack.c.bf16 %v3581_v47, %v3576_v43 }
 0x203   :  { %1839 = vst [vmem:[%s3777_s4 + $0x80] sm:$0xff] %v1747_v17   ;;  %1840 = vst [vmem:[%s3777_s4 + $0x88] sm:$0xff] %v1752_v51   ;;  %v1812_v58 = vpack.c.bf16 %v3591_v19, %v3586_v42  ;;  %v1817_v53 = vpack.c.bf16 %v4060_v13, %v3596_v55  ;;  %v1822_v25 = vpack.c.bf16 %v3611_v11, %v4061_v63 }
 0x204   :  { %1841 = vst [vmem:[%s3777_s4 + $0x90] sm:$0xff] %v1757_v0   ;;  %1842 = vst [vmem:[%s3777_s4 + $0x98] sm:$0xff] %v1762_v15  }
 0x205   :  { %1843 = vst [vmem:[%s3777_s4 + $0xa0] sm:$0xff] %v1767_v28   ;;  %1844 = vst [vmem:[%s3777_s4 + $0xa8] sm:$0xff] %v1772_v12  }
 0x206   :  { %1845 = vst [vmem:[%s3777_s4 + $0xb0] sm:$0xff] %v1777_v20   ;;  %1846 = vst [vmem:[%s3777_s4 + $0xb8] sm:$0xff] %v1782_v35  }
 0x207   :  { %1847 = vst [vmem:[%s3777_s4 + $0xc0] sm:$0xff] %v1787_v50   ;;  %1848 = vst [vmem:[%s3777_s4 + $0xc8] sm:$0xff] %v1792_v32  }
 0x208   :  { %1849 = vst [vmem:[%s3777_s4 + $0xd0] sm:$0xff] %v1797_v34   ;;  %1850 = vst [vmem:[%s3777_s4 + $0xd8] sm:$0xff] %v1802_v27  }
 0x209   :  { %1851 = vst [vmem:[%s3777_s4 + $0xe0] sm:$0xff] %v1807_v57   ;;  %1852 = vst [vmem:[%s3777_s4 + $0xe8] sm:$0xff] %v1812_v58  }
 0x20a   :  { %1853 = vst [vmem:[%s3777_s4 + $0xf0] sm:$0xff] %v1817_v53   ;;  %1854 = vst [vmem:[%s3777_s4 + $0xf8] sm:$0xff] %v1822_v25  }

// kernel: discriminator_forward.7
= control target key start
LH: loop header
LB: loop body
LE: loop exit
PB: predicated region body
PF: predicated region fallthrough
CT: control target
= control target key end

     0   :  { %s1080_s1 = inlined_call_operand.vmem [shape: bf16[256,128], index: 1, kind: input, shape index: {}]   ;;  %s1081_s0 = inlined_call_operand.vmem [shape: bf16[128,256], index: 0, kind: input, shape index: {}]   ;;  %s1082_s2 = inlined_call_operand.vmem [shape: f32[1,128], index: 2, kind: input, shape index: {}]   ;;  %s1083_s3 = inlined_call_operand.vmem [shape: f32[1,128], index: 3, kind: input, shape index: {}]   ;;  %s1084_s4 = inlined_call_operand.vmem [shape: bf16[128,128], index: 4, kind: output, shape index: {}]  }
   0x1   :  { %v775_v0 = vld [vmem:[%s1080_s1 + $0x40] sm:$0xff]   ;;  %v777_v2 = vld [vmem:[%s1080_s1 + $0x48] sm:$0xff]   ;;  %v779_v4 = vld [vmem:[%s1080_s1 + $0x50] sm:$0xff]  }
   0x2   :  { %v776_v1 = vld [vmem:[%s1080_s1] sm:$0xff]   ;;  %695 = vmatprep.subr.bf16.mxu0 %v775_v0  ;;  %759 = vmatprep.subr.bf16.mxu1 %v775_v0  ;;  %v778_v3 = vld [vmem:[%s1080_s1 + $0x8] sm:$0xff]   ;;  %v780_v5 = vld [vmem:[%s1080_s1 + $0x10] sm:$0xff]  }
   0x3   :  { %696 = vmatpush3.bf16.msra.mxu0 %v776_v1  ;;  %767 = vmatpush3.bf16.msra.mxu1 %v776_v1  ;;  %v781_v6 = vld [vmem:[%s1080_s1 + $0x58] sm:$0xff]   ;;  %v783_v8 = vld [vmem:[%s1080_s1 + $0x60] sm:$0xff]   ;;  %v785_v10 = vld [vmem:[%s1080_s1 + $0x68] sm:$0xff]  }
   0x4   :  { %697 = vmatprep.subr.bf16.mxu0 %v777_v2  ;;  %760 = vmatprep.subr.bf16.mxu1 %v777_v2  ;;  %v782_v7 = vld [vmem:[%s1080_s1 + $0x18] sm:$0xff]   ;;  %v784_v9 = vld [vmem:[%s1080_s1 + $0x20] sm:$0xff]   ;;  %v786_v12 = vld [vmem:[%s1080_s1 + $0x28] sm:$0xff]  }
   0x5   :  { %v793_v11 = vld [vmem:[%s1081_s0 + $0x4] ss:$8 sps:$4 sm:$0xff]   ;;  %v787_v14 = vld [vmem:[%s1080_s1 + $0x70] sm:$0xff]   ;;  %v789_v16 = vld [vmem:[%s1080_s1 + $0x78] sm:$0xff]  }
   0x6   :  { %v799_v13 = vld [vmem:[%s1081_s0 + $0x44] ss:$8 sps:$4 sm:$0xff]   ;;  %274 = vmatprep.mubr.bf16.mxu0 %v793_v11  ;;  %v788_v15 = vld [vmem:[%s1080_s1 + $0x30] sm:$0xff]   ;;  %v790_v17 = vld [vmem:[%s1080_s1 + $0x38] sm:$0xff]  }
   0x7   :  { %698 = vmatpush3.bf16.msra.mxu0 %v778_v3  ;;  %768 = vmatpush3.bf16.msra.mxu1 %v778_v3  ;;  %v791_v18 = vld [vmem:[%s1081_s0] ss:$8 sps:$4 sm:$0xff]   ;;  %v794_v20 = vld [vmem:[%s1081_s0 + $0x14] ss:$8 sps:$4 sm:$0xff]   ;;  %v796_v22 = vld [vmem:[%s1081_s0 + $0x10] ss:$8 sps:$4 sm:$0xff]  }
   0x8   :  { %699 = vmatprep.subr.bf16.mxu0 %v779_v4  ;;  %761 = vmatprep.subr.bf16.mxu1 %v779_v4  ;;  %v797_v19 = vld [vmem:[%s1081_s0 + $0x40] ss:$8 sps:$4 sm:$0xff]   ;;  %v803_v21 = vld [vmem:[%s1081_s0 + $0x54] ss:$8 sps:$4 sm:$0xff]   ;;  %v805_v23 = vld [vmem:[%s1081_s0 + $0x50] ss:$8 sps:$4 sm:$0xff]  }
   0x9   :  { %306 = vmatprep.mubr.bf16.mxu1 %v799_v13  ;;  %v800_v24 = vld [vmem:[%s1081_s0 + $0x24] ss:$8 sps:$4 sm:$0xff]   ;;  %v802_v26 = vld [vmem:[%s1081_s0 + $0x20] ss:$8 sps:$4 sm:$0xff]   ;;  %v806_v28 = vld [vmem:[%s1081_s0 + $0x34] ss:$8 sps:$4 sm:$0xff]  }
   0xa   :  { %v809_v25 = vld [vmem:[%s1081_s0 + $0x64] ss:$8 sps:$4 sm:$0xff]   ;;  %v811_v27 = vld [vmem:[%s1081_s0 + $0x60] ss:$8 sps:$4 sm:$0xff]   ;;  %v812_v29 = vld [vmem:[%s1081_s0 + $0x74] ss:$8 sps:$4 sm:$0xff]  }
   0xb   :  { %700 = vmatpush3.bf16.msra.mxu0 %v780_v5  ;;  %769 = vmatpush3.bf16.msra.mxu1 %v780_v5  ;;  %v808_v30 = vld [vmem:[%s1081_s0 + $0x30] ss:$8 sps:$4 sm:$0xff]  }
   0xc   :  { %701 = vmatprep.subr.bf16.mxu0 %v781_v6  ;;  %762 = vmatprep.subr.bf16.mxu1 %v781_v6  ;;  %v814_v31 = vld [vmem:[%s1081_s0 + $0x70] ss:$8 sps:$4 sm:$0xff]  }
   0xf   :  { %702 = vmatpush3.bf16.msra.mxu0 %v782_v7  ;;  %770 = vmatpush3.bf16.msra.mxu1 %v782_v7 }
  0x10   :  { %703 = vmatprep.subr.bf16.mxu0 %v783_v8  ;;  %763 = vmatprep.subr.bf16.mxu1 %v783_v8 }
  0x13   :  { %704 = vmatpush3.bf16.msra.mxu0 %v784_v9  ;;  %771 = vmatpush3.bf16.msra.mxu1 %v784_v9 }
  0x14   :  { %705 = vmatprep.subr.bf16.mxu0 %v785_v10  ;;  %764 = vmatprep.subr.bf16.mxu1 %v785_v10 }
  0x17   :  { %706 = vmatpush3.bf16.msra.mxu0 %v786_v12  ;;  %772 = vmatpush3.bf16.msra.mxu1 %v786_v12 }
  0x18   :  { %707 = vmatprep.subr.bf16.mxu0 %v787_v14  ;;  %765 = vmatprep.subr.bf16.mxu1 %v787_v14 }
  0x1b   :  { %708 = vmatpush3.bf16.msra.mxu0 %v788_v15  ;;  %773 = vmatpush3.bf16.msra.mxu1 %v788_v15 }
  0x1c   :  { %709 = vmatprep.subr.bf16.mxu0 %v789_v16  ;;  %766 = vmatprep.subr.bf16.mxu1 %v789_v16 }
  0x1f   :  { %710 = vmatpush3.bf16.msra.mxu0 %v790_v17  ;;  %774 = vmatpush3.bf16.msra.mxu1 %v790_v17 }
  0x22   :  { %275 = vmatmul.mubr.bf16.vlgmr.msra.gmra.mrb[0].mxu0 %v791_v18  ;;  %307 = vmatmul.mubr.bf16.vlgmr.msra.gmra.mrb[0].mxu1 %v797_v19 }
  0x23   :  { %282 = vmatprep.mubr.bf16.mxu0 %v794_v20  ;;  %314 = vmatprep.mubr.bf16.mxu1 %v803_v21 }
  0x2a   :  { %283 = vmatmul.mubr.bf16.gmra.mrb[4].mxu0 %v796_v22  ;;  %315 = vmatmul.mubr.bf16.gmra.mrb[4].mxu1 %v805_v23 }
  0x2b   :  { %290 = vmatprep.mubr.bf16.mxu0 %v800_v24  ;;  %322 = vmatprep.mubr.bf16.mxu1 %v809_v25 }
  0x32   :  { %291 = vmatmul.mubr.bf16.gmra.mrb[8].mxu0 %v802_v26  ;;  %323 = vmatmul.mubr.bf16.gmra.mrb[8].mxu1 %v811_v27 }
  0x33   :  { %298 = vmatprep.mubr.bf16.mxu0 %v806_v28  ;;  %330 = vmatprep.mubr.bf16.mxu1 %v812_v29 }
  0x3a   :  { %299 = vmatmul.mubr.bf16.gmra.mrb[12].mxu0 %v808_v30  ;;  %331 = vmatmul.mubr.bf16.gmra.mrb[12].mxu1 %v814_v31 }
  0xf5   :  { %v711_v32 = vpop.f32.mrb[0].mxu0  ;;  %v735_v33 = vpop.f32.mrb[0].mxu1 }
  0xf6   :  { %v712_v34 = vpop.f32.mrb[1].mxu0  ;;  %v736_v35 = vpop.f32.mrb[1].mxu1 }
  0xf7   :  { %v938_v36 = vadd.f32 %v712_v34, %v711_v32  ;;  %v714_v37 = vpop.f32.mrb[2].mxu0  ;;  %v940_v38 = vadd.f32 %v736_v35, %v735_v33  ;;  %v738_v39 = vpop.f32.mrb[2].mxu1 }
  0xf8   :  { %v715_v40 = vpop.f32.mrb[3].mxu0  ;;  %v739_v41 = vpop.f32.mrb[3].mxu1 }
  0xf9   :  { %v942_v42 = vadd.f32 %v715_v40, %v714_v37  ;;  %v944_v43 = vadd.f32 %v739_v41, %v738_v39  ;;  %v361_v55 = vmul.f32 %v938_v36, %v938_v36  ;;  %v369_v39 = vmul.f32 %v940_v38, %v940_v38 }
  0xfb   :  { %v362_v48 = vmul.f32 %v942_v42, %v942_v42  ;;  %v339_v56 = vadd.f32 %v942_v42, %v938_v36 }
  0xfd   :  { %v717_v44 = vpop.f32.mrb[4].mxu0  ;;  %v741_v45 = vpop.f32.mrb[4].mxu1  ;;  %v377_v60 = vadd.f32 %v362_v48, %v361_v55 }
  0xfe   :  { %v718_v46 = vpop.f32.mrb[5].mxu0  ;;  %v742_v47 = vpop.f32.mrb[5].mxu1 }
  0xff   :  { %v948_v49 = vadd.f32 %v718_v46, %v717_v44  ;;  %v720_v50 = vpop.f32.mrb[6].mxu0  ;;  %v950_v51 = vadd.f32 %v742_v47, %v741_v45  ;;  %v744_v52 = vpop.f32.mrb[6].mxu1  ;;  %v370_v44 = vmul.f32 %v944_v43, %v944_v43 }
 0x100   :  { %v721_v53 = vpop.f32.mrb[7].mxu0  ;;  %v745_v54 = vpop.f32.mrb[7].mxu1 }
 0x101   :  { %v363_v57 = vmul.f32 %v948_v49, %v948_v49  ;;  %v958_v58 = vadd.f32 %v721_v53, %v720_v50  ;;  %v960_v59 = vadd.f32 %v745_v54, %v744_v52  ;;  %v340_v61 = vadd.f32 %v948_v49, %v339_v56 }
 0x102   :  { %v371_v47 = vmul.f32 %v950_v51, %v950_v51 }
 0x103   :  { %v378_v62 = vadd.f32 %v377_v60, %v363_v57  ;;  %v364_v63 = vmul.f32 %v958_v58, %v958_v58  ;;  %v341_v4 = vadd.f32 %v958_v58, %v340_v61  ;;  %v372_v52 = vmul.f32 %v960_v59, %v960_v59 }
 0x105   :  { %v723_v0 = vpop.f32.mrb[8].mxu0  ;;  %v747_v1 = vpop.f32.mrb[8].mxu1  ;;  %v379_v11 = vadd.f32 %v378_v62, %v364_v63 }
 0x106   :  { %v724_v2 = vpop.f32.mrb[9].mxu0  ;;  %v748_v3 = vpop.f32.mrb[9].mxu1 }
 0x107   :  { %v966_v5 = vadd.f32 %v724_v2, %v723_v0  ;;  %v726_v6 = vpop.f32.mrb[10].mxu0  ;;  %v968_v7 = vadd.f32 %v748_v3, %v747_v1  ;;  %v750_v8 = vpop.f32.mrb[10].mxu1 }
 0x108   :  { %v727_v9 = vpop.f32.mrb[11].mxu0  ;;  %v751_v10 = vpop.f32.mrb[11].mxu1 }
 0x109   :  { %v342_v12 = vadd.f32 %v966_v5, %v341_v4  ;;  %v365_v13 = vmul.f32 %v966_v5, %v966_v5  ;;  %v973_v14 = vadd.f32 %v727_v9, %v726_v6  ;;  %v975_v15 = vadd.f32 %v751_v10, %v750_v8 }
 0x10a   :  { %v373_v56 = vmul.f32 %v968_v7, %v968_v7 }
 0x10b   :  { %v380_v16 = vadd.f32 %v379_v11, %v365_v13  ;;  %v343_v17 = vadd.f32 %v973_v14, %v342_v12  ;;  %v366_v18 = vmul.f32 %v973_v14, %v973_v14  ;;  %v374_v62 = vmul.f32 %v975_v15, %v975_v15 }
 0x10d   :  { %v381_v19 = vadd.f32 %v380_v16, %v366_v18  ;;  %v729_v20 = vpop.f32.mrb[12].mxu0  ;;  %v753_v21 = vpop.f32.mrb[12].mxu1 }
 0x10e   :  { %v730_v22 = vpop.f32.mrb[13].mxu0  ;;  %v754_v23 = vpop.f32.mrb[13].mxu1 }
 0x10f   :  { %v980_v24 = vadd.f32 %v730_v22, %v729_v20  ;;  %v732_v25 = vpop.f32.mrb[14].mxu0  ;;  %v982_v26 = vadd.f32 %v754_v23, %v753_v21  ;;  %v756_v27 = vpop.f32.mrb[14].mxu1 }
 0x110   :  { %v733_v28 = vpop.f32.mrb[15].mxu0  ;;  %v757_v29 = vpop.f32.mrb[15].mxu1 }
 0x111   :  { %v344_v30 = vadd.f32 %v980_v24, %v343_v17  ;;  %v367_v31 = vmul.f32 %v980_v24, %v980_v24  ;;  %v987_v32 = vadd.f32 %v733_v28, %v732_v25  ;;  %v989_v33 = vadd.f32 %v757_v29, %v756_v27 }
 0x112   :  { %v375_v63 = vmul.f32 %v982_v26, %v982_v26  ;;  %v409_v29 = vlaneseq }
 0x113   :  { %v382_v34 = vadd.f32 %v381_v19, %v367_v31  ;;  %v345_v35 = vadd.f32 %v987_v32, %v344_v30  ;;  %v368_v37 = vmul.f32 %v987_v32, %v987_v32  ;;  %v376_v4 = vmul.f32 %v989_v33, %v989_v33  ;;  %v401_v31 = vld [vmem:[%s1082_s2] sm:$0x1] }
 0x114   :  { %v410_v30 = vshrl.u32 %v409_v29, 7 }
 0x115   :  { %v346_v40 = vadd.f32 %v940_v38, %v345_v35  ;;  %v383_v41 = vadd.f32 %v382_v34, %v368_v37 }
 0x116   :  { %v411_v34 = vsub.s32 0, %v410_v30 }
 0x117   :  { %v347_v45 = vadd.f32 %v944_v43, %v346_v40  ;;  %v384_v46 = vadd.f32 %v383_v41, %v369_v39  ;;  %v405_v39 = vld [vmem:[%s1083_s3] sm:$0x1] }
 0x119   :  { %v385_v48 = vadd.f32 %v384_v46, %v370_v44  ;;  %v348_v50 = vadd.f32 %v950_v51, %v347_v45 }
 0x11b   :  { %v349_v53 = vadd.f32 %v960_v59, %v348_v50  ;;  %v386_v54 = vadd.f32 %v385_v48, %v371_v47 }
 0x11d   :  { %v350_v55 = vadd.f32 %v968_v7, %v349_v53  ;;  %v387_v57 = vadd.f32 %v386_v54, %v372_v52 }
 0x11f   :  { %v388_v60 = vadd.f32 %v387_v57, %v373_v56  ;;  %v351_v61 = vadd.f32 %v975_v15, %v350_v55 }
 0x121   :  { %v389_v0 = vadd.f32 %v388_v60, %v374_v62  ;;  %v352_v1 = vadd.f32 %v982_v26, %v351_v61 }
 0x123   :  { %v390_v2 = vadd.f32 %v389_v0, %v375_v63  ;;  %v353_v3 = vadd.f32 %v989_v33, %v352_v1 }
 0x125   :  { %v354_v6 = vrot.slane %v353_v3, 4  ;;  %v391_v8 = vadd.f32 %v390_v2, %v376_v4 }
 0x127   :  { %v355_v9 = vadd.f32 %v354_v6, %v353_v3  ;;  %v392_v10 = vrot.slane %v391_v8, 4 }
 0x129   :  { %v356_v11 = vrot.slane %v355_v9, 2  ;;  %v393_v12 = vadd.f32 %v392_v10, %v391_v8 }
 0x12b   :  { %v357_v13 = vadd.f32 %v356_v11, %v355_v9  ;;  %v394_v16 = vrot.slane %v393_v12, 2 }
 0x12d   :  { %v358_v17 = vrot.slane %v357_v13, 1  ;;  %v395_v18 = vadd.f32 %v394_v16, %v393_v12 }
 0x12f   :  { %v359_v19 = vadd.f32 %v358_v17, %v357_v13  ;;  %v396_v20 = vrot.slane %v395_v18, 1 }
 0x131   :  { %v360_v21 = vmul.f32 0.0078125, %v359_v19  ;;  %v397_v22 = vadd.f32 %v396_v20, %v395_v18 }
 0x133   :  { %v398_v23 = vmul.f32 0.0078125, %v397_v22  ;;  %v399_v25 = vmul.f32 %v360_v21, %v360_v21 }
 0x135   :  { %v400_v27 = vsub.f32 %v398_v23, %v399_v25 }
 0x137   :  { %v402_v28 = vadd.f32 1e-05, %v400_v27 }
 0x139   :  { %815 = vrsqrt.f32 %v402_v28 }
 0x143   :  { %v816_v35 = vpop.eup %815 }
 0x144   :  { %v404_v37 = vmul.f32 %v816_v35, %v401_v31 }
 0x146   :  { %v406_v40 = vmul.f32 %v404_v37, %v360_v21  ;;  %v412_v41 = vrot.slane %v404_v37, %v411_v34 }
 0x148   :  { %v407_v44 = vsub.f32 %v405_v39, %v406_v40  ;;  %v414_v45 = vmul.f32 %v938_v36, %v412_v41  ;;  %v417_v46 = vmul.f32 %v958_v58, %v412_v41  ;;  %v418_v47 = vmul.f32 %v966_v5, %v412_v41 }
 0x149   :  { %v419_v48 = vmul.f32 %v973_v14, %v412_v41  ;;  %v420_v50 = vmul.f32 %v980_v24, %v412_v41  ;;  %v421_v52 = vmul.f32 %v987_v32, %v412_v41  ;;  %v422_v53 = vmul.f32 %v940_v38, %v412_v41 }
 0x14a   :  { %v423_v54 = vmul.f32 %v944_v43, %v412_v41  ;;  %v424_v55 = vmul.f32 %v950_v51, %v412_v41  ;;  %v425_v56 = vmul.f32 %v960_v59, %v412_v41  ;;  %v426_v36 = vmul.f32 %v968_v7, %v412_v41 }
 0x14b   :  { %v427_v58 = vmul.f32 %v975_v15, %v412_v41  ;;  %v428_v5 = vmul.f32 %v982_v26, %v412_v41  ;;  %v415_v14 = vmul.f32 %v942_v42, %v412_v41  ;;  %v416_v24 = vmul.f32 %v948_v49, %v412_v41 }
 0x14c   :  { %v429_v32 = vmul.f32 %v989_v33, %v412_v41  ;;  %v434_v57 = vrot.slane %v407_v44, %v411_v34 }
 0x14e   :  { %v436_v38 = vadd.f32 %v434_v57, %v414_v45  ;;  %v437_v60 = vadd.f32 %v434_v57, %v415_v14  ;;  %v438_v43 = vadd.f32 %v434_v57, %v416_v24  ;;  %v439_v61 = vadd.f32 %v434_v57, %v417_v46 }
 0x14f   :  { %v440_v51 = vadd.f32 %v434_v57, %v418_v47  ;;  %v441_v62 = vadd.f32 %v434_v57, %v419_v48  ;;  %v442_v59 = vadd.f32 %v434_v57, %v420_v50  ;;  %v443_v63 = vadd.f32 %v434_v57, %v421_v52 }
 0x150   :  { %v444_v7 = vadd.f32 %v434_v57, %v422_v53  ;;  %v445_v0 = vadd.f32 %v434_v57, %v423_v54  ;;  %v446_v15 = vadd.f32 %v434_v57, %v424_v55  ;;  %v447_v1 = vadd.f32 %v434_v57, %v425_v56 }
 0x151   :  { %v448_v26 = vadd.f32 %v434_v57, %v426_v36  ;;  %v449_v2 = vadd.f32 %v434_v57, %v427_v58  ;;  %v450_v42 = vadd.f32 %v434_v57, %v428_v5  ;;  %v451_v3 = vadd.f32 %v434_v57, %v429_v32 }
 0x152   :  { %vm452_vm0 = vcmp.gt.f32.partialorder %v436_v38, 0.0  ;;  %vm453_vm1 = vcmp.gt.f32.partialorder %v437_v60, 0.0  ;;  %vm454_vm2 = vcmp.gt.f32.partialorder %v438_v43, 0.0  ;;  %vm455_vm3 = vcmp.gt.f32.partialorder %v439_v61, 0.0 }
 0x153   :  { %vm456_vm4 = vcmp.gt.f32.partialorder %v440_v51, 0.0  ;;  %vm457_vm5 = vcmp.gt.f32.partialorder %v441_v62, 0.0  ;;  %vm458_vm6 = vcmp.gt.f32.partialorder %v442_v59, 0.0  ;;  %vm459_vm7 = vcmp.gt.f32.partialorder %v443_v63, 0.0 }
 0x154   :  { %vm460_vm8 = vcmp.gt.f32.partialorder %v444_v7, 0.0  ;;  %vm461_vm9 = vcmp.gt.f32.partialorder %v445_v0, 0.0  ;;  %vm462_vm10 = vcmp.gt.f32.partialorder %v446_v15, 0.0  ;;  %vm463_vm11 = vcmp.gt.f32.partialorder %v447_v1, 0.0 }
 0x155   :  { %vm464_vm12 = vcmp.gt.f32.partialorder %v448_v26, 0.0  ;;  %vm465_vm13 = vcmp.gt.f32.partialorder %v449_v2, 0.0  ;;  %vm466_vm14 = vcmp.gt.f32.partialorder %v450_v42, 0.0  ;;  %vm467_vm15 = vcmp.gt.f32.partialorder %v451_v3, 0.0 }
 0x156   :  { %v468_v49 = vmul.f32 0.2, %v436_v38  ;;  %v469_v33 = vmul.f32 0.2, %v437_v60  ;;  %v470_v4 = vmul.f32 0.2, %v438_v43 }
 0x157   :  { %v471_v6 = vmul.f32 0.2, %v439_v61  ;;  %v472_v8 = vmul.f32 0.2, %v440_v51  ;;  %v473_v9 = vmul.f32 0.2, %v441_v62 }
 0x158   :  { %v474_v10 = vmul.f32 0.2, %v442_v59  ;;  %v475_v11 = vmul.f32 0.2, %v443_v63  ;;  %v476_v12 = vmul.f32 0.2, %v444_v7  ;;  %v484_v13 = vsel %vm452_vm0, %v436_v38, %v468_v49 }
 0x159   :  { %v477_v16 = vmul.f32 0.2, %v445_v0  ;;  %v478_v17 = vmul.f32 0.2, %v446_v15  ;;  %v479_v18 = vmul.f32 0.2, %v447_v1  ;;  %v485_v19 = vsel %vm453_vm1, %v437_v60, %v469_v33 }
 0x15a   :  { %v480_v20 = vmul.f32 0.2, %v448_v26  ;;  %v481_v21 = vmul.f32 0.2, %v449_v2  ;;  %v482_v22 = vmul.f32 0.2, %v450_v42  ;;  %v486_v23 = vsel %vm454_vm2, %v438_v43, %v470_v4 }
 0x15b   :  { %v483_v25 = vmul.f32 0.2, %v451_v3  ;;  %v487_v27 = vsel %vm455_vm3, %v439_v61, %v471_v6  ;;  %v488_v28 = vsel %vm456_vm4, %v440_v51, %v472_v8  ;;  %v489_v29 = vsel %vm457_vm5, %v441_v62, %v473_v9 }
 0x15c   :  { %v490_v30 = vsel %vm458_vm6, %v442_v59, %v474_v10  ;;  %v491_v31 = vsel %vm459_vm7, %v443_v63, %v475_v11  ;;  %v492_v34 = vsel %vm460_vm8, %v444_v7, %v476_v12  ;;  %v493_v35 = vsel %vm461_vm9, %v445_v0, %v477_v16 }
 0x15d   :  { %v494_v37 = vsel %vm462_vm10, %v446_v15, %v478_v17  ;;  %v495_v39 = vsel %vm463_vm11, %v447_v1, %v479_v18  ;;  %v496_v40 = vsel %vm464_vm12, %v448_v26, %v480_v20  ;;  %v497_v41 = vsel %vm465_vm13, %v449_v2, %v481_v21 }
 0x15e   :  { %v498_v44 = vsel %vm466_vm14, %v450_v42, %v482_v22  ;;  %v499_v45 = vsel %vm467_vm15, %v451_v3, %v483_v25  ;;  %v651_v46 = vpack.c.bf16 %v485_v19, %v484_v13  ;;  %v656_v47 = vpack.c.bf16 %v487_v27, %v486_v23 }
 0x15f   :  { %v661_v48 = vpack.c.bf16 %v489_v29, %v488_v28  ;;  %v666_v50 = vpack.c.bf16 %v491_v31, %v490_v30  ;;  %v671_v52 = vpack.c.bf16 %v493_v35, %v492_v34  ;;  %v676_v53 = vpack.c.bf16 %v495_v39, %v494_v37 }
 0x160   :  { %652 = vst [vmem:[%s1084_s4] sm:$0xff] %v651_v46   ;;  %688 = vst [vmem:[%s1084_s4 + $0x8] sm:$0xff] %v656_v47   ;;  %v681_v54 = vpack.c.bf16 %v497_v41, %v496_v40  ;;  %v686_v55 = vpack.c.bf16 %v499_v45, %v498_v44 }
 0x161   :  { %689 = vst [vmem:[%s1084_s4 + $0x10] sm:$0xff] %v661_v48   ;;  %690 = vst [vmem:[%s1084_s4 + $0x18] sm:$0xff] %v666_v50  }
 0x162   :  { %691 = vst [vmem:[%s1084_s4 + $0x20] sm:$0xff] %v671_v52   ;;  %692 = vst [vmem:[%s1084_s4 + $0x28] sm:$0xff] %v676_v53  }
 0x163   :  { %693 = vst [vmem:[%s1084_s4 + $0x30] sm:$0xff] %v681_v54   ;;  %694 = vst [vmem:[%s1084_s4 + $0x38] sm:$0xff] %v686_v55  }

// kernel: discriminator_forward.8
= control target key start
LH: loop header
LB: loop body
LE: loop exit
PB: predicated region body
PF: predicated region fallthrough
CT: control target
= control target key end

     0   :  { %s827_s1 = inlined_call_operand.vmem [shape: bf16[512,128], index: 1, kind: input, shape index: {}]   ;;  %s828_s0 = inlined_call_operand.vmem [shape: bf16[32,512], index: 0, kind: input, shape index: {}]   ;;  %s829_s2 = inlined_call_operand.vmem [shape: f32[1,128], index: 2, kind: input, shape index: {}]   ;;  %s830_s3 = inlined_call_operand.vmem [shape: f32[1,128], index: 3, kind: input, shape index: {}]   ;;  %s831_s4 = inlined_call_operand.vmem [shape: bf16[32,128], index: 4, kind: output, shape index: {}]  }
   0x1   :  { %v624_v0 = vld [vmem:[%s827_s1 + $0x40] sm:$0xff]   ;;  %v628_v4 = vld [vmem:[%s827_s1 + $0x48] sm:$0xff]   ;;  %v632_v8 = vld [vmem:[%s827_s1 + $0x50] sm:$0xff]  }
   0x2   :  { %v625_v1 = vld [vmem:[%s827_s1 + $0xc0] sm:$0xff]   ;;  %568 = vmatprep.subr.bf16.mxu0 %v624_v0  ;;  %v629_v5 = vld [vmem:[%s827_s1 + $0xc8] sm:$0xff]   ;;  %v633_v9 = vld [vmem:[%s827_s1 + $0xd0] sm:$0xff]  }
   0x3   :  { %v626_v2 = vld [vmem:[%s827_s1] sm:$0xff]   ;;  %596 = vmatprep.subr.bf16.mxu1 %v625_v1  ;;  %v630_v6 = vld [vmem:[%s827_s1 + $0x8] sm:$0xff]   ;;  %v634_v10 = vld [vmem:[%s827_s1 + $0x10] sm:$0xff]  }
   0x4   :  { %v627_v3 = vld [vmem:[%s827_s1 + $0x80] sm:$0xff]   ;;  %569 = vmatpush3.bf16.msra.mxu0 %v626_v2  ;;  %v631_v7 = vld [vmem:[%s827_s1 + $0x88] sm:$0xff]   ;;  %v635_v11 = vld [vmem:[%s827_s1 + $0x90] sm:$0xff]  }
   0x5   :  { %597 = vmatpush3.bf16.msra.mxu1 %v627_v3  ;;  %570 = vmatprep.subr.bf16.mxu0 %v628_v4  ;;  %v636_v12 = vld [vmem:[%s827_s1 + $0x58] sm:$0xff]   ;;  %v640_v16 = vld [vmem:[%s827_s1 + $0x60] sm:$0xff]   ;;  %v644_v20 = vld [vmem:[%s827_s1 + $0x68] sm:$0xff]  }
   0x6   :  { %598 = vmatprep.subr.bf16.mxu1 %v629_v5  ;;  %v637_v13 = vld [vmem:[%s827_s1 + $0xd8] sm:$0xff]   ;;  %v641_v17 = vld [vmem:[%s827_s1 + $0xe0] sm:$0xff]   ;;  %v645_v21 = vld [vmem:[%s827_s1 + $0xe8] sm:$0xff]  }
   0x7   :  { %v638_v14 = vld [vmem:[%s827_s1 + $0x18] sm:$0xff]   ;;  %v642_v18 = vld [vmem:[%s827_s1 + $0x20] sm:$0xff]   ;;  %v646_v22 = vld [vmem:[%s827_s1 + $0x28] sm:$0xff]  }
   0x8   :  { %571 = vmatpush3.bf16.msra.mxu0 %v630_v6  ;;  %v639_v15 = vld [vmem:[%s827_s1 + $0x98] sm:$0xff]   ;;  %v643_v19 = vld [vmem:[%s827_s1 + $0xa0] sm:$0xff]   ;;  %v647_v23 = vld [vmem:[%s827_s1 + $0xa8] sm:$0xff]  }
   0x9   :  { %599 = vmatpush3.bf16.msra.mxu1 %v631_v7  ;;  %572 = vmatprep.subr.bf16.mxu0 %v632_v8  ;;  %v648_v24 = vld [vmem:[%s827_s1 + $0x70] sm:$0xff]   ;;  %v652_v28 = vld [vmem:[%s827_s1 + $0x78] sm:$0xff]  }
   0xa   :  { %600 = vmatprep.subr.bf16.mxu1 %v633_v9  ;;  %v649_v25 = vld [vmem:[%s827_s1 + $0xf0] sm:$0xff]   ;;  %v653_v29 = vld [vmem:[%s827_s1 + $0xf8] sm:$0xff]  }
   0xb   :  { %v650_v26 = vld [vmem:[%s827_s1 + $0x30] sm:$0xff]   ;;  %v654_v30 = vld [vmem:[%s827_s1 + $0x38] sm:$0xff]  }
   0xc   :  { %573 = vmatpush3.bf16.msra.mxu0 %v634_v10  ;;  %v651_v27 = vld [vmem:[%s827_s1 + $0xb0] sm:$0xff]   ;;  %v655_v31 = vld [vmem:[%s827_s1 + $0xb8] sm:$0xff]  }
   0xd   :  { %601 = vmatpush3.bf16.msra.mxu1 %v635_v11  ;;  %574 = vmatprep.subr.bf16.mxu0 %v636_v12  ;;  %v656_v32 = vld [vmem:[%s828_s0] ss:$16 sps:$4 sm:$0xff]   ;;  %v658_v33 = vld [vmem:[%s828_s0 + $0x4] ss:$16 sps:$4 sm:$0xff]   ;;  %v659_v34 = vld [vmem:[%s828_s0 + $0x8] ss:$16 sps:$4 sm:$0xff]  }
   0xe   :  { %602 = vmatprep.subr.bf16.mxu1 %v637_v13  ;;  %v661_v35 = vld [vmem:[%s828_s0 + $0xc] ss:$16 sps:$4 sm:$0xff]   ;;  %354 = vmatprep.mubr.bf16.mxu0 %v658_v33  ;;  %v662_v36 = vld [vmem:[%s828_s0 + $0x24] ss:$16 sps:$4 sm:$0xff]   ;;  %v666_v38 = vld [vmem:[%s828_s0 + $0x20] ss:$16 sps:$4 sm:$0xff]  }
   0xf   :  { %403 = vmatprep.mubr.bf16.mxu1 %v661_v35  ;;  %v664_v37 = vld [vmem:[%s828_s0 + $0x2c] ss:$16 sps:$4 sm:$0xff]   ;;  %v667_v39 = vld [vmem:[%s828_s0 + $0x28] ss:$16 sps:$4 sm:$0xff]   ;;  %v446_v33 = vld [vmem:[%s829_s2] sm:$0x1] }
  0x10   :  { %575 = vmatpush3.bf16.msra.mxu0 %v638_v14 }
  0x11   :  { %603 = vmatpush3.bf16.msra.mxu1 %v639_v15  ;;  %576 = vmatprep.subr.bf16.mxu0 %v640_v16 }
  0x12   :  { %604 = vmatprep.subr.bf16.mxu1 %v641_v17 }
  0x14   :  { %577 = vmatpush3.bf16.msra.mxu0 %v642_v18 }
  0x15   :  { %605 = vmatpush3.bf16.msra.mxu1 %v643_v19  ;;  %578 = vmatprep.subr.bf16.mxu0 %v644_v20 }
  0x16   :  { %606 = vmatprep.subr.bf16.mxu1 %v645_v21 }
  0x18   :  { %579 = vmatpush3.bf16.msra.mxu0 %v646_v22 }
  0x19   :  { %607 = vmatpush3.bf16.msra.mxu1 %v647_v23  ;;  %580 = vmatprep.subr.bf16.mxu0 %v648_v24 }
  0x1a   :  { %608 = vmatprep.subr.bf16.mxu1 %v649_v25 }
  0x1c   :  { %581 = vmatpush3.bf16.msra.mxu0 %v650_v26 }
  0x1d   :  { %609 = vmatpush3.bf16.msra.mxu1 %v651_v27  ;;  %582 = vmatprep.subr.bf16.mxu0 %v652_v28 }
  0x1e   :  { %610 = vmatprep.subr.bf16.mxu1 %v653_v29 }
  0x20   :  { %583 = vmatpush3.bf16.msra.mxu0 %v654_v30 }
  0x21   :  { %611 = vmatpush3.bf16.msra.mxu1 %v655_v31  ;;  %v454_v31 = vlaneseq }
  0x23   :  { %355 = vmatmul.mubr.bf16.vlgmr.msra.gmra.mrb[0].mxu0 %v656_v32  ;;  %v455_v32 = vshrl.u32 %v454_v31, 7 }
  0x24   :  { %404 = vmatmul.mubr.bf16.vlgmr.msra.gmra.mrb[0].mxu1 %v659_v34  ;;  %362 = vmatprep.mubr.bf16.mxu0 %v662_v36 }
  0x25   :  { %411 = vmatprep.mubr.bf16.mxu1 %v664_v37  ;;  %v456_v34 = vsub.s32 0, %v455_v32  ;;  %v450_v37 = vld [vmem:[%s830_s3] sm:$0x1] }
  0x2b   :  { %363 = vmatmul.mubr.bf16.gmra.mrb[4].mxu0 %v666_v38 }
  0x2c   :  { %412 = vmatmul.mubr.bf16.gmra.mrb[4].mxu1 %v667_v39 }
  0xf6   :  { %v584_v40 = vpop.f32.mrb[0].mxu0 }
  0xf7   :  { %v612_v41 = vpop.f32.mrb[0].mxu1  ;;  %v585_v42 = vpop.f32.mrb[1].mxu0 }
  0xf8   :  { %v586_v43 = vadd.f32 %v585_v42, %v584_v40  ;;  %v613_v44 = vpop.f32.mrb[1].mxu1  ;;  %v587_v45 = vpop.f32.mrb[2].mxu0 }
  0xf9   :  { %v614_v46 = vadd.f32 %v613_v44, %v612_v41  ;;  %v615_v47 = vpop.f32.mrb[2].mxu1  ;;  %v588_v48 = vpop.f32.mrb[3].mxu0 }
  0xfa   :  { %v589_v49 = vadd.f32 %v588_v48, %v587_v45  ;;  %v616_v50 = vpop.f32.mrb[3].mxu1 }
  0xfb   :  { %v406_v51 = vadd.f32 %v614_v46, %v586_v43  ;;  %v617_v52 = vadd.f32 %v616_v50, %v615_v47 }
  0xfd   :  { %v409_v53 = vadd.f32 %v617_v52, %v589_v49  ;;  %v430_v55 = vmul.f32 %v406_v51, %v406_v51 }
  0xfe   :  { %v590_v54 = vpop.f32.mrb[4].mxu0 }
  0xff   :  { %v420_v56 = vadd.f32 %v409_v53, %v406_v51  ;;  %v431_v57 = vmul.f32 %v409_v53, %v409_v53  ;;  %v618_v58 = vpop.f32.mrb[4].mxu1  ;;  %v591_v59 = vpop.f32.mrb[5].mxu0 }
 0x100   :  { %v592_v60 = vadd.f32 %v591_v59, %v590_v54  ;;  %v619_v61 = vpop.f32.mrb[5].mxu1  ;;  %v593_v62 = vpop.f32.mrb[6].mxu0 }
 0x101   :  { %v434_v63 = vadd.f32 %v431_v57, %v430_v55  ;;  %v620_v0 = vadd.f32 %v619_v61, %v618_v58  ;;  %v621_v1 = vpop.f32.mrb[6].mxu1  ;;  %v594_v2 = vpop.f32.mrb[7].mxu0 }
 0x102   :  { %v595_v3 = vadd.f32 %v594_v2, %v593_v62  ;;  %v622_v4 = vpop.f32.mrb[7].mxu1 }
 0x103   :  { %v414_v5 = vadd.f32 %v620_v0, %v592_v60  ;;  %v623_v6 = vadd.f32 %v622_v4, %v621_v1 }
 0x105   :  { %v421_v7 = vadd.f32 %v420_v56, %v414_v5  ;;  %v432_v8 = vmul.f32 %v414_v5, %v414_v5  ;;  %v417_v9 = vadd.f32 %v623_v6, %v595_v3 }
 0x107   :  { %v435_v10 = vadd.f32 %v434_v63, %v432_v8  ;;  %v422_v11 = vadd.f32 %v421_v7, %v417_v9  ;;  %v433_v12 = vmul.f32 %v417_v9, %v417_v9 }
 0x109   :  { %v423_v13 = vrot.slane %v422_v11, 4  ;;  %v436_v14 = vadd.f32 %v435_v10, %v433_v12 }
 0x10b   :  { %v424_v15 = vadd.f32 %v423_v13, %v422_v11  ;;  %v437_v16 = vrot.slane %v436_v14, 4 }
 0x10d   :  { %v425_v17 = vrot.slane %v424_v15, 2  ;;  %v438_v18 = vadd.f32 %v437_v16, %v436_v14 }
 0x10f   :  { %v426_v19 = vadd.f32 %v425_v17, %v424_v15  ;;  %v439_v20 = vrot.slane %v438_v18, 2 }
 0x111   :  { %v427_v21 = vrot.slane %v426_v19, 1  ;;  %v440_v22 = vadd.f32 %v439_v20, %v438_v18 }
 0x113   :  { %v428_v23 = vadd.f32 %v427_v21, %v426_v19  ;;  %v441_v24 = vrot.slane %v440_v22, 1 }
 0x115   :  { %v429_v25 = vmul.f32 0.03125, %v428_v23  ;;  %v442_v26 = vadd.f32 %v441_v24, %v440_v22 }
 0x117   :  { %v443_v27 = vmul.f32 0.03125, %v442_v26  ;;  %v444_v28 = vmul.f32 %v429_v25, %v429_v25 }
 0x119   :  { %v445_v29 = vsub.f32 %v443_v27, %v444_v28 }
 0x11b   :  { %v447_v30 = vadd.f32 1e-05, %v445_v29 }
 0x11d   :  { %668 = vrsqrt.f32 %v447_v30 }
 0x127   :  { %v669_v35 = vpop.eup %668 }
 0x128   :  { %v449_v36 = vmul.f32 %v669_v35, %v446_v33 }
 0x12a   :  { %v451_v38 = vmul.f32 %v449_v36, %v429_v25  ;;  %v457_v39 = vrot.slane %v449_v36, %v456_v34 }
 0x12c   :  { %v452_v40 = vsub.f32 %v450_v37, %v451_v38  ;;  %v459_v41 = vmul.f32 %v457_v39, %v406_v51  ;;  %v460_v42 = vmul.f32 %v457_v39, %v409_v53  ;;  %v461_v43 = vmul.f32 %v457_v39, %v414_v5 }
 0x12d   :  { %v462_v44 = vmul.f32 %v457_v39, %v417_v9 }
 0x12e   :  { %v467_v45 = vrot.slane %v452_v40, %v456_v34 }
 0x130   :  { %v469_v46 = vadd.f32 %v467_v45, %v459_v41  ;;  %v470_v47 = vadd.f32 %v467_v45, %v460_v42  ;;  %v471_v48 = vadd.f32 %v467_v45, %v461_v43  ;;  %v472_v49 = vadd.f32 %v467_v45, %v462_v44 }
 0x132   :  { %vm473_vm0 = vcmp.gt.f32.partialorder %v469_v46, 0.0  ;;  %vm474_vm1 = vcmp.gt.f32.partialorder %v470_v47, 0.0  ;;  %vm475_vm2 = vcmp.gt.f32.partialorder %v471_v48, 0.0  ;;  %vm476_vm3 = vcmp.gt.f32.partialorder %v472_v49, 0.0 }
 0x133   :  { %v477_v50 = vmul.f32 0.2, %v469_v46  ;;  %v478_v52 = vmul.f32 0.2, %v470_v47  ;;  %v479_v54 = vmul.f32 0.2, %v471_v48 }
 0x134   :  { %v480_v55 = vmul.f32 0.2, %v472_v49 }
 0x135   :  { %v481_v56 = vsel %vm473_vm0, %v469_v46, %v477_v50  ;;  %v482_v57 = vsel %vm474_vm1, %v470_v47, %v478_v52  ;;  %v483_v58 = vsel %vm475_vm2, %v471_v48, %v479_v54 }
 0x136   :  { %v484_v51 = vsel %vm476_vm3, %v472_v49, %v480_v55  ;;  %v560_v53 = vpack.c.bf16 %v482_v57, %v481_v56 }
 0x137   :  { %v565_v59 = vpack.c.bf16 %v484_v51, %v483_v58 }
 0x138   :  { %561 = vst [vmem:[%s831_s4] sm:$0xff] %v560_v53  }
 0x139   :  { %567 = vst [vmem:[%s831_s4 + $0x8] sm:$0xff] %v565_v59  }

// kernel: discriminator_forward.9
= control target key start
LH: loop header
LB: loop body
LE: loop exit
PB: predicated region body
PF: predicated region fallthrough
CT: control target
= control target key end

     0   :  { %s1185_s1 = inlined_call_operand.vmem [shape: bf16[1024,128], index: 1, kind: input, shape index: {}]   ;;  %s1186_s0 = inlined_call_operand.vmem [shape: bf16[8,1024], index: 0, kind: input, shape index: {}]   ;;  %s1187_s2 = inlined_call_operand.vmem [shape: f32[8,128], index: 2, kind: output, shape index: {}]  }
   0x1   :  { %v887_v0 = vld [vmem:[%s1185_s1 + $0x40] sm:$0xff]   ;;  %v891_v4 = vld [vmem:[%s1185_s1 + $0x48] sm:$0xff]   ;;  %v895_v8 = vld [vmem:[%s1185_s1 + $0x50] sm:$0xff]  }
   0x2   :  { %v888_v1 = vld [vmem:[%s1185_s1 + $0xc0] sm:$0xff]   ;;  %799 = vmatprep.subr.bf16.mxu0 %v887_v0  ;;  %v892_v5 = vld [vmem:[%s1185_s1 + $0xc8] sm:$0xff]   ;;  %v896_v9 = vld [vmem:[%s1185_s1 + $0xd0] sm:$0xff]  }
   0x3   :  { %v889_v2 = vld [vmem:[%s1185_s1] sm:$0xff]   ;;  %821 = vmatprep.subr.bf16.mxu1 %v888_v1  ;;  %v893_v6 = vld [vmem:[%s1185_s1 + $0x8] sm:$0xff]   ;;  %v897_v10 = vld [vmem:[%s1185_s1 + $0x10] sm:$0xff]  }
   0x4   :  { %v890_v3 = vld [vmem:[%s1185_s1 + $0x80] sm:$0xff]   ;;  %800 = vmatpush3.bf16.msra.mxu0 %v889_v2  ;;  %v894_v7 = vld [vmem:[%s1185_s1 + $0x88] sm:$0xff]   ;;  %v898_v11 = vld [vmem:[%s1185_s1 + $0x90] sm:$0xff]  }
   0x5   :  { %822 = vmatpush3.bf16.msra.mxu1 %v890_v3  ;;  %801 = vmatprep.subr.bf16.mxu0 %v891_v4  ;;  %v899_v12 = vld [vmem:[%s1185_s1 + $0x58] sm:$0xff]   ;;  %v903_v16 = vld [vmem:[%s1185_s1 + $0x60] sm:$0xff]   ;;  %v907_v20 = vld [vmem:[%s1185_s1 + $0x68] sm:$0xff]  }
   0x6   :  { %823 = vmatprep.subr.bf16.mxu1 %v892_v5  ;;  %v900_v13 = vld [vmem:[%s1185_s1 + $0xd8] sm:$0xff]   ;;  %v904_v17 = vld [vmem:[%s1185_s1 + $0xe0] sm:$0xff]   ;;  %v908_v21 = vld [vmem:[%s1185_s1 + $0xe8] sm:$0xff]  }
   0x7   :  { %v901_v14 = vld [vmem:[%s1185_s1 + $0x18] sm:$0xff]   ;;  %v905_v18 = vld [vmem:[%s1185_s1 + $0x20] sm:$0xff]   ;;  %v909_v22 = vld [vmem:[%s1185_s1 + $0x28] sm:$0xff]  }
   0x8   :  { %802 = vmatpush3.bf16.msra.mxu0 %v893_v6  ;;  %v902_v15 = vld [vmem:[%s1185_s1 + $0x98] sm:$0xff]   ;;  %v906_v19 = vld [vmem:[%s1185_s1 + $0xa0] sm:$0xff]   ;;  %v910_v23 = vld [vmem:[%s1185_s1 + $0xa8] sm:$0xff]  }
   0x9   :  { %824 = vmatpush3.bf16.msra.mxu1 %v894_v7  ;;  %803 = vmatprep.subr.bf16.mxu0 %v895_v8  ;;  %v911_v24 = vld [vmem:[%s1185_s1 + $0x70] sm:$0xff]   ;;  %v915_v28 = vld [vmem:[%s1185_s1 + $0x78] sm:$0xff]   ;;  %v12_v32 = vld [vmem:[%s1186_s0] sm:$0xff] }
   0xa   :  { %825 = vmatprep.subr.bf16.mxu1 %v896_v9  ;;  %v912_v25 = vld [vmem:[%s1185_s1 + $0xf0] sm:$0xff]   ;;  %v916_v29 = vld [vmem:[%s1185_s1 + $0xf8] sm:$0xff]   ;;  %v13_v33 = vld [vmem:[%s1186_s0 + $0x8] sm:$0xff]  ;;  %v727_v34 = vcombine.low %v12_v32, %v12_v32  ;;  %v728_v35 = vcombine.high %v12_v32, %v12_v32 }
   0xb   :  { %v913_v26 = vld [vmem:[%s1185_s1 + $0x30] sm:$0xff]   ;;  %v917_v30 = vld [vmem:[%s1185_s1 + $0x38] sm:$0xff]   ;;  %v729_v36 = vcombine.low %v13_v33, %v13_v33  ;;  %v730_v37 = vcombine.high %v13_v33, %v13_v33  ;;  %v923_v38 = vld [vmem:[%s1185_s1 + $0x140] sm:$0xff]  }
   0xc   :  { %804 = vmatpush3.bf16.msra.mxu0 %v897_v10  ;;  %v914_v27 = vld [vmem:[%s1185_s1 + $0xb0] sm:$0xff]   ;;  %v918_v31 = vld [vmem:[%s1185_s1 + $0xb8] sm:$0xff]   ;;  %v924_v39 = vld [vmem:[%s1185_s1 + $0x1c0] sm:$0xff]   ;;  %588 = vmatprep.mubr.bf16.mxu0 %v728_v35 }
   0xd   :  { %826 = vmatpush3.bf16.msra.mxu1 %v898_v11  ;;  %805 = vmatprep.subr.bf16.mxu0 %v899_v12  ;;  %v925_v40 = vld [vmem:[%s1185_s1 + $0x100] sm:$0xff]   ;;  %v927_v42 = vld [vmem:[%s1185_s1 + $0x148] sm:$0xff]   ;;  %v931_v46 = vld [vmem:[%s1185_s1 + $0x150] sm:$0xff]  }
   0xe   :  { %827 = vmatprep.subr.bf16.mxu1 %v900_v13  ;;  %628 = vmatprep.mubr.bf16.mxu1 %v730_v37  ;;  %v926_v41 = vld [vmem:[%s1185_s1 + $0x180] sm:$0xff]   ;;  %v928_v43 = vld [vmem:[%s1185_s1 + $0x1c8] sm:$0xff]   ;;  %v932_v47 = vld [vmem:[%s1185_s1 + $0x1d0] sm:$0xff]  }
   0xf   :  { %v929_v44 = vld [vmem:[%s1185_s1 + $0x108] sm:$0xff]   ;;  %v933_v48 = vld [vmem:[%s1185_s1 + $0x110] sm:$0xff]   ;;  %v935_v50 = vld [vmem:[%s1185_s1 + $0x158] sm:$0xff]  }
  0x10   :  { %806 = vmatpush3.bf16.msra.mxu0 %v901_v14  ;;  %v930_v45 = vld [vmem:[%s1185_s1 + $0x188] sm:$0xff]   ;;  %v934_v49 = vld [vmem:[%s1185_s1 + $0x190] sm:$0xff]   ;;  %v936_v51 = vld [vmem:[%s1185_s1 + $0x1d8] sm:$0xff]  }
  0x11   :  { %828 = vmatpush3.bf16.msra.mxu1 %v902_v15  ;;  %807 = vmatprep.subr.bf16.mxu0 %v903_v16  ;;  %v937_v52 = vld [vmem:[%s1185_s1 + $0x118] sm:$0xff]   ;;  %v939_v54 = vld [vmem:[%s1185_s1 + $0x160] sm:$0xff]   ;;  %v943_v58 = vld [vmem:[%s1185_s1 + $0x168] sm:$0xff]  }
  0x12   :  { %829 = vmatprep.subr.bf16.mxu1 %v904_v17  ;;  %v938_v53 = vld [vmem:[%s1185_s1 + $0x198] sm:$0xff]   ;;  %v940_v55 = vld [vmem:[%s1185_s1 + $0x1e0] sm:$0xff]   ;;  %v944_v59 = vld [vmem:[%s1185_s1 + $0x1e8] sm:$0xff]  }
  0x13   :  { %v941_v56 = vld [vmem:[%s1185_s1 + $0x120] sm:$0xff]   ;;  %v945_v60 = vld [vmem:[%s1185_s1 + $0x128] sm:$0xff]   ;;  %v947_v62 = vld [vmem:[%s1185_s1 + $0x170] sm:$0xff]  }
  0x14   :  { %808 = vmatpush3.bf16.msra.mxu0 %v905_v18  ;;  %v942_v57 = vld [vmem:[%s1185_s1 + $0x1a0] sm:$0xff]   ;;  %v946_v61 = vld [vmem:[%s1185_s1 + $0x1a8] sm:$0xff]   ;;  %v948_v63 = vld [vmem:[%s1185_s1 + $0x1f0] sm:$0xff]  }
  0x15   :  { %830 = vmatpush3.bf16.msra.mxu1 %v906_v19  ;;  %809 = vmatprep.subr.bf16.mxu0 %v907_v20  ;;  %v949_v0 = vld [vmem:[%s1185_s1 + $0x130] sm:$0xff]   ;;  %v951_v2 = vld [vmem:[%s1185_s1 + $0x178] sm:$0xff]  }
  0x16   :  { %831 = vmatprep.subr.bf16.mxu1 %v908_v21  ;;  %v950_v1 = vld [vmem:[%s1185_s1 + $0x1b0] sm:$0xff]   ;;  %v952_v3 = vld [vmem:[%s1185_s1 + $0x1f8] sm:$0xff]  }
  0x17   :  { %v953_v4 = vld [vmem:[%s1185_s1 + $0x138] sm:$0xff]   ;;  %v14_v6 = vld [vmem:[%s1186_s0 + $0x10] sm:$0xff] }
  0x18   :  { %810 = vmatpush3.bf16.msra.mxu0 %v909_v22  ;;  %v954_v5 = vld [vmem:[%s1185_s1 + $0x1b8] sm:$0xff]   ;;  %v731_v7 = vcombine.low %v14_v6, %v14_v6  ;;  %v732_v8 = vcombine.high %v14_v6, %v14_v6 }
  0x19   :  { %832 = vmatpush3.bf16.msra.mxu1 %v910_v23  ;;  %811 = vmatprep.subr.bf16.mxu0 %v911_v24  ;;  %v15_v9 = vld [vmem:[%s1186_s0 + $0x18] sm:$0xff] }
  0x1a   :  { %833 = vmatprep.subr.bf16.mxu1 %v912_v25  ;;  %v733_v10 = vcombine.low %v15_v9, %v15_v9  ;;  %v734_v11 = vcombine.high %v15_v9, %v15_v9 }
  0x1c   :  { %812 = vmatpush3.bf16.msra.mxu0 %v913_v26 }
  0x1d   :  { %834 = vmatpush3.bf16.msra.mxu1 %v914_v27  ;;  %813 = vmatprep.subr.bf16.mxu0 %v915_v28 }
  0x1e   :  { %835 = vmatprep.subr.bf16.mxu1 %v916_v29 }
  0x20   :  { %814 = vmatpush3.bf16.msra.mxu0 %v917_v30 }
  0x21   :  { %836 = vmatpush3.bf16.msra.mxu1 %v918_v31  ;;  %843 = vmatprep.subr.bf16.mxu0 %v923_v38 }
  0x22   :  { %865 = vmatprep.subr.bf16.mxu1 %v924_v39 }
  0x23   :  { %589 = vmatmul.mubr.bf16.vlgmr.msra.gmra.mrb[0].mxu0 %v727_v34 }
  0x24   :  { %629 = vmatmul.mubr.bf16.vlgmr.msra.gmra.mrb[0].mxu1 %v729_v36  ;;  %844 = vmatpush3.bf16.msra.mxu0 %v925_v40 }
  0x25   :  { %866 = vmatpush3.bf16.msra.mxu1 %v926_v41  ;;  %845 = vmatprep.subr.bf16.mxu0 %v927_v42 }
  0x26   :  { %867 = vmatprep.subr.bf16.mxu1 %v928_v43  ;;  %668 = vmatprep.mubr.bf16.mxu0 %v732_v8 }
  0x27   :  { %708 = vmatprep.mubr.bf16.mxu1 %v734_v11 }
  0x28   :  { %846 = vmatpush3.bf16.msra.mxu0 %v929_v44 }
  0x29   :  { %868 = vmatpush3.bf16.msra.mxu1 %v930_v45  ;;  %847 = vmatprep.subr.bf16.mxu0 %v931_v46 }
  0x2a   :  { %869 = vmatprep.subr.bf16.mxu1 %v932_v47 }
  0x2c   :  { %848 = vmatpush3.bf16.msra.mxu0 %v933_v48 }
  0x2d   :  { %870 = vmatpush3.bf16.msra.mxu1 %v934_v49  ;;  %849 = vmatprep.subr.bf16.mxu0 %v935_v50 }
  0x2e   :  { %871 = vmatprep.subr.bf16.mxu1 %v936_v51 }
  0x30   :  { %850 = vmatpush3.bf16.msra.mxu0 %v937_v52 }
  0x31   :  { %872 = vmatpush3.bf16.msra.mxu1 %v938_v53  ;;  %851 = vmatprep.subr.bf16.mxu0 %v939_v54 }
  0x32   :  { %873 = vmatprep.subr.bf16.mxu1 %v940_v55 }
  0x34   :  { %852 = vmatpush3.bf16.msra.mxu0 %v941_v56 }
  0x35   :  { %874 = vmatpush3.bf16.msra.mxu1 %v942_v57  ;;  %853 = vmatprep.subr.bf16.mxu0 %v943_v58 }
  0x36   :  { %875 = vmatprep.subr.bf16.mxu1 %v944_v59 }
  0x38   :  { %854 = vmatpush3.bf16.msra.mxu0 %v945_v60 }
  0x39   :  { %876 = vmatpush3.bf16.msra.mxu1 %v946_v61  ;;  %855 = vmatprep.subr.bf16.mxu0 %v947_v62 }
  0x3a   :  { %877 = vmatprep.subr.bf16.mxu1 %v948_v63 }
  0x3c   :  { %856 = vmatpush3.bf16.msra.mxu0 %v949_v0 }
  0x3d   :  { %878 = vmatpush3.bf16.msra.mxu1 %v950_v1  ;;  %857 = vmatprep.subr.bf16.mxu0 %v951_v2 }
  0x3e   :  { %879 = vmatprep.subr.bf16.mxu1 %v952_v3 }
  0x40   :  { %858 = vmatpush3.bf16.msra.mxu0 %v953_v4 }
  0x41   :  { %880 = vmatpush3.bf16.msra.mxu1 %v954_v5 }
  0x43   :  { %669 = vmatmul.mubr.bf16.vlgmr.msra.gmra.mrb[4].mxu0 %v731_v7 }
  0x44   :  { %709 = vmatmul.mubr.bf16.vlgmr.msra.gmra.mrb[4].mxu1 %v733_v10 }
  0xf6   :  { %v815_v12 = vpop.f32.mrb[0].mxu0 }
  0xf7   :  { %v837_v13 = vpop.f32.mrb[0].mxu1  ;;  %v816_v14 = vpop.f32.mrb[1].mxu0 }
  0xf8   :  { %v838_v15 = vpop.f32.mrb[1].mxu1  ;;  %v817_v16 = vadd.f32 %v816_v14, %v815_v12  ;;  %v818_v18 = vpop.f32.mrb[2].mxu0 }
  0xf9   :  { %v839_v17 = vadd.f32 %v838_v15, %v837_v13  ;;  %v840_v19 = vpop.f32.mrb[2].mxu1  ;;  %v819_v20 = vpop.f32.mrb[3].mxu0 }
  0xfa   :  { %v841_v21 = vpop.f32.mrb[3].mxu1 }
  0xfb   :  { %v631_v22 = vadd.f32 %v839_v17, %v817_v16 }
 0x116   :  { %v859_v23 = vpop.f32.mrb[4].mxu0 }
 0x117   :  { %v881_v24 = vpop.f32.mrb[4].mxu1  ;;  %v860_v25 = vpop.f32.mrb[5].mxu0 }
 0x118   :  { %v882_v26 = vpop.f32.mrb[5].mxu1  ;;  %v861_v27 = vadd.f32 %v860_v25, %v859_v23  ;;  %v862_v29 = vpop.f32.mrb[6].mxu0 }
 0x119   :  { %v883_v28 = vadd.f32 %v882_v26, %v881_v24  ;;  %v884_v30 = vpop.f32.mrb[6].mxu1  ;;  %v863_v31 = vpop.f32.mrb[7].mxu0 }
 0x11a   :  { %v885_v32 = vpop.f32.mrb[7].mxu1  ;;  %v671_v33 = vadd.f32 %v861_v27, %v631_v22 }
 0x11c   :  { %v711_v34 = vadd.f32 %v883_v28, %v671_v33 }
 0x11e   :  { %v716_v35 = vsub.f32 0.0, %v711_v34 }
 0x120   :  { %v717_v36 = vmul.f32 1.442695, %v716_v35 }
 0x122   :  { %959 = vpow2.f32 %v717_v36 }
 0x12c   :  { %v960_v37 = vpop.eup %959 }
 0x12d   :  { %v719_v38 = vadd.f32 1.0, %v960_v37 }
 0x12f   :  { %961 = vrcp.f32 %v719_v38 }
 0x139   :  { %v962_v39 = vpop.eup %961 }
 0x13a   :  { %722 = vst [vmem:[%s1187_s2] sm:$0xff] %v962_v39 }

</bundles_post_ra>
